<compile_context>
chip_gen: v6e
topology: v6e:2x2x1
jax: 0.10.0
libtpu: 0.0.40
codegen_flags: <defaults>
</compile_context>

<pallas_src>
import math
from functools import partial

import numpy as np
import jax
import jax.numpy as jnp
from jax.experimental import pallas as pl
from jax.experimental.pallas import tpu as pltpu


# ----------------------------------------------------------------------------
# small helpers
# ----------------------------------------------------------------------------

def _pick_batch_tile(B, per_sample_bytes, budget_bytes=6 << 20, cap=64):
    """Largest divisor of B (<= cap) whose block stays under the VMEM budget."""
    best = 1
    for t in range(1, min(B, cap) + 1):
        if B % t == 0 and t * per_sample_bytes <= budget_bytes:
            best = t
    return best


def _max2(x):
    return jnp.max(jnp.max(x, axis=-1, keepdims=True), axis=-2, keepdims=True)


def _sum2(x):
    return jnp.sum(jnp.sum(x, axis=-1, keepdims=True), axis=-2, keepdims=True)


def _min2(x):
    return jnp.min(jnp.min(x, axis=-1, keepdims=True), axis=-2, keepdims=True)


def _toeplitz_weight(Wt, Wp, Wh, KS, dtype):
    """Banded block-Toeplitz conv weight.

    A[kh, wp*Cin+ci, s*Wh*Cout + jo*Cout + co] = Wt[co, ci, kh, wp-(2*jo+s)]
    (zero outside the 5-tap band).  With this weight, one matmul per (kh,
    h-parity) computes the whole width of the conv for BOTH w-pool parities,
    with the contraction folded over (kw, Cin) and a lane-dense output.
    """
    Cout, Cin = int(Wt.shape[0]), int(Wt.shape[1])
    wp = np.arange(Wp)[:, None, None]
    s = np.arange(2)[None, :, None]
    jo = np.arange(Wh)[None, None, :]
    kw = wp - (2 * jo + s)                               # (Wp, 2, Wh)
    valid = (kw >= 0) & (kw < KS)
    kw_c = np.clip(kw, 0, KS - 1)
    Wg = Wt[:, :, :, kw_c]                               # (Cout, Cin, KS, Wp, 2, Wh)
    Wg = jnp.where(jnp.asarray(valid)[None, None, None], Wg, 0.0)
    A = jnp.transpose(Wg, (2, 3, 1, 4, 5, 0))            # (KS, Wp, Cin, 2, Wh, Cout)
    return A.reshape(KS, Wp * Cin, 2 * Wh * Cout).astype(dtype)


# ----------------------------------------------------------------------------
# shared conv(5x5,p=2) + bias + ReLU + maxpool(2x2/2) body
# ----------------------------------------------------------------------------

def _conv_pool_compute(x_ref, A_ref, bcols_ref, *, KS, Hh):
    # x_ref:  (TB, Hp2, 2, Wp*Cin)  padded rows, split by row parity, (w,c) packed
    # A_ref:  (KS, Wp*Cin, 2*Wh*Cout)  banded Toeplitz weight (bf16)
    # bcols:  (1, Wh*Cout)  bias tiled over the packed (w, c) lane dim
    # returns pooled ReLU'd activations, shape (TB*Hh, Wh*Cout), f32
    TB = x_ref.shape[0]
    Kdim = x_ref.shape[3]
    Ncols = A_ref.shape[2]
    NH = Ncols // 2
    M = TB * Hh

    def parity_conv(r):
        acc = jnp.zeros((M, Ncols), jnp.float32)
        for kh in range(KS):
            t = r + kh
            lhs = x_ref[:, t // 2:t // 2 + Hh, t % 2, :].reshape(M, Kdim)
            acc = acc + jnp.dot(lhs, A_ref[kh],
                                preferred_element_type=jnp.float32)
        return acc

    ym = jnp.maximum(parity_conv(0), parity_conv(1))     # max over h-parity
    pooled = jnp.maximum(ym[:, :NH], ym[:, NH:])         # max over w-parity
    return jnp.maximum(pooled + bcols_ref[...], 0.0)     # bias + ReLU


# ----------------------------------------------------------------------------
# kernel 1: conv1 + ReLU + pool  ->  lane-dense bf16 slab
# ----------------------------------------------------------------------------

def _conv1_kernel(x_ref, A_ref, bcols_ref, o_ref, *, KS):
    TB, Hh, NH = o_ref.shape
    pooled = _conv_pool_compute(x_ref, A_ref, bcols_ref, KS=KS, Hh=Hh)
    o_ref[...] = pooled.reshape(TB, Hh, NH).astype(o_ref.dtype)


def conv_relu_pool(x_nhwc, Wt, b, *, ksize=5, pad=2, out_dtype=jnp.bfloat16):
    """x: (B, H, W, Cin).  Returns packed (B, H/2, (W/2)*Cout) activations."""
    B, H, W, Cin = x_nhwc.shape
    Cout = int(Wt.shape[0])
    Hh, Wh = H // 2, W // 2
    Hp, Wp = H + 2 * pad, W + 2 * pad
    Hp2 = Hp // 2
    Kdim = Wp * Cin
    NH = Wh * Cout

    xp = jnp.pad(x_nhwc, ((0, 0), (pad, pad), (pad, pad), (0, 0)))
    xps = xp.reshape(B, Hp2, 2, Kdim).astype(jnp.bfloat16)   # pure reshape, no copy
    A = _toeplitz_weight(Wt, Wp, Wh, ksize, jnp.bfloat16)
    bcols = jnp.tile(b, Wh).reshape(1, NH).astype(jnp.float32)

    per_sample = (Hp2 * 2 * Kdim + Hh * NH) * 2 + Hh * (2 * NH) * 4 * 3
    TB = _pick_batch_tile(B, per_sample)

    return pl.pallas_call(
        partial(_conv1_kernel, KS=ksize),
        out_shape=jax.ShapeDtypeStruct((B, Hh, NH), out_dtype),
        grid=(B // TB,),
        in_specs=[
            pl.BlockSpec((TB, Hp2, 2, Kdim), lambda i: (i, 0, 0, 0)),
            pl.BlockSpec((ksize, Kdim, 2 * NH), lambda i: (0, 0, 0)),
            pl.BlockSpec((1, NH), lambda i: (0, 0)),
        ],
        out_specs=pl.BlockSpec((TB, Hh, NH), lambda i: (i, 0, 0)),
        compiler_params=pltpu.CompilerParams(
            dimension_semantics=("parallel",),
            vmem_limit_bytes=48 * 1024 * 1024),
    )(xps, A, bcols)


# ----------------------------------------------------------------------------
# kernel 2: conv2 + ReLU + pool + 1x1 conv + log-softmax + gumbel gate + top-K
# ----------------------------------------------------------------------------

def _conv2_tail_kernel(x_ref, A_ref, bcols_ref, w3_ref, b3_ref, g_ref,
                       p_ref, zh_ref, zf_ref, *, KS, tau, K):
    TB, Hh, Wh = p_ref.shape
    D = Hh * Wh

    pooled = _conv_pool_compute(x_ref, A_ref, bcols_ref, KS=KS, Hh=Hh)  # (TB*Hh, Wh*C2)

    # 1x1 conv (16 -> 1) as a block-diagonal matmul: (TB*Hh, Wh*C2) @ (Wh*C2, Wh)
    logits = jnp.dot(pooled.astype(w3_ref.dtype), w3_ref[...],
                     preferred_element_type=jnp.float32) + b3_ref[...]
    logits = logits.reshape(TB, Hh, Wh)

    # log-softmax over all D = Hh*Wh positions
    m = _max2(logits)
    ex = jnp.exp(logits - m)
    p = logits - m - jnp.log(_sum2(ex))
    p_ref[...] = p

    # gumbel-softmax soft gate: sum of K samples, then sigmoid((V - .5) * 10)
    gl = (p[:, None, :, :] + g_ref[...]) * (1.0 / tau)   # (TB, K, Hh, Wh)
    gm = _max2(gl)
    ge = jnp.exp(gl - gm)
    V = jnp.sum(ge / _sum2(ge), axis=1)                  # (TB, Hh, Wh)
    zh_ref[...] = 1.0 / (1.0 + jnp.exp(-(V - 0.5) * 10.0))

    # exact top-K one-hot mask of p (ties -> lowest flat index)
    pos = (jax.lax.broadcasted_iota(jnp.int32, (TB, Hh, Wh), 1) * Wh
           + jax.lax.broadcasted_iota(jnp.int32, (TB, Hh, Wh), 2)).astype(jnp.float32)
    work = p
    mask = jnp.zeros_like(p)
    for _ in range(K):
        cur = _max2(work)
        first = _min2(jnp.where(work == cur, pos, jnp.float32(D)))
        hit = (pos == first).astype(jnp.float32)
        mask = mask + hit
        work = jnp.where(hit > 0.5, jnp.float32(-1e30), work)
    zf_ref[...] = mask


def conv2_tail(h1_packed, C1, Wt2, b2, w3, b3, gumbel, *, ksize=5, pad=2, tau, K):
    """h1_packed: (B, Hin, Win*C1) bf16.  Returns (p_i, Z_hat, Z_hat_fixed)."""
    B, Hin, WC = h1_packed.shape
    Win = WC // C1
    C2 = int(Wt2.shape[0])
    Hh, Wh = Hin // 2, Win // 2
    Hp, Wp = Hin + 2 * pad, Win + 2 * pad
    Hp2 = Hp // 2
    Kdim = Wp * C1
    NH = Wh * C2
    D = Hh * Wh

    h1 = h1_packed.reshape(B, Hin, Win, C1)
    h1p = jnp.pad(h1, ((0, 0), (pad, pad), (pad, pad), (0, 0)))
    xps = h1p.reshape(B, Hp2, 2, Kdim)                       # bf16, pure reshape
    A = _toeplitz_weight(Wt2, Wp, Wh, ksize, jnp.bfloat16)
    bcols = jnp.tile(b2, Wh).reshape(1, NH).astype(jnp.float32)

    w3v = w3.reshape(-1).astype(jnp.bfloat16)                # (C2,)
    eye = jnp.eye(Wh, dtype=jnp.bfloat16)
    w3blk = (eye[:, None, :] * w3v[None, :, None]).reshape(NH, Wh)
    b3row = jnp.broadcast_to(b3.reshape(1, 1).astype(jnp.float32), (1, Wh))

    g = gumbel.astype(jnp.float32)                           # (B, K, Hh, Wh)

    per_sample = (Hp2 * 2 * Kdim) * 2 + Hh * (2 * NH) * 4 * 4 + (K + 4) * D * 4
    TB = _pick_batch_tile(B, per_sample)

    p3, zh3, zf3 = pl.pallas_call(
        partial(_conv2_tail_kernel, KS=ksize, tau=float(tau), K=int(K)),
        out_shape=(
            jax.ShapeDtypeStruct((B, Hh, Wh), jnp.float32),
            jax.ShapeDtypeStruct((B, Hh, Wh), jnp.float32),
            jax.ShapeDtypeStruct((B, Hh, Wh), jnp.float32),
        ),
        grid=(B // TB,),
        in_specs=[
            pl.BlockSpec((TB, Hp2, 2, Kdim), lambda i: (i, 0, 0, 0)),
            pl.BlockSpec((ksize, Kdim, 2 * NH), lambda i: (0, 0, 0)),
            pl.BlockSpec((1, NH), lambda i: (0, 0)),
            pl.BlockSpec((NH, Wh), lambda i: (0, 0)),
            pl.BlockSpec((1, Wh), lambda i: (0, 0)),
            pl.BlockSpec((TB, K, Hh, Wh), lambda i: (i, 0, 0, 0)),
        ],
        out_specs=(
            pl.BlockSpec((TB, Hh, Wh), lambda i: (i, 0, 0)),
            pl.BlockSpec((TB, Hh, Wh), lambda i: (i, 0, 0)),
            pl.BlockSpec((TB, Hh, Wh), lambda i: (i, 0, 0)),
        ),
        compiler_params=pltpu.CompilerParams(
            dimension_semantics=("parallel",),
            vmem_limit_bytes=48 * 1024 * 1024),
    )(xps, A, bcols, w3blk, b3row, g)

    return p3.reshape(B, D), zh3.reshape(B, 1, D), zf3.reshape(B, 1, D)


# ----------------------------------------------------------------------------
# forward pass
# ----------------------------------------------------------------------------

def featureselector_forward(x_nchw, params, *, tau, K, seed):
    x = jnp.transpose(x_nchw, (0, 2, 3, 1)).astype(jnp.float32)   # NCHW -> NHWC
    B, H, W, _ = x.shape
    assert H % 4 == 0 and W % 4 == 0, "H and W must be divisible by 4"
    Hh2, Wh2 = H // 4, W // 4
    C1 = int(params["w1"].shape[0])

    h1 = conv_relu_pool(x, params["w1"], params["b1"])            # (B, H/2, (W/2)*8) bf16

    # gumbel noise drawn once on the host side (tiny; portable across backends)
    gumbel = jax.random.gumbel(jax.random.PRNGKey(seed), (B, K, Hh2, Wh2),
                               dtype=jnp.float32)

    p_i, Z_hat, Z_fix = conv2_tail(h1, C1, params["w2"], params["b2"],
                                   params["w3"], params["b3"], gumbel,
                                   tau=tau, K=K)
    return p_i, Z_hat, Z_fix


# ----------------------------------------------------------------------------
# Deterministic parameter init (xavier_uniform, gain=sqrt(2); biases zero)
# ----------------------------------------------------------------------------

def init_params(key):
    def xavier(k, shape, fan_in, fan_out):
        bound = math.sqrt(2.0) * math.sqrt(6.0 / (fan_in + fan_out))
        return jax.random.uniform(k, shape, jnp.float32, -bound, bound)

    k1, k2, k3 = jax.random.split(key, 3)
    return {
        "w1": xavier(k1, (8, 3, 5, 5), 3 * 25, 8 * 25),
        "b1": jnp.zeros((8,), jnp.float32),
        "w2": xavier(k2, (16, 8, 5, 5), 8 * 25, 16 * 25),
        "b2": jnp.zeros((16,), jnp.float32),
        "w3": xavier(k3, (1, 16, 1, 1), 16, 1),
        "b3": jnp.zeros((1,), jnp.float32),
    }


if __name__ == "__main__":
    key = jax.random.PRNGKey(0)
    kx, kp = jax.random.split(key)

    # Small CIFAR-like input: NCHW (B=2, C=3, H=W=16)  ->  D = (16/4)^2 = 16
    x = jax.random.normal(kx, (2, 3, 16, 16), dtype=jnp.float32)
    params = init_params(kp)
    TAU, K = 0.5, 4

    fwd = jax.jit(partial(featureselector_forward, tau=TAU, K=K, seed=0))
    p_i, Z_hat, Z_hat_fixed = fwd(x, params)
    jax.block_until_ready((p_i, Z_hat, Z_hat_fixed))

    # sanity: shapes, valid log-probabilities, exact-K mask, bounded gate
    assert p_i.shape == (2, 16)
    assert Z_hat.shape == (2, 1, 16) and Z_hat_fixed.shape == (2, 1, 16)
    assert bool(jnp.all(jnp.isfinite(p_i)))
    assert bool(jnp.allclose(jnp.sum(jnp.exp(p_i), axis=-1), 1.0, atol=1e-3))
    assert bool(jnp.all(jnp.sum(Z_hat_fixed, axis=-1) == float(K)))
    assert bool(jnp.all((Z_hat > 0.0) & (Z_hat < 1.0)))

    print("KERNEL_OK")
</pallas_src>

<mosaic_0001>
module attributes {stable_mosaic.version = 11 : i64} {
  func.func @_conv1_kernel(%arg0: i32, %arg1: memref<2x10x2x60xbf16, #tpu.memory_space<vmem>>, %arg2: memref<5x60x128xbf16, #tpu.memory_space<vmem>>, %arg3: memref<1x64xf32, #tpu.memory_space<vmem>>, %arg4: memref<2x8x64xbf16, #tpu.memory_space<vmem>>) attributes {dimension_semantics = [#tpu.dimension_semantics<parallel>], iteration_bounds = array<i64: 1>, scalar_prefetch = 0 : i64, scratch_operands = 0 : i64, tpu.core_type = #tpu.core_type<tc>, window_params = [{transform_indices = @transform_0, window_bounds = array<i64: 2, 10, 2, 60>}, {pipeline_mode = #tpu.pipeline_mode<synchronous>, transform_indices = @transform_1, window_bounds = array<i64: 5, 60, 128>}, {pipeline_mode = #tpu.pipeline_mode<synchronous>, transform_indices = @transform_2, window_bounds = array<i64: 1, 64>}, {transform_indices = @transform_3, window_bounds = array<i64: 2, 8, 64>}]} {
    %cst = arith.constant 0.000000e+00 : f32
    %0 = vector.broadcast %cst : f32 to vector<16x128xf32>
    %c0 = arith.constant 0 : index
    %c0_0 = arith.constant 0 : index
    %c0_1 = arith.constant 0 : index
    %c0_2 = arith.constant 0 : index
    %1 = vector.load %arg1[%c0, %c0_0, %c0_1, %c0_2] : memref<2x10x2x60xbf16, #tpu.memory_space<vmem>>, vector<2x8x1x60xbf16>
    %2 = vector.shape_cast %1 : vector<2x8x1x60xbf16> to vector<2x8x60xbf16>
    %3 = vector.shape_cast %2 : vector<2x8x60xbf16> to vector<16x60xbf16>
    %c0_3 = arith.constant 0 : index
    %c0_4 = arith.constant 0 : index
    %c0_5 = arith.constant 0 : index
    %4 = vector.load %arg2[%c0_3, %c0_4, %c0_5] : memref<5x60x128xbf16, #tpu.memory_space<vmem>>, vector<1x60x128xbf16>
    %5 = vector.shape_cast %4 : vector<1x60x128xbf16> to vector<60x128xbf16>
    %cst_6 = arith.constant dense<0.000000e+00> : vector<16x128xf32>
    %6 = tpu.matmul %3, %5, %cst_6 {dimension_numbers = #tpu.dot_dimension_numbers<[1], [0], [0], [1], [0, 0, 1, 1], [], []>} : vector<16x60xbf16>, vector<60x128xbf16>, vector<16x128xf32> -> vector<16x128xf32>
    %7 = arith.addf %0, %6 : vector<16x128xf32>
    %c0_7 = arith.constant 0 : index
    %c0_8 = arith.constant 0 : index
    %c1 = arith.constant 1 : index
    %c0_9 = arith.constant 0 : index
    %8 = vector.load %arg1[%c0_7, %c0_8, %c1, %c0_9] : memref<2x10x2x60xbf16, #tpu.memory_space<vmem>>, vector<2x8x1x60xbf16>
    %9 = vector.shape_cast %8 : vector<2x8x1x60xbf16> to vector<2x8x60xbf16>
    %10 = vector.shape_cast %9 : vector<2x8x60xbf16> to vector<16x60xbf16>
    %c1_10 = arith.constant 1 : index
    %c0_11 = arith.constant 0 : index
    %c0_12 = arith.constant 0 : index
    %11 = vector.load %arg2[%c1_10, %c0_11, %c0_12] : memref<5x60x128xbf16, #tpu.memory_space<vmem>>, vector<1x60x128xbf16>
    %12 = vector.shape_cast %11 : vector<1x60x128xbf16> to vector<60x128xbf16>
    %cst_13 = arith.constant dense<0.000000e+00> : vector<16x128xf32>
    %13 = tpu.matmul %10, %12, %cst_13 {dimension_numbers = #tpu.dot_dimension_numbers<[1], [0], [0], [1], [0, 0, 1, 1], [], []>} : vector<16x60xbf16>, vector<60x128xbf16>, vector<16x128xf32> -> vector<16x128xf32>
    %14 = arith.addf %7, %13 : vector<16x128xf32>
    %c0_14 = arith.constant 0 : index
    %c1_15 = arith.constant 1 : index
    %c0_16 = arith.constant 0 : index
    %c0_17 = arith.constant 0 : index
    %15 = vector.load %arg1[%c0_14, %c1_15, %c0_16, %c0_17] : memref<2x10x2x60xbf16, #tpu.memory_space<vmem>>, vector<2x8x1x60xbf16>
    %16 = vector.shape_cast %15 : vector<2x8x1x60xbf16> to vector<2x8x60xbf16>
    %17 = vector.shape_cast %16 : vector<2x8x60xbf16> to vector<16x60xbf16>
    %c2 = arith.constant 2 : index
    %c0_18 = arith.constant 0 : index
    %c0_19 = arith.constant 0 : index
    %18 = vector.load %arg2[%c2, %c0_18, %c0_19] : memref<5x60x128xbf16, #tpu.memory_space<vmem>>, vector<1x60x128xbf16>
    %19 = vector.shape_cast %18 : vector<1x60x128xbf16> to vector<60x128xbf16>
    %cst_20 = arith.constant dense<0.000000e+00> : vector<16x128xf32>
    %20 = tpu.matmul %17, %19, %cst_20 {dimension_numbers = #tpu.dot_dimension_numbers<[1], [0], [0], [1], [0, 0, 1, 1], [], []>} : vector<16x60xbf16>, vector<60x128xbf16>, vector<16x128xf32> -> vector<16x128xf32>
    %21 = arith.addf %14, %20 : vector<16x128xf32>
    %c0_21 = arith.constant 0 : index
    %c1_22 = arith.constant 1 : index
    %c1_23 = arith.constant 1 : index
    %c0_24 = arith.constant 0 : index
    %22 = vector.load %arg1[%c0_21, %c1_22, %c1_23, %c0_24] : memref<2x10x2x60xbf16, #tpu.memory_space<vmem>>, vector<2x8x1x60xbf16>
    %23 = vector.shape_cast %22 : vector<2x8x1x60xbf16> to vector<2x8x60xbf16>
    %24 = vector.shape_cast %23 : vector<2x8x60xbf16> to vector<16x60xbf16>
    %c3 = arith.constant 3 : index
    %c0_25 = arith.constant 0 : index
    %c0_26 = arith.constant 0 : index
    %25 = vector.load %arg2[%c3, %c0_25, %c0_26] : memref<5x60x128xbf16, #tpu.memory_space<vmem>>, vector<1x60x128xbf16>
    %26 = vector.shape_cast %25 : vector<1x60x128xbf16> to vector<60x128xbf16>
    %cst_27 = arith.constant dense<0.000000e+00> : vector<16x128xf32>
    %27 = tpu.matmul %24, %26, %cst_27 {dimension_numbers = #tpu.dot_dimension_numbers<[1], [0], [0], [1], [0, 0, 1, 1], [], []>} : vector<16x60xbf16>, vector<60x128xbf16>, vector<16x128xf32> -> vector<16x128xf32>
    %28 = arith.addf %21, %27 : vector<16x128xf32>
    %c0_28 = arith.constant 0 : index
    %c2_29 = arith.constant 2 : index
    %c0_30 = arith.constant 0 : index
    %c0_31 = arith.constant 0 : index
    %29 = vector.load %arg1[%c0_28, %c2_29, %c0_30, %c0_31] : memref<2x10x2x60xbf16, #tpu.memory_space<vmem>>, vector<2x8x1x60xbf16>
    %30 = vector.shape_cast %29 : vector<2x8x1x60xbf16> to vector<2x8x60xbf16>
    %31 = vector.shape_cast %30 : vector<2x8x60xbf16> to vector<16x60xbf16>
    %c4 = arith.constant 4 : index
    %c0_32 = arith.constant 0 : index
    %c0_33 = arith.constant 0 : index
    %32 = vector.load %arg2[%c4, %c0_32, %c0_33] : memref<5x60x128xbf16, #tpu.memory_space<vmem>>, vector<1x60x128xbf16>
    %33 = vector.shape_cast %32 : vector<1x60x128xbf16> to vector<60x128xbf16>
    %cst_34 = arith.constant dense<0.000000e+00> : vector<16x128xf32>
    %34 = tpu.matmul %31, %33, %cst_34 {dimension_numbers = #tpu.dot_dimension_numbers<[1], [0], [0], [1], [0, 0, 1, 1], [], []>} : vector<16x60xbf16>, vector<60x128xbf16>, vector<16x128xf32> -> vector<16x128xf32>
    %35 = arith.addf %28, %34 : vector<16x128xf32>
    %cst_35 = arith.constant 0.000000e+00 : f32
    %36 = vector.broadcast %cst_35 : f32 to vector<16x128xf32>
    %c0_36 = arith.constant 0 : index
    %c0_37 = arith.constant 0 : index
    %c1_38 = arith.constant 1 : index
    %c0_39 = arith.constant 0 : index
    %37 = vector.load %arg1[%c0_36, %c0_37, %c1_38, %c0_39] : memref<2x10x2x60xbf16, #tpu.memory_space<vmem>>, vector<2x8x1x60xbf16>
    %38 = vector.shape_cast %37 : vector<2x8x1x60xbf16> to vector<2x8x60xbf16>
    %39 = vector.shape_cast %38 : vector<2x8x60xbf16> to vector<16x60xbf16>
    %c0_40 = arith.constant 0 : index
    %c0_41 = arith.constant 0 : index
    %c0_42 = arith.constant 0 : index
    %40 = vector.load %arg2[%c0_40, %c0_41, %c0_42] : memref<5x60x128xbf16, #tpu.memory_space<vmem>>, vector<1x60x128xbf16>
    %41 = vector.shape_cast %40 : vector<1x60x128xbf16> to vector<60x128xbf16>
    %cst_43 = arith.constant dense<0.000000e+00> : vector<16x128xf32>
    %42 = tpu.matmul %39, %41, %cst_43 {dimension_numbers = #tpu.dot_dimension_numbers<[1], [0], [0], [1], [0, 0, 1, 1], [], []>} : vector<16x60xbf16>, vector<60x128xbf16>, vector<16x128xf32> -> vector<16x128xf32>
    %43 = arith.addf %36, %42 : vector<16x128xf32>
    %c0_44 = arith.constant 0 : index
    %c1_45 = arith.constant 1 : index
    %c0_46 = arith.constant 0 : index
    %c0_47 = arith.constant 0 : index
    %44 = vector.load %arg1[%c0_44, %c1_45, %c0_46, %c0_47] : memref<2x10x2x60xbf16, #tpu.memory_space<vmem>>, vector<2x8x1x60xbf16>
    %45 = vector.shape_cast %44 : vector<2x8x1x60xbf16> to vector<2x8x60xbf16>
    %46 = vector.shape_cast %45 : vector<2x8x60xbf16> to vector<16x60xbf16>
    %c1_48 = arith.constant 1 : index
    %c0_49 = arith.constant 0 : index
    %c0_50 = arith.constant 0 : index
    %47 = vector.load %arg2[%c1_48, %c0_49, %c0_50] : memref<5x60x128xbf16, #tpu.memory_space<vmem>>, vector<1x60x128xbf16>
    %48 = vector.shape_cast %47 : vector<1x60x128xbf16> to vector<60x128xbf16>
    %cst_51 = arith.constant dense<0.000000e+00> : vector<16x128xf32>
    %49 = tpu.matmul %46, %48, %cst_51 {dimension_numbers = #tpu.dot_dimension_numbers<[1], [0], [0], [1], [0, 0, 1, 1], [], []>} : vector<16x60xbf16>, vector<60x128xbf16>, vector<16x128xf32> -> vector<16x128xf32>
    %50 = arith.addf %43, %49 : vector<16x128xf32>
    %c0_52 = arith.constant 0 : index
    %c1_53 = arith.constant 1 : index
    %c1_54 = arith.constant 1 : index
    %c0_55 = arith.constant 0 : index
    %51 = vector.load %arg1[%c0_52, %c1_53, %c1_54, %c0_55] : memref<2x10x2x60xbf16, #tpu.memory_space<vmem>>, vector<2x8x1x60xbf16>
    %52 = vector.shape_cast %51 : vector<2x8x1x60xbf16> to vector<2x8x60xbf16>
    %53 = vector.shape_cast %52 : vector<2x8x60xbf16> to vector<16x60xbf16>
    %c2_56 = arith.constant 2 : index
    %c0_57 = arith.constant 0 : index
    %c0_58 = arith.constant 0 : index
    %54 = vector.load %arg2[%c2_56, %c0_57, %c0_58] : memref<5x60x128xbf16, #tpu.memory_space<vmem>>, vector<1x60x128xbf16>
    %55 = vector.shape_cast %54 : vector<1x60x128xbf16> to vector<60x128xbf16>
    %cst_59 = arith.constant dense<0.000000e+00> : vector<16x128xf32>
    %56 = tpu.matmul %53, %55, %cst_59 {dimension_numbers = #tpu.dot_dimension_numbers<[1], [0], [0], [1], [0, 0, 1, 1], [], []>} : vector<16x60xbf16>, vector<60x128xbf16>, vector<16x128xf32> -> vector<16x128xf32>
    %57 = arith.addf %50, %56 : vector<16x128xf32>
    %c0_60 = arith.constant 0 : index
    %c2_61 = arith.constant 2 : index
    %c0_62 = arith.constant 0 : index
    %c0_63 = arith.constant 0 : index
    %58 = vector.load %arg1[%c0_60, %c2_61, %c0_62, %c0_63] : memref<2x10x2x60xbf16, #tpu.memory_space<vmem>>, vector<2x8x1x60xbf16>
    %59 = vector.shape_cast %58 : vector<2x8x1x60xbf16> to vector<2x8x60xbf16>
    %60 = vector.shape_cast %59 : vector<2x8x60xbf16> to vector<16x60xbf16>
    %c3_64 = arith.constant 3 : index
    %c0_65 = arith.constant 0 : index
    %c0_66 = arith.constant 0 : index
    %61 = vector.load %arg2[%c3_64, %c0_65, %c0_66] : memref<5x60x128xbf16, #tpu.memory_space<vmem>>, vector<1x60x128xbf16>
    %62 = vector.shape_cast %61 : vector<1x60x128xbf16> to vector<60x128xbf16>
    %cst_67 = arith.constant dense<0.000000e+00> : vector<16x128xf32>
    %63 = tpu.matmul %60, %62, %cst_67 {dimension_numbers = #tpu.dot_dimension_numbers<[1], [0], [0], [1], [0, 0, 1, 1], [], []>} : vector<16x60xbf16>, vector<60x128xbf16>, vector<16x128xf32> -> vector<16x128xf32>
    %64 = arith.addf %57, %63 : vector<16x128xf32>
    %c0_68 = arith.constant 0 : index
    %c2_69 = arith.constant 2 : index
    %c1_70 = arith.constant 1 : index
    %c0_71 = arith.constant 0 : index
    %65 = vector.load %arg1[%c0_68, %c2_69, %c1_70, %c0_71] : memref<2x10x2x60xbf16, #tpu.memory_space<vmem>>, vector<2x8x1x60xbf16>
    %66 = vector.shape_cast %65 : vector<2x8x1x60xbf16> to vector<2x8x60xbf16>
    %67 = vector.shape_cast %66 : vector<2x8x60xbf16> to vector<16x60xbf16>
    %c4_72 = arith.constant 4 : index
    %c0_73 = arith.constant 0 : index
    %c0_74 = arith.constant 0 : index
    %68 = vector.load %arg2[%c4_72, %c0_73, %c0_74] : memref<5x60x128xbf16, #tpu.memory_space<vmem>>, vector<1x60x128xbf16>
    %69 = vector.shape_cast %68 : vector<1x60x128xbf16> to vector<60x128xbf16>
    %cst_75 = arith.constant dense<0.000000e+00> : vector<16x128xf32>
    %70 = tpu.matmul %67, %69, %cst_75 {dimension_numbers = #tpu.dot_dimension_numbers<[1], [0], [0], [1], [0, 0, 1, 1], [], []>} : vector<16x60xbf16>, vector<60x128xbf16>, vector<16x128xf32> -> vector<16x128xf32>
    %71 = arith.addf %64, %70 : vector<16x128xf32>
    %72 = arith.maximumf %35, %71 : vector<16x128xf32>
    %73 = vector.extract_strided_slice %72 {offsets = [0, 0], sizes = [16, 64], strides = [1, 1]} : vector<16x128xf32> to vector<16x64xf32>
    %74 = vector.extract_strided_slice %72 {offsets = [0, 64], sizes = [16, 64], strides = [1, 1]} : vector<16x128xf32> to vector<16x64xf32>
    %75 = arith.maximumf %73, %74 : vector<16x64xf32>
    %c0_76 = arith.constant 0 : index
    %c0_77 = arith.constant 0 : index
    %76 = vector.load %arg3[%c0_76, %c0_77] : memref<1x64xf32, #tpu.memory_space<vmem>>, vector<1x64xf32>
    %77 = vector.broadcast %76 : vector<1x64xf32> to vector<16x64xf32>
    %78 = arith.addf %75, %77 : vector<16x64xf32>
    %cst_78 = arith.constant 0.000000e+00 : f32
    %79 = vector.broadcast %cst_78 : f32 to vector<16x64xf32>
    %80 = arith.maximumf %78, %79 : vector<16x64xf32>
    %81 = vector.shape_cast %80 : vector<16x64xf32> to vector<2x8x64xf32>
    %82 = arith.truncf %81 : vector<2x8x64xf32> to vector<2x8x64xbf16>
    %c0_79 = arith.constant 0 : index
    %c0_80 = arith.constant 0 : index
    %c0_81 = arith.constant 0 : index
    %83 = vector.load %arg4[%c0_79, %c0_80, %c0_81] : memref<2x8x64xbf16, #tpu.memory_space<vmem>>, vector<2x8x64xbf16>
    tpu.vector_store %arg4[%c0_79, %c0_80, %c0_81], %82 {strides = array<i32>} : memref<2x8x64xbf16, #tpu.memory_space<vmem>>, vector<2x8x64xbf16>,
    return
  }
  func.func @transform_0(%arg0: i32) -> (i32, i32, i32, i32) {
    %c0_i32 = arith.constant 0 : i32
    %c0_i32_0 = arith.constant 0 : i32
    %c0_i32_1 = arith.constant 0 : i32
    %c0_i32_2 = arith.constant 0 : i32
    return %arg0, %c0_i32, %c0_i32_0, %c0_i32_1 : i32, i32, i32, i32
  }
  func.func @transform_1(%arg0: i32) -> (i32, i32, i32) {
    %c0_i32 = arith.constant 0 : i32
    %c0_i32_0 = arith.constant 0 : i32
    %c0_i32_1 = arith.constant 0 : i32
    %c0_i32_2 = arith.constant 0 : i32
    return %c0_i32, %c0_i32_0, %c0_i32_1 : i32, i32, i32
  }
  func.func @transform_2(%arg0: i32) -> (i32, i32) {
    %c0_i32 = arith.constant 0 : i32
    %c0_i32_0 = arith.constant 0 : i32
    %c0_i32_1 = arith.constant 0 : i32
    return %c0_i32, %c0_i32_0 : i32, i32
  }
  func.func @transform_3(%arg0: i32) -> (i32, i32, i32) {
    %c0_i32 = arith.constant 0 : i32
    %c0_i32_0 = arith.constant 0 : i32
    %c0_i32_1 = arith.constant 0 : i32
    return %arg0, %c0_i32, %c0_i32_0 : i32, i32, i32
  }
}

module attributes {stable_mosaic.version = 11 : i64} {
  func.func @_conv2_tail_kernel(%arg0: i32, %arg1: memref<2x6x2x96xbf16, #tpu.memory_space<vmem>>, %arg2: memref<5x96x128xbf16, #tpu.memory_space<vmem>>, %arg3: memref<1x64xf32, #tpu.memory_space<vmem>>, %arg4: memref<64x4xbf16, #tpu.memory_space<vmem>>, %arg5: memref<1x4xf32, #tpu.memory_space<vmem>>, %arg6: memref<2x4x4x4xf32, #tpu.memory_space<vmem>>, %arg7: memref<2x4x4xf32, #tpu.memory_space<vmem>>, %arg8: memref<2x4x4xf32, #tpu.memory_space<vmem>>, %arg9: memref<2x4x4xf32, #tpu.memory_space<vmem>>) attributes {dimension_semantics = [#tpu.dimension_semantics<parallel>], iteration_bounds = array<i64: 1>, scalar_prefetch = 0 : i64, scratch_operands = 0 : i64, tpu.core_type = #tpu.core_type<tc>, window_params = [{transform_indices = @transform_0, window_bounds = array<i64: 2, 6, 2, 96>}, {pipeline_mode = #tpu.pipeline_mode<synchronous>, transform_indices = @transform_1, window_bounds = array<i64: 5, 96, 128>}, {pipeline_mode = #tpu.pipeline_mode<synchronous>, transform_indices = @transform_2, window_bounds = array<i64: 1, 64>}, {pipeline_mode = #tpu.pipeline_mode<synchronous>, transform_indices = @transform_3, window_bounds = array<i64: 64, 4>}, {pipeline_mode = #tpu.pipeline_mode<synchronous>, transform_indices = @transform_4, window_bounds = array<i64: 1, 4>}, {transform_indices = @transform_5, window_bounds = array<i64: 2, 4, 4, 4>}, {transform_indices = @transform_6, window_bounds = array<i64: 2, 4, 4>}, {transform_indices = @transform_7, window_bounds = array<i64: 2, 4, 4>}, {transform_indices = @transform_8, window_bounds = array<i64: 2, 4, 4>}]} {
    %cst = arith.constant 0.000000e+00 : f32
    %0 = vector.broadcast %cst : f32 to vector<8x128xf32>
    %c0 = arith.constant 0 : index
    %c0_0 = arith.constant 0 : index
    %c0_1 = arith.constant 0 : index
    %c0_2 = arith.constant 0 : index
    %1 = vector.load %arg1[%c0, %c0_0, %c0_1, %c0_2] : memref<2x6x2x96xbf16, #tpu.memory_space<vmem>>, vector<2x4x1x96xbf16>
    %2 = vector.shape_cast %1 : vector<2x4x1x96xbf16> to vector<2x4x96xbf16>
    %3 = vector.shape_cast %2 : vector<2x4x96xbf16> to vector<8x96xbf16>
    %c0_3 = arith.constant 0 : index
    %c0_4 = arith.constant 0 : index
    %c0_5 = arith.constant 0 : index
    %4 = vector.load %arg2[%c0_3, %c0_4, %c0_5] : memref<5x96x128xbf16, #tpu.memory_space<vmem>>, vector<1x96x128xbf16>
    %5 = vector.shape_cast %4 : vector<1x96x128xbf16> to vector<96x128xbf16>
    %cst_6 = arith.constant dense<0.000000e+00> : vector<8x128xf32>
    %6 = tpu.matmul %3, %5, %cst_6 {dimension_numbers = #tpu.dot_dimension_numbers<[1], [0], [0], [1], [0, 0, 1, 1], [], []>} : vector<8x96xbf16>, vector<96x128xbf16>, vector<8x128xf32> -> vector<8x128xf32>
    %7 = arith.addf %0, %6 : vector<8x128xf32>
    %c0_7 = arith.constant 0 : index
    %c0_8 = arith.constant 0 : index
    %c1 = arith.constant 1 : index
    %c0_9 = arith.constant 0 : index
    %8 = vector.load %arg1[%c0_7, %c0_8, %c1, %c0_9] : memref<2x6x2x96xbf16, #tpu.memory_space<vmem>>, vector<2x4x1x96xbf16>
    %9 = vector.shape_cast %8 : vector<2x4x1x96xbf16> to vector<2x4x96xbf16>
    %10 = vector.shape_cast %9 : vector<2x4x96xbf16> to vector<8x96xbf16>
    %c1_10 = arith.constant 1 : index
    %c0_11 = arith.constant 0 : index
    %c0_12 = arith.constant 0 : index
    %11 = vector.load %arg2[%c1_10, %c0_11, %c0_12] : memref<5x96x128xbf16, #tpu.memory_space<vmem>>, vector<1x96x128xbf16>
    %12 = vector.shape_cast %11 : vector<1x96x128xbf16> to vector<96x128xbf16>
    %cst_13 = arith.constant dense<0.000000e+00> : vector<8x128xf32>
    %13 = tpu.matmul %10, %12, %cst_13 {dimension_numbers = #tpu.dot_dimension_numbers<[1], [0], [0], [1], [0, 0, 1, 1], [], []>} : vector<8x96xbf16>, vector<96x128xbf16>, vector<8x128xf32> -> vector<8x128xf32>
    %14 = arith.addf %7, %13 : vector<8x128xf32>
    %c0_14 = arith.constant 0 : index
    %c1_15 = arith.constant 1 : index
    %c0_16 = arith.constant 0 : index
    %c0_17 = arith.constant 0 : index
    %15 = vector.load %arg1[%c0_14, %c1_15, %c0_16, %c0_17] : memref<2x6x2x96xbf16, #tpu.memory_space<vmem>>, vector<2x4x1x96xbf16>
    %16 = vector.shape_cast %15 : vector<2x4x1x96xbf16> to vector<2x4x96xbf16>
    %17 = vector.shape_cast %16 : vector<2x4x96xbf16> to vector<8x96xbf16>
    %c2 = arith.constant 2 : index
    %c0_18 = arith.constant 0 : index
    %c0_19 = arith.constant 0 : index
    %18 = vector.load %arg2[%c2, %c0_18, %c0_19] : memref<5x96x128xbf16, #tpu.memory_space<vmem>>, vector<1x96x128xbf16>
    %19 = vector.shape_cast %18 : vector<1x96x128xbf16> to vector<96x128xbf16>
    %cst_20 = arith.constant dense<0.000000e+00> : vector<8x128xf32>
    %20 = tpu.matmul %17, %19, %cst_20 {dimension_numbers = #tpu.dot_dimension_numbers<[1], [0], [0], [1], [0, 0, 1, 1], [], []>} : vector<8x96xbf16>, vector<96x128xbf16>, vector<8x128xf32> -> vector<8x128xf32>
    %21 = arith.addf %14, %20 : vector<8x128xf32>
    %c0_21 = arith.constant 0 : index
    %c1_22 = arith.constant 1 : index
    %c1_23 = arith.constant 1 : index
    %c0_24 = arith.constant 0 : index
    %22 = vector.load %arg1[%c0_21, %c1_22, %c1_23, %c0_24] : memref<2x6x2x96xbf16, #tpu.memory_space<vmem>>, vector<2x4x1x96xbf16>
    %23 = vector.shape_cast %22 : vector<2x4x1x96xbf16> to vector<2x4x96xbf16>
    %24 = vector.shape_cast %23 : vector<2x4x96xbf16> to vector<8x96xbf16>
    %c3 = arith.constant 3 : index
    %c0_25 = arith.constant 0 : index
    %c0_26 = arith.constant 0 : index
    %25 = vector.load %arg2[%c3, %c0_25, %c0_26] : memref<5x96x128xbf16, #tpu.memory_space<vmem>>, vector<1x96x128xbf16>
    %26 = vector.shape_cast %25 : vector<1x96x128xbf16> to vector<96x128xbf16>
    %cst_27 = arith.constant dense<0.000000e+00> : vector<8x128xf32>
    %27 = tpu.matmul %24, %26, %cst_27 {dimension_numbers = #tpu.dot_dimension_numbers<[1], [0], [0], [1], [0, 0, 1, 1], [], []>} : vector<8x96xbf16>, vector<96x128xbf16>, vector<8x128xf32> -> vector<8x128xf32>
    %28 = arith.addf %21, %27 : vector<8x128xf32>
    %c0_28 = arith.constant 0 : index
    %c2_29 = arith.constant 2 : index
    %c0_30 = arith.constant 0 : index
    %c0_31 = arith.constant 0 : index
    %29 = vector.load %arg1[%c0_28, %c2_29, %c0_30, %c0_31] : memref<2x6x2x96xbf16, #tpu.memory_space<vmem>>, vector<2x4x1x96xbf16>
    %30 = vector.shape_cast %29 : vector<2x4x1x96xbf16> to vector<2x4x96xbf16>
    %31 = vector.shape_cast %30 : vector<2x4x96xbf16> to vector<8x96xbf16>
    %c4 = arith.constant 4 : index
    %c0_32 = arith.constant 0 : index
    %c0_33 = arith.constant 0 : index
    %32 = vector.load %arg2[%c4, %c0_32, %c0_33] : memref<5x96x128xbf16, #tpu.memory_space<vmem>>, vector<1x96x128xbf16>
    %33 = vector.shape_cast %32 : vector<1x96x128xbf16> to vector<96x128xbf16>
    %cst_34 = arith.constant dense<0.000000e+00> : vector<8x128xf32>
    %34 = tpu.matmul %31, %33, %cst_34 {dimension_numbers = #tpu.dot_dimension_numbers<[1], [0], [0], [1], [0, 0, 1, 1], [], []>} : vector<8x96xbf16>, vector<96x128xbf16>, vector<8x128xf32> -> vector<8x128xf32>
    %35 = arith.addf %28, %34 : vector<8x128xf32>
    %cst_35 = arith.constant 0.000000e+00 : f32
    %36 = vector.broadcast %cst_35 : f32 to vector<8x128xf32>
    %c0_36 = arith.constant 0 : index
    %c0_37 = arith.constant 0 : index
    %c1_38 = arith.constant 1 : index
    %c0_39 = arith.constant 0 : index
    %37 = vector.load %arg1[%c0_36, %c0_37, %c1_38, %c0_39] : memref<2x6x2x96xbf16, #tpu.memory_space<vmem>>, vector<2x4x1x96xbf16>
    %38 = vector.shape_cast %37 : vector<2x4x1x96xbf16> to vector<2x4x96xbf16>
    %39 = vector.shape_cast %38 : vector<2x4x96xbf16> to vector<8x96xbf16>
    %c0_40 = arith.constant 0 : index
    %c0_41 = arith.constant 0 : index
    %c0_42 = arith.constant 0 : index
    %40 = vector.load %arg2[%c0_40, %c0_41, %c0_42] : memref<5x96x128xbf16, #tpu.memory_space<vmem>>, vector<1x96x128xbf16>
    %41 = vector.shape_cast %40 : vector<1x96x128xbf16> to vector<96x128xbf16>
    %cst_43 = arith.constant dense<0.000000e+00> : vector<8x128xf32>
    %42 = tpu.matmul %39, %41, %cst_43 {dimension_numbers = #tpu.dot_dimension_numbers<[1], [0], [0], [1], [0, 0, 1, 1], [], []>} : vector<8x96xbf16>, vector<96x128xbf16>, vector<8x128xf32> -> vector<8x128xf32>
    %43 = arith.addf %36, %42 : vector<8x128xf32>
    %c0_44 = arith.constant 0 : index
    %c1_45 = arith.constant 1 : index
    %c0_46 = arith.constant 0 : index
    %c0_47 = arith.constant 0 : index
    %44 = vector.load %arg1[%c0_44, %c1_45, %c0_46, %c0_47] : memref<2x6x2x96xbf16, #tpu.memory_space<vmem>>, vector<2x4x1x96xbf16>
    %45 = vector.shape_cast %44 : vector<2x4x1x96xbf16> to vector<2x4x96xbf16>
    %46 = vector.shape_cast %45 : vector<2x4x96xbf16> to vector<8x96xbf16>
    %c1_48 = arith.constant 1 : index
    %c0_49 = arith.constant 0 : index
    %c0_50 = arith.constant 0 : index
    %47 = vector.load %arg2[%c1_48, %c0_49, %c0_50] : memref<5x96x128xbf16, #tpu.memory_space<vmem>>, vector<1x96x128xbf16>
    %48 = vector.shape_cast %47 : vector<1x96x128xbf16> to vector<96x128xbf16>
    %cst_51 = arith.constant dense<0.000000e+00> : vector<8x128xf32>
    %49 = tpu.matmul %46, %48, %cst_51 {dimension_numbers = #tpu.dot_dimension_numbers<[1], [0], [0], [1], [0, 0, 1, 1], [], []>} : vector<8x96xbf16>, vector<96x128xbf16>, vector<8x128xf32> -> vector<8x128xf32>
    %50 = arith.addf %43, %49 : vector<8x128xf32>
    %c0_52 = arith.constant 0 : index
    %c1_53 = arith.constant 1 : index
    %c1_54 = arith.constant 1 : index
    %c0_55 = arith.constant 0 : index
    %51 = vector.load %arg1[%c0_52, %c1_53, %c1_54, %c0_55] : memref<2x6x2x96xbf16, #tpu.memory_space<vmem>>, vector<2x4x1x96xbf16>
    %52 = vector.shape_cast %51 : vector<2x4x1x96xbf16> to vector<2x4x96xbf16>
    %53 = vector.shape_cast %52 : vector<2x4x96xbf16> to vector<8x96xbf16>
    %c2_56 = arith.constant 2 : index
    %c0_57 = arith.constant 0 : index
    %c0_58 = arith.constant 0 : index
    %54 = vector.load %arg2[%c2_56, %c0_57, %c0_58] : memref<5x96x128xbf16, #tpu.memory_space<vmem>>, vector<1x96x128xbf16>
    %55 = vector.shape_cast %54 : vector<1x96x128xbf16> to vector<96x128xbf16>
    %cst_59 = arith.constant dense<0.000000e+00> : vector<8x128xf32>
    %56 = tpu.matmul %53, %55, %cst_59 {dimension_numbers = #tpu.dot_dimension_numbers<[1], [0], [0], [1], [0, 0, 1, 1], [], []>} : vector<8x96xbf16>, vector<96x128xbf16>, vector<8x128xf32> -> vector<8x128xf32>
    %57 = arith.addf %50, %56 : vector<8x128xf32>
    %c0_60 = arith.constant 0 : index
    %c2_61 = arith.constant 2 : index
    %c0_62 = arith.constant 0 : index
    %c0_63 = arith.constant 0 : index
    %58 = vector.load %arg1[%c0_60, %c2_61, %c0_62, %c0_63] : memref<2x6x2x96xbf16, #tpu.memory_space<vmem>>, vector<2x4x1x96xbf16>
    %59 = vector.shape_cast %58 : vector<2x4x1x96xbf16> to vector<2x4x96xbf16>
    %60 = vector.shape_cast %59 : vector<2x4x96xbf16> to vector<8x96xbf16>
    %c3_64 = arith.constant 3 : index
    %c0_65 = arith.constant 0 : index
    %c0_66 = arith.constant 0 : index
    %61 = vector.load %arg2[%c3_64, %c0_65, %c0_66] : memref<5x96x128xbf16, #tpu.memory_space<vmem>>, vector<1x96x128xbf16>
    %62 = vector.shape_cast %61 : vector<1x96x128xbf16> to vector<96x128xbf16>
    %cst_67 = arith.constant dense<0.000000e+00> : vector<8x128xf32>
    %63 = tpu.matmul %60, %62, %cst_67 {dimension_numbers = #tpu.dot_dimension_numbers<[1], [0], [0], [1], [0, 0, 1, 1], [], []>} : vector<8x96xbf16>, vector<96x128xbf16>, vector<8x128xf32> -> vector<8x128xf32>
    %64 = arith.addf %57, %63 : vector<8x128xf32>
    %c0_68 = arith.constant 0 : index
    %c2_69 = arith.constant 2 : index
    %c1_70 = arith.constant 1 : index
    %c0_71 = arith.constant 0 : index
    %65 = vector.load %arg1[%c0_68, %c2_69, %c1_70, %c0_71] : memref<2x6x2x96xbf16, #tpu.memory_space<vmem>>, vector<2x4x1x96xbf16>
    %66 = vector.shape_cast %65 : vector<2x4x1x96xbf16> to vector<2x4x96xbf16>
    %67 = vector.shape_cast %66 : vector<2x4x96xbf16> to vector<8x96xbf16>
    %c4_72 = arith.constant 4 : index
    %c0_73 = arith.constant 0 : index
    %c0_74 = arith.constant 0 : index
    %68 = vector.load %arg2[%c4_72, %c0_73, %c0_74] : memref<5x96x128xbf16, #tpu.memory_space<vmem>>, vector<1x96x128xbf16>
    %69 = vector.shape_cast %68 : vector<1x96x128xbf16> to vector<96x128xbf16>
    %cst_75 = arith.constant dense<0.000000e+00> : vector<8x128xf32>
    %70 = tpu.matmul %67, %69, %cst_75 {dimension_numbers = #tpu.dot_dimension_numbers<[1], [0], [0], [1], [0, 0, 1, 1], [], []>} : vector<8x96xbf16>, vector<96x128xbf16>, vector<8x128xf32> -> vector<8x128xf32>
    %71 = arith.addf %64, %70 : vector<8x128xf32>
    %72 = arith.maximumf %35, %71 : vector<8x128xf32>
    %73 = vector.extract_strided_slice %72 {offsets = [0, 0], sizes = [8, 64], strides = [1, 1]} : vector<8x128xf32> to vector<8x64xf32>
    %74 = vector.extract_strided_slice %72 {offsets = [0, 64], sizes = [8, 64], strides = [1, 1]} : vector<8x128xf32> to vector<8x64xf32>
    %75 = arith.maximumf %73, %74 : vector<8x64xf32>
    %c0_76 = arith.constant 0 : index
    %c0_77 = arith.constant 0 : index
    %76 = vector.load %arg3[%c0_76, %c0_77] : memref<1x64xf32, #tpu.memory_space<vmem>>, vector<1x64xf32>
    %77 = vector.broadcast %76 : vector<1x64xf32> to vector<8x64xf32>
    %78 = arith.addf %75, %77 : vector<8x64xf32>
    %cst_78 = arith.constant 0.000000e+00 : f32
    %79 = vector.broadcast %cst_78 : f32 to vector<8x64xf32>
    %80 = arith.maximumf %78, %79 : vector<8x64xf32>
    %81 = arith.truncf %80 : vector<8x64xf32> to vector<8x64xbf16>
    %c0_79 = arith.constant 0 : index
    %c0_80 = arith.constant 0 : index
    %82 = vector.load %arg4[%c0_79, %c0_80] : memref<64x4xbf16, #tpu.memory_space<vmem>>, vector<64x4xbf16>
    %cst_81 = arith.constant dense<0.000000e+00> : vector<8x4xf32>
    %83 = tpu.matmul %81, %82, %cst_81 {dimension_numbers = #tpu.dot_dimension_numbers<[1], [0], [0], [1], [0, 0, 1, 1], [], []>} : vector<8x64xbf16>, vector<64x4xbf16>, vector<8x4xf32> -> vector<8x4xf32>
    %c0_82 = arith.constant 0 : index
    %c0_83 = arith.constant 0 : index
    %84 = vector.load %arg5[%c0_82, %c0_83] : memref<1x4xf32, #tpu.memory_space<vmem>>, vector<1x4xf32>
    %85 = vector.broadcast %84 : vector<1x4xf32> to vector<8x4xf32>
    %86 = arith.addf %83, %85 : vector<8x4xf32>
    %87 = vector.shape_cast %86 : vector<8x4xf32> to vector<2x4x4xf32>
    %cst_84 = arith.constant dense<0xFF800000> : vector<2x4xf32>
    %88 = vector.multi_reduction <maximumf>, %87, %cst_84 [2] : vector<2x4x4xf32> to vector<2x4xf32>
    %89 = vector.shape_cast %88 : vector<2x4xf32> to vector<2x4x1xf32>
    %cst_85 = arith.constant dense<0xFF800000> : vector<2x1xf32>
    %90 = vector.multi_reduction <maximumf>, %89, %cst_85 [1] : vector<2x4x1xf32> to vector<2x1xf32>
    %91 = vector.shape_cast %90 : vector<2x1xf32> to vector<2x1x1xf32>
    %92 = vector.broadcast %91 : vector<2x1x1xf32> to vector<2x4x4xf32>
    %93 = arith.subf %87, %92 : vector<2x4x4xf32>
    %94 = math.exp %93 : vector<2x4x4xf32>
    %95 = vector.broadcast %91 : vector<2x1x1xf32> to vector<2x4x4xf32>
    %96 = arith.subf %87, %95 : vector<2x4x4xf32>
    %cst_86 = arith.constant dense<0.000000e+00> : vector<2x4xf32>
    %97 = vector.multi_reduction <add>, %94, %cst_86 [2] : vector<2x4x4xf32> to vector<2x4xf32>
    %98 = vector.shape_cast %97 : vector<2x4xf32> to vector<2x4x1xf32>
    %cst_87 = arith.constant dense<0.000000e+00> : vector<2x1xf32>
    %99 = vector.multi_reduction <add>, %98, %cst_87 [1] : vector<2x4x1xf32> to vector<2x1xf32>
    %100 = vector.shape_cast %99 : vector<2x1xf32> to vector<2x1x1xf32>
    %101 = math.log %100 : vector<2x1x1xf32>
    %102 = vector.broadcast %101 : vector<2x1x1xf32> to vector<2x4x4xf32>
    %103 = arith.subf %96, %102 : vector<2x4x4xf32>
    %c0_88 = arith.constant 0 : index
    %c0_89 = arith.constant 0 : index
    %c0_90 = arith.constant 0 : index
    %104 = vector.load %arg7[%c0_88, %c0_89, %c0_90] : memref<2x4x4xf32, #tpu.memory_space<vmem>>, vector<2x4x4xf32>
    tpu.vector_store %arg7[%c0_88, %c0_89, %c0_90], %103 {strides = array<i32>} : memref<2x4x4xf32, #tpu.memory_space<vmem>>, vector<2x4x4xf32>,
    %105 = vector.shape_cast %103 : vector<2x4x4xf32> to vector<2x1x4x4xf32>
    %c0_91 = arith.constant 0 : index
    %c0_92 = arith.constant 0 : index
    %c0_93 = arith.constant 0 : index
    %c0_94 = arith.constant 0 : index
    %106 = vector.load %arg6[%c0_91, %c0_92, %c0_93, %c0_94] : memref<2x4x4x4xf32, #tpu.memory_space<vmem>>, vector<2x4x4x4xf32>
    %107 = vector.broadcast %105 : vector<2x1x4x4xf32> to vector<2x4x4x4xf32>
    %108 = arith.addf %107, %106 : vector<2x4x4x4xf32>
    %cst_95 = arith.constant 2.000000e+00 : f32
    %109 = vector.broadcast %cst_95 : f32 to vector<2x4x4x4xf32>
    %110 = arith.mulf %108, %109 : vector<2x4x4x4xf32>
    %cst_96 = arith.constant dense<0xFF800000> : vector<2x4x4xf32>
    %111 = vector.multi_reduction <maximumf>, %110, %cst_96 [3] : vector<2x4x4x4xf32> to vector<2x4x4xf32>
    %112 = vector.shape_cast %111 : vector<2x4x4xf32> to vector<2x4x4x1xf32>
    %cst_97 = arith.constant dense<0xFF800000> : vector<2x4x1xf32>
    %113 = vector.multi_reduction <maximumf>, %112, %cst_97 [2] : vector<2x4x4x1xf32> to vector<2x4x1xf32>
    %114 = vector.shape_cast %113 : vector<2x4x1xf32> to vector<2x4x1x1xf32>
    %115 = vector.broadcast %114 : vector<2x4x1x1xf32> to vector<2x4x4x4xf32>
    %116 = arith.subf %110, %115 : vector<2x4x4x4xf32>
    %117 = math.exp %116 : vector<2x4x4x4xf32>
    %cst_98 = arith.constant dense<0.000000e+00> : vector<2x4x4xf32>
    %118 = vector.multi_reduction <add>, %117, %cst_98 [3] : vector<2x4x4x4xf32> to vector<2x4x4xf32>
    %119 = vector.shape_cast %118 : vector<2x4x4xf32> to vector<2x4x4x1xf32>
    %cst_99 = arith.constant dense<0.000000e+00> : vector<2x4x1xf32>
    %120 = vector.multi_reduction <add>, %119, %cst_99 [2] : vector<2x4x4x1xf32> to vector<2x4x1xf32>
    %121 = vector.shape_cast %120 : vector<2x4x1xf32> to vector<2x4x1x1xf32>
    %122 = vector.broadcast %121 : vector<2x4x1x1xf32> to vector<2x4x4x4xf32>
    %123 = arith.divf %117, %122 : vector<2x4x4x4xf32>
    %cst_100 = arith.constant dense<0.000000e+00> : vector<2x4x4xf32>
    %124 = vector.multi_reduction <add>, %123, %cst_100 [1] : vector<2x4x4x4xf32> to vector<2x4x4xf32>
    %cst_101 = arith.constant 5.000000e-01 : f32
    %125 = vector.broadcast %cst_101 : f32 to vector<2x4x4xf32>
    %126 = arith.subf %124, %125 : vector<2x4x4xf32>
    %cst_102 = arith.constant 0.000000e+00 : f32
    %127 = vector.broadcast %cst_102 : f32 to vector<2x4x4xf32>
    %128 = arith.subf %127, %126 : vector<2x4x4xf32>
    %cst_103 = arith.constant 1.000000e+01 : f32
    %129 = vector.broadcast %cst_103 : f32 to vector<2x4x4xf32>
    %130 = arith.mulf %128, %129 : vector<2x4x4xf32>
    %131 = math.exp %130 : vector<2x4x4xf32>
    %cst_104 = arith.constant 1.000000e+00 : f32
    %132 = vector.broadcast %cst_104 : f32 to vector<2x4x4xf32>
    %133 = arith.addf %132, %131 : vector<2x4x4xf32>
    %cst_105 = arith.constant 1.000000e+00 : f32
    %134 = vector.broadcast %cst_105 : f32 to vector<2x4x4xf32>
    %135 = arith.divf %134, %133 : vector<2x4x4xf32>
    %c0_106 = arith.constant 0 : index
    %c0_107 = arith.constant 0 : index
    %c0_108 = arith.constant 0 : index
    %136 = vector.load %arg8[%c0_106, %c0_107, %c0_108] : memref<2x4x4xf32, #tpu.memory_space<vmem>>, vector<2x4x4xf32>
    tpu.vector_store %arg8[%c0_106, %c0_107, %c0_108], %135 {strides = array<i32>} : memref<2x4x4xf32, #tpu.memory_space<vmem>>, vector<2x4x4xf32>,
    %137 = tpu.iota {dimensions = array<i32: 1>} : vector<2x4x4xi32>
    %c4_i32 = arith.constant 4 : i32
    %138 = vector.broadcast %c4_i32 : i32 to vector<2x4x4xi32>
    %139 = arith.muli %137, %138 : vector<2x4x4xi32>
    %140 = tpu.iota {dimensions = array<i32: 2>} : vector<2x4x4xi32>
    %141 = arith.addi %139, %140 : vector<2x4x4xi32>
    %142 = arith.sitofp %141 : vector<2x4x4xi32> to vector<2x4x4xf32>
    %cst_109 = arith.constant 0.000000e+00 : f32
    %143 = vector.broadcast %cst_109 : f32 to vector<2x4x4xf32>
    %cst_110 = arith.constant dense<0xFF800000> : vector<2x4xf32>
    %144 = vector.multi_reduction <maximumf>, %103, %cst_110 [2] : vector<2x4x4xf32> to vector<2x4xf32>
    %145 = vector.shape_cast %144 : vector<2x4xf32> to vector<2x4x1xf32>
    %cst_111 = arith.constant dense<0xFF800000> : vector<2x1xf32>
    %146 = vector.multi_reduction <maximumf>, %145, %cst_111 [1] : vector<2x4x1xf32> to vector<2x1xf32>
    %147 = vector.shape_cast %146 : vector<2x1xf32> to vector<2x1x1xf32>
    %148 = vector.broadcast %147 : vector<2x1x1xf32> to vector<2x4x4xf32>
    %149 = arith.cmpf oeq, %103, %148 : vector<2x4x4xf32>
    %cst_112 = arith.constant 1.600000e+01 : f32
    %150 = vector.broadcast %cst_112 : f32 to vector<2x4x4xf32>
    %151 = arith.select %149, %142, %150 : vector<2x4x4xi1>, vector<2x4x4xf32>
    %cst_113 = arith.constant dense<0x7F800000> : vector<2x4xf32>
    %152 = vector.multi_reduction <minimumf>, %151, %cst_113 [2] : vector<2x4x4xf32> to vector<2x4xf32>
    %153 = vector.shape_cast %152 : vector<2x4xf32> to vector<2x4x1xf32>
    %cst_114 = arith.constant dense<0x7F800000> : vector<2x1xf32>
    %154 = vector.multi_reduction <minimumf>, %153, %cst_114 [1] : vector<2x4x1xf32> to vector<2x1xf32>
    %155 = vector.shape_cast %154 : vector<2x1xf32> to vector<2x1x1xf32>
    %156 = vector.broadcast %155 : vector<2x1x1xf32> to vector<2x4x4xf32>
    %157 = arith.cmpf oeq, %142, %156 : vector<2x4x4xf32>
    %158 = arith.extui %157 : vector<2x4x4xi1> to vector<2x4x4xi32>
    %159 = arith.sitofp %158 : vector<2x4x4xi32> to vector<2x4x4xf32>
    %160 = arith.addf %143, %159 : vector<2x4x4xf32>
    %cst_115 = arith.constant 5.000000e-01 : f32
    %161 = vector.broadcast %cst_115 : f32 to vector<2x4x4xf32>
    %162 = arith.cmpf ogt, %159, %161 : vector<2x4x4xf32>
    %cst_116 = arith.constant -1.000000e+30 : f32
    %163 = vector.broadcast %cst_116 : f32 to vector<2x4x4xf32>
    %164 = arith.select %162, %163, %103 : vector<2x4x4xi1>, vector<2x4x4xf32>
    %cst_117 = arith.constant dense<0xFF800000> : vector<2x4xf32>
    %165 = vector.multi_reduction <maximumf>, %164, %cst_117 [2] : vector<2x4x4xf32> to vector<2x4xf32>
    %166 = vector.shape_cast %165 : vector<2x4xf32> to vector<2x4x1xf32>
    %cst_118 = arith.constant dense<0xFF800000> : vector<2x1xf32>
    %167 = vector.multi_reduction <maximumf>, %166, %cst_118 [1] : vector<2x4x1xf32> to vector<2x1xf32>
    %168 = vector.shape_cast %167 : vector<2x1xf32> to vector<2x1x1xf32>
    %169 = vector.broadcast %168 : vector<2x1x1xf32> to vector<2x4x4xf32>
    %170 = arith.cmpf oeq, %164, %169 : vector<2x4x4xf32>
    %cst_119 = arith.constant 1.600000e+01 : f32
    %171 = vector.broadcast %cst_119 : f32 to vector<2x4x4xf32>
    %172 = arith.select %170, %142, %171 : vector<2x4x4xi1>, vector<2x4x4xf32>
    %cst_120 = arith.constant dense<0x7F800000> : vector<2x4xf32>
    %173 = vector.multi_reduction <minimumf>, %172, %cst_120 [2] : vector<2x4x4xf32> to vector<2x4xf32>
    %174 = vector.shape_cast %173 : vector<2x4xf32> to vector<2x4x1xf32>
    %cst_121 = arith.constant dense<0x7F800000> : vector<2x1xf32>
    %175 = vector.multi_reduction <minimumf>, %174, %cst_121 [1] : vector<2x4x1xf32> to vector<2x1xf32>
    %176 = vector.shape_cast %175 : vector<2x1xf32> to vector<2x1x1xf32>
    %177 = vector.broadcast %176 : vector<2x1x1xf32> to vector<2x4x4xf32>
    %178 = arith.cmpf oeq, %142, %177 : vector<2x4x4xf32>
    %179 = arith.extui %178 : vector<2x4x4xi1> to vector<2x4x4xi32>
    %180 = arith.sitofp %179 : vector<2x4x4xi32> to vector<2x4x4xf32>
    %181 = arith.addf %160, %180 : vector<2x4x4xf32>
    %cst_122 = arith.constant 5.000000e-01 : f32
    %182 = vector.broadcast %cst_122 : f32 to vector<2x4x4xf32>
    %183 = arith.cmpf ogt, %180, %182 : vector<2x4x4xf32>
    %cst_123 = arith.constant -1.000000e+30 : f32
    %184 = vector.broadcast %cst_123 : f32 to vector<2x4x4xf32>
    %185 = arith.select %183, %184, %164 : vector<2x4x4xi1>, vector<2x4x4xf32>
    %cst_124 = arith.constant dense<0xFF800000> : vector<2x4xf32>
    %186 = vector.multi_reduction <maximumf>, %185, %cst_124 [2] : vector<2x4x4xf32> to vector<2x4xf32>
    %187 = vector.shape_cast %186 : vector<2x4xf32> to vector<2x4x1xf32>
    %cst_125 = arith.constant dense<0xFF800000> : vector<2x1xf32>
    %188 = vector.multi_reduction <maximumf>, %187, %cst_125 [1] : vector<2x4x1xf32> to vector<2x1xf32>
    %189 = vector.shape_cast %188 : vector<2x1xf32> to vector<2x1x1xf32>
    %190 = vector.broadcast %189 : vector<2x1x1xf32> to vector<2x4x4xf32>
    %191 = arith.cmpf oeq, %185, %190 : vector<2x4x4xf32>
    %cst_126 = arith.constant 1.600000e+01 : f32
    %192 = vector.broadcast %cst_126 : f32 to vector<2x4x4xf32>
    %193 = arith.select %191, %142, %192 : vector<2x4x4xi1>, vector<2x4x4xf32>
    %cst_127 = arith.constant dense<0x7F800000> : vector<2x4xf32>
    %194 = vector.multi_reduction <minimumf>, %193, %cst_127 [2] : vector<2x4x4xf32> to vector<2x4xf32>
    %195 = vector.shape_cast %194 : vector<2x4xf32> to vector<2x4x1xf32>
    %cst_128 = arith.constant dense<0x7F800000> : vector<2x1xf32>
    %196 = vector.multi_reduction <minimumf>, %195, %cst_128 [1] : vector<2x4x1xf32> to vector<2x1xf32>
    %197 = vector.shape_cast %196 : vector<2x1xf32> to vector<2x1x1xf32>
    %198 = vector.broadcast %197 : vector<2x1x1xf32> to vector<2x4x4xf32>
    %199 = arith.cmpf oeq, %142, %198 : vector<2x4x4xf32>
    %200 = arith.extui %199 : vector<2x4x4xi1> to vector<2x4x4xi32>
    %201 = arith.sitofp %200 : vector<2x4x4xi32> to vector<2x4x4xf32>
    %202 = arith.addf %181, %201 : vector<2x4x4xf32>
    %cst_129 = arith.constant 5.000000e-01 : f32
    %203 = vector.broadcast %cst_129 : f32 to vector<2x4x4xf32>
    %204 = arith.cmpf ogt, %201, %203 : vector<2x4x4xf32>
    %cst_130 = arith.constant -1.000000e+30 : f32
    %205 = vector.broadcast %cst_130 : f32 to vector<2x4x4xf32>
    %206 = arith.select %204, %205, %185 : vector<2x4x4xi1>, vector<2x4x4xf32>
    %cst_131 = arith.constant dense<0xFF800000> : vector<2x4xf32>
    %207 = vector.multi_reduction <maximumf>, %206, %cst_131 [2] : vector<2x4x4xf32> to vector<2x4xf32>
    %208 = vector.shape_cast %207 : vector<2x4xf32> to vector<2x4x1xf32>
    %cst_132 = arith.constant dense<0xFF800000> : vector<2x1xf32>
    %209 = vector.multi_reduction <maximumf>, %208, %cst_132 [1] : vector<2x4x1xf32> to vector<2x1xf32>
    %210 = vector.shape_cast %209 : vector<2x1xf32> to vector<2x1x1xf32>
    %211 = vector.broadcast %210 : vector<2x1x1xf32> to vector<2x4x4xf32>
    %212 = arith.cmpf oeq, %206, %211 : vector<2x4x4xf32>
    %cst_133 = arith.constant 1.600000e+01 : f32
    %213 = vector.broadcast %cst_133 : f32 to vector<2x4x4xf32>
    %214 = arith.select %212, %142, %213 : vector<2x4x4xi1>, vector<2x4x4xf32>
    %cst_134 = arith.constant dense<0x7F800000> : vector<2x4xf32>
    %215 = vector.multi_reduction <minimumf>, %214, %cst_134 [2] : vector<2x4x4xf32> to vector<2x4xf32>
    %216 = vector.shape_cast %215 : vector<2x4xf32> to vector<2x4x1xf32>
    %cst_135 = arith.constant dense<0x7F800000> : vector<2x1xf32>
    %217 = vector.multi_reduction <minimumf>, %216, %cst_135 [1] : vector<2x4x1xf32> to vector<2x1xf32>
    %218 = vector.shape_cast %217 : vector<2x1xf32> to vector<2x1x1xf32>
    %219 = vector.broadcast %218 : vector<2x1x1xf32> to vector<2x4x4xf32>
    %220 = arith.cmpf oeq, %142, %219 : vector<2x4x4xf32>
    %221 = arith.extui %220 : vector<2x4x4xi1> to vector<2x4x4xi32>
    %222 = arith.sitofp %221 : vector<2x4x4xi32> to vector<2x4x4xf32>
    %223 = arith.addf %202, %222 : vector<2x4x4xf32>
    %c0_136 = arith.constant 0 : index
    %c0_137 = arith.constant 0 : index
    %c0_138 = arith.constant 0 : index
    %224 = vector.load %arg9[%c0_136, %c0_137, %c0_138] : memref<2x4x4xf32, #tpu.memory_space<vmem>>, vector<2x4x4xf32>
    tpu.vector_store %arg9[%c0_136, %c0_137, %c0_138], %223 {strides = array<i32>} : memref<2x4x4xf32, #tpu.memory_space<vmem>>, vector<2x4x4xf32>,
    return
  }
  func.func @transform_0(%arg0: i32) -> (i32, i32, i32, i32) {
    %c0_i32 = arith.constant 0 : i32
    %c0_i32_0 = arith.constant 0 : i32
    %c0_i32_1 = arith.constant 0 : i32
    %c0_i32_2 = arith.constant 0 : i32
    return %arg0, %c0_i32, %c0_i32_0, %c0_i32_1 : i32, i32, i32, i32
  }
  func.func @transform_1(%arg0: i32) -> (i32, i32, i32) {
    %c0_i32 = arith.constant 0 : i32
    %c0_i32_0 = arith.constant 0 : i32
    %c0_i32_1 = arith.constant 0 : i32
    %c0_i32_2 = arith.constant 0 : i32
    return %c0_i32, %c0_i32_0, %c0_i32_1 : i32, i32, i32
  }
  func.func @transform_2(%arg0: i32) -> (i32, i32) {
    %c0_i32 = arith.constant 0 : i32
    %c0_i32_0 = arith.constant 0 : i32
    %c0_i32_1 = arith.constant 0 : i32
    return %c0_i32, %c0_i32_0 : i32, i32
  }
  func.func @transform_3(%arg0: i32) -> (i32, i32) {
    %c0_i32 = arith.constant 0 : i32
    %c0_i32_0 = arith.constant 0 : i32
    %c0_i32_1 = arith.constant 0 : i32
    return %c0_i32, %c0_i32_0 : i32, i32
  }
  func.func @transform_4(%arg0: i32) -> (i32, i32) {
    %c0_i32 = arith.constant 0 : i32
    %c0_i32_0 = arith.constant 0 : i32
    %c0_i32_1 = arith.constant 0 : i32
    return %c0_i32, %c0_i32_0 : i32, i32
  }
  func.func @transform_5(%arg0: i32) -> (i32, i32, i32, i32) {
    %c0_i32 = arith.constant 0 : i32
    %c0_i32_0 = arith.constant 0 : i32
    %c0_i32_1 = arith.constant 0 : i32
    %c0_i32_2 = arith.constant 0 : i32
    return %arg0, %c0_i32, %c0_i32_0, %c0_i32_1 : i32, i32, i32, i32
  }
  func.func @transform_6(%arg0: i32) -> (i32, i32, i32) {
    %c0_i32 = arith.constant 0 : i32
    %c0_i32_0 = arith.constant 0 : i32
    %c0_i32_1 = arith.constant 0 : i32
    return %arg0, %c0_i32, %c0_i32_0 : i32, i32, i32
  }
  func.func @transform_7(%arg0: i32) -> (i32, i32, i32) {
    %c0_i32 = arith.constant 0 : i32
    %c0_i32_0 = arith.constant 0 : i32
    %c0_i32_1 = arith.constant 0 : i32
    return %arg0, %c0_i32, %c0_i32_0 : i32, i32, i32
  }
  func.func @transform_8(%arg0: i32) -> (i32, i32, i32) {
    %c0_i32 = arith.constant 0 : i32
    %c0_i32_0 = arith.constant 0 : i32
    %c0_i32_1 = arith.constant 0 : i32
    return %arg0, %c0_i32, %c0_i32_0 : i32, i32, i32
  }
}

</mosaic_0001>

<bundles_post_ra>
// kernel: tile.13
= control target key start
LH: loop header
LB: loop body
LE: loop exit
PB: predicated region body
PF: predicated region fallthrough
CT: control target
= control target key end

     0   :  { %s22_s0 = inlined_call_operand.vmem [shape: f32[8], index: 0, kind: input, shape index: {}]   ;;  %s23_s1 = inlined_call_operand.vmem [shape: f32[8,8], index: 1, kind: output, shape index: {}]  }
   0x1   :  { %v4_v0 = vld [vmem:[%s22_s0] ss:$0 sm:$0xff] }
   0x2   :  { %5 = vst [vmem:[%s23_s1] sm:$0xff] %v4_v0 }

// kernel: tile.14
= control target key start
LH: loop header
LB: loop body
LE: loop exit
PB: predicated region body
PF: predicated region fallthrough
CT: control target
= control target key end

     0   :  { %s69_s10 = smov 56   ;;  %s70_s11 = smov 40   ;;  %vm3_vm0 = vcmask 64512   ;;  %vm9_vm1 = vcmask 523712   ;;  %vm15_vm2 = vcmask 458112   ;;  %vm21_vm3 = vcmask 392512   ;;  %s113_s0 = inlined_call_operand.vmem [shape: f32[8,8], index: 0, kind: input, shape index: {}]   ;;  %s114_s1 = inlined_call_operand.vmem [shape: f32[1,64], index: 1, kind: output, shape index: {}]  }
   0x1   :  { %v55_v0 = vld [vmem:[%s113_s0 + $0x7] sm:$0x1]   ;;  %v57_v1 = vld [vmem:[%s113_s0 + $0x5] sm:$0x1]   ;;  %v56_v2 = vld [vmem:[%s113_s0 + $0x6] sm:$0x1]  }
   0x2   :  { %7 = vrot.lane.b32.xlu0 %v55_v0, %s69_s10  ;;  %19 = vrot.lane.b32.xlu1 %v57_v1, %s70_s11  ;;  %v58_v3 = vld [vmem:[%s113_s0 + $0x4] sm:$0x1]   ;;  %v2_v4 = vld [vmem:[%s113_s0] sm:$0x1]   ;;  %s71_s18 = smov 48   ;;  %s72_s19 = smov 32  }
   0x3   :  { %4 = vst.msk [vmem:[#allocation0] sm:$0x1] %vm3_vm0, %v2_v4   ;;  %v59_v5 = vld [vmem:[%s113_s0 + $0x3] sm:$0x1]   ;;  %v60_v6 = vld [vmem:[%s113_s0 + $0x2] sm:$0x1]  }
   0x4   :  { %s73_s24 = smov 24   ;;  %s74_s25 = smov 16   ;;  %v61_v7 = vld [vmem:[%s113_s0 + $0x1] sm:$0x1]   ;;  %vm27_vm4 = vcmask 326912   ;;  %vm33_vm5 = vcmask 261312  }
   0x5   :  { %s75_s0 = smov 8   ;;  %vm39_vm6 = vcmask 195712   ;;  %vm45_vm7 = vcmask 130112  }
   0x6   :  { %13 = vrot.lane.b32.xlu0 %v56_v2, %s71_s18  ;;  %25 = vrot.lane.b32.xlu1 %v58_v3, %s72_s19 }
   0xa   :  { %31 = vrot.lane.b32.xlu0 %v59_v5, %s73_s24  ;;  %37 = vrot.lane.b32.xlu1 %v60_v6, %s74_s25 }
   0xe   :  { %43 = vrot.lane.b32.xlu0 %v61_v7, %s75_s0 }
  0x74   :  { %v8_v8 = vpop.permute.xlu0 %7   ;;  %v20_v9 = vpop.permute.xlu1 %19  }
  0x75   :  { %10 = vst.msk [vmem:[#allocation0] sm:$0x1] %vm9_vm1, %v8_v8  }
  0x78   :  { %v14_v10 = vpop.permute.xlu0 %13   ;;  %v26_v11 = vpop.permute.xlu1 %25  }
  0x79   :  { %16 = vst.msk [vmem:[#allocation0] sm:$0x1] %vm15_vm2, %v14_v10  }
  0x7a   :  { %22 = vst.msk [vmem:[#allocation0] sm:$0x1] %vm21_vm3, %v20_v9  }
  0x7b   :  { %28 = vst.msk [vmem:[#allocation0] sm:$0x1] %vm27_vm4, %v26_v11  }
  0x7c   :  { %v32_v12 = vpop.permute.xlu0 %31   ;;  %v38_v13 = vpop.permute.xlu1 %37  }
  0x7d   :  { %34 = vst.msk [vmem:[#allocation0] sm:$0x1] %vm33_vm5, %v32_v12  }
  0x7e   :  { %40 = vst.msk [vmem:[#allocation0] sm:$0x1] %vm39_vm6, %v38_v13  }
  0x80   :  { %v44_v14 = vpop.permute.xlu0 %43  }
  0x81   :  { %46 = vst.msk [vmem:[#allocation0] sm:$0x1] %vm45_vm7, %v44_v14  }
  0x88   :  { %v51_v15 = vld [vmem:[#allocation0] sm:$0x1] }
  0x89   :  { %54 = vst [vmem:[%s114_s1] sm:$0x1] %v51_v15 }

// kernel: featureselector_forward.2
= control target key start
LH: loop header
LB: loop body
LE: loop exit
PB: predicated region body
PF: predicated region fallthrough
CT: control target
= control target key end

     0   :  { %vm367_vm0 = vcmask 1045504   ;;  %v2607_v0 = vmov 0.0   ;;  %v2608_v2 = vmov 1966171168   ;;  %v74_v4 = vlaneseq  ;;  %s3161_s1 = inlined_call_operand.vmem [shape: bf16[5,60,128], index: 1, kind: input, shape index: {}]   ;;  %s3162_s0 = inlined_call_operand.vmem [shape: bf16[2,10,2,60], index: 0, kind: input, shape index: {}]   ;;  %s3163_s2 = inlined_call_operand.vmem [shape: f32[1,64], index: 2, kind: input, shape index: {}]   ;;  %s3164_s3 = inlined_call_operand.vmem [shape: bf16[2,8,64], index: 3, kind: output, shape index: {}]  }
   0x1   :  { %2463 = vmatprep.subr.bf16.mxu0 %v2607_v0  ;;  %2475 = vmatprep.subr.bf16.mxu1 %v2607_v0  ;;  %v2587_v1 = vld [vmem:[%s3161_s1 + $0x38] sm:$0x3f]   ;;  %v72_v3 = vunpack.c.l.s4 %v2608_v2  ;;  %vm2609_vm1 = vmmov 0   ;;  %v2653_v9 = vld [vmem:[%s3161_s1 + $0x30] sm:$0xff]   ;;  %v2669_v13 = vld [vmem:[%s3161_s1 + $0x28] sm:$0xff]   ;;  %vm305_vm2 = vcmask 1041409  }
   0x2   :  { %v2588_v5 = vld [vmem:[%s3161_s1 + $0x18] sm:$0x3f]   ;;  %2471 = vmatprep.mubr.msk.bf16.mxu0 %vm2609_vm1, %v2607_v0  ;;  %2483 = vmatprep.mubr.msk.bf16.mxu1 %vm2609_vm1, %v2607_v0  ;;  %v2644_v6 = vsel %vm367_vm0, %v2587_v1, 0  ;;  %v2660_v10 = vld [vmem:[%s3161_s1 + $0x10] sm:$0xff]   ;;  %v75_v11 = vshrl.u32 %v74_v4, 7  ;;  %v2676_v14 = vld [vmem:[%s3161_s1 + $0x8] sm:$0xff]  }
   0x3   :  { %v73_v7 = vunpack.c.0.s8 %v72_v3  ;;  %2464 = vmatpush3.bf16.msra.mxu0 %v2644_v6  ;;  %v2648_v8 = vsel %vm367_vm0, %v2588_v5, 0  ;;  %v2214_v15 = vld.sshfl [vmem:[%s3162_s0] sm:$0x1 pattern:$0x75316420]  ;;  %vm308_vm3 = vcmask 1042434  }
   0x4   :  { %2476 = vmatpush3.bf16.msra.mxu1 %v2648_v8  ;;  %2465 = vmatprep.subr.bf16.mxu0 %v2607_v0  ;;  %v2685_v16 = vld [vmem:[%s3161_s1 + $0x20] sm:$0xff]   ;;  %vm311_vm4 = vcmask 1043459   ;;  %vm314_vm5 = vcmask 1044484   ;;  %vm317_vm6 = vcmask 1045509   ;;  %vm320_vm7 = vcmask 1046534  }
   0x5   :  { %2477 = vmatprep.subr.bf16.mxu1 %v2607_v0  ;;  %v2663_v12 = vsub.s32 %v73_v7, %v75_v11  ;;  %v2215_v17 = vld.sshfl [vmem:[%s3162_s0 + $0x1] sm:$0x1 pattern:$0x75316420]  ;;  %vm323_vm8 = vcmask 1047559   ;;  %vm363_vm9 = vcmask 490496  }
   0x6   :  { %v2694_v19 = vld [vmem:[%s3161_s1] sm:$0xff]   ;;  %v2222_v41 = vld.sshfl [vmem:[%s3162_s0 + $0xa] sm:$0x1 pattern:$0x75316420]  ;;  %vm2199_vm10 = vcmask 519168  }
   0x7   :  { %2466 = vmatpush3.bf16.msra.mxu0 %v2653_v9  ;;  %v77_v18 = vrot.slane %v2214_v15, %v2663_v12  ;;  %v2216_v20 = vld.sshfl [vmem:[%s3162_s0 + $0x2] sm:$0x1 pattern:$0x75316420]  ;;  %v91_v21 = vrot.slane %v2215_v17, %v2663_v12  ;;  %v189_v47 = vrot.slane %v2222_v41, %v2663_v12 }
   0x8   :  { %2478 = vmatpush3.bf16.msra.mxu1 %v2660_v10  ;;  %2467 = vmatprep.subr.bf16.mxu0 %v2607_v0  ;;  %v2217_v22 = vld.sshfl [vmem:[%s3162_s0 + $0x3] sm:$0x1 pattern:$0x75316420]  ;;  %v105_v23 = vrot.slane %v2216_v20, %v2663_v12 }
   0x9   :  { %2479 = vmatprep.subr.bf16.mxu1 %v2607_v0  ;;  %v288_v24 = vunpack.c.l.b16 %v77_v18  ;;  %v2218_v25 = vld.sshfl [vmem:[%s3162_s0 + $0x4] sm:$0x1 pattern:$0x75316420]  ;;  %v119_v26 = vrot.slane %v2217_v22, %v2663_v12  ;;  %v2711_v27 = vunpack.c.l.b16 %v91_v21  ;;  %v296_v58 = vunpack.c.l.b16 %v189_v47 }
   0xa   :  { %v2219_v28 = vld.sshfl [vmem:[%s3162_s0 + $0x5] sm:$0x1 pattern:$0x75316420]  ;;  %v133_v29 = vrot.slane %v2218_v25, %v2663_v12  ;;  %v2718_v30 = vunpack.c.l.b16 %v105_v23 }
   0xb   :  { %2468 = vmatpush3.bf16.msra.mxu0 %v2669_v13  ;;  %v304_v31 = vrot.slane %v288_v24, 1  ;;  %v2220_v32 = vld.sshfl [vmem:[%s3162_s0 + $0x6] sm:$0x1 pattern:$0x75316420]  ;;  %v147_v33 = vrot.slane %v2219_v28, %v2663_v12  ;;  %v2724_v34 = vunpack.c.l.b16 %v119_v26  ;;  %v412_v35 = vrot.slane %v2711_v27, 7 }
   0xc   :  { %2480 = vmatpush3.bf16.msra.mxu1 %v2676_v14  ;;  %2469 = vmatprep.subr.bf16.mxu0 %v2607_v0  ;;  %v2221_v36 = vld.sshfl [vmem:[%s3162_s0 + $0x7] sm:$0x1 pattern:$0x75316420]  ;;  %v161_v37 = vrot.slane %v2220_v32, %v2663_v12  ;;  %v2732_v38 = vunpack.c.l.b16 %v133_v29  ;;  %v307_v40 = vrot.slane %v2718_v30, 7  ;;  %v325_v11 = vrot.slane %v296_v58, 1 }
   0xd   :  { %2481 = vmatprep.subr.bf16.mxu1 %v2607_v0  ;;  %v306_v39 = vsel %vm305_vm2, %v2711_v27, %v304_v31  ;;  %v175_v42 = vrot.slane %v2221_v36, %v2663_v12  ;;  %v2743_v43 = vunpack.c.l.b16 %v147_v33  ;;  %v310_v44 = vrot.slane %v2724_v34, 6  ;;  %v2223_v46 = vld.sshfl [vmem:[%s3162_s0 + $0xb] sm:$0x1 pattern:$0x75316420] }
   0xe   :  { %v413_v45 = vsel %vm305_vm2, %v412_v35, %v288_v24  ;;  %v2752_v48 = vunpack.c.l.b16 %v161_v37  ;;  %v309_v49 = vsel %vm308_vm3, %v307_v40, %v306_v39  ;;  %v313_v50 = vrot.slane %v2732_v38, 5  ;;  %v2224_v51 = vld.sshfl [vmem:[%s3162_s0 + $0xc] sm:$0x1 pattern:$0x75316420] }
   0xf   :  { %2470 = vmatpush3.bf16.msra.mxu0 %v2685_v16  ;;  %v203_v52 = vrot.slane %v2223_v46, %v2663_v12  ;;  %v2762_v53 = vunpack.c.l.b16 %v175_v42  ;;  %v312_v54 = vsel %vm311_vm4, %v310_v44, %v309_v49  ;;  %v316_v55 = vrot.slane %v2743_v43, 4  ;;  %v2225_v56 = vld.sshfl [vmem:[%s3162_s0 + $0xd] sm:$0x1 pattern:$0x75316420] }
  0x10   :  { %2482 = vmatpush3.bf16.msra.mxu1 %v2694_v19  ;;  %2487 = vmatprep.subr.bf16.mxu0 %v2607_v0  ;;  %v217_v57 = vrot.slane %v2224_v51, %v2663_v12  ;;  %v315_v59 = vsel %vm314_vm5, %v313_v50, %v312_v54  ;;  %v319_v60 = vrot.slane %v2752_v48, 3  ;;  %v2226_v61 = vld.sshfl [vmem:[%s3162_s0 + $0xe] sm:$0x1 pattern:$0x75316420]  ;;  %v231_v62 = vrot.slane %v2225_v56, %v2663_v12 }
  0x11   :  { %2499 = vmatprep.subr.bf16.mxu1 %v2607_v0  ;;  %v2780_v63 = vunpack.c.l.b16 %v203_v52  ;;  %v318_v1 = vsel %vm317_vm6, %v316_v55, %v315_v59  ;;  %v322_v2 = vrot.slane %v2762_v53, 2  ;;  %v2227_v3 = vld.sshfl [vmem:[%s3162_s0 + $0xf] sm:$0x1 pattern:$0x75316420]  ;;  %v245_v4 = vrot.slane %v2226_v61, %v2663_v12 }
  0x12   :  { %v2790_v5 = vunpack.c.l.b16 %v217_v57  ;;  %v321_v7 = vsel %vm320_vm7, %v319_v60, %v318_v1  ;;  %v2228_v15 = vld.sshfl [vmem:[%s3162_s0 + $0x10] sm:$0x1 pattern:$0x75316420]  ;;  %v259_v17 = vrot.slane %v2227_v3, %v2663_v12  ;;  %v2799_v18 = vunpack.c.l.b16 %v231_v62  ;;  %v2595_v52 = vld [vmem:[%s3161_s1 + $0x58] sm:$0x3f]  }
  0x13   :  { %v324_v20 = vsel %vm323_vm8, %v322_v2, %v321_v7  ;;  %v414_v21 = vrot.slane %v2718_v30, 6  ;;  %v2229_v22 = vld.sshfl [vmem:[%s3162_s0 + $0x11] sm:$0x1 pattern:$0x75316420]  ;;  %v273_v23 = vrot.slane %v2228_v15, %v2663_v12  ;;  %v2809_v24 = vunpack.c.l.b16 %v245_v4 }
  0x14   :  { %v326_v25 = vsel %vm305_vm2, %v2780_v63, %v325_v11  ;;  %v327_v26 = vrot.slane %v2790_v5, 7  ;;  %v287_v28 = vrot.slane %v2229_v22, %v2663_v12  ;;  %v2815_v29 = vunpack.c.l.b16 %v259_v17  ;;  %v2596_v54 = vld [vmem:[%s3161_s1 + $0x78] sm:$0x3f]  }
  0x15   :  { %v329_v31 = vrot.slane %v2799_v18, 6  ;;  %v415_v32 = vsel %vm308_vm3, %v414_v21, %v413_v45  ;;  %v2819_v33 = vunpack.c.l.b16 %v273_v23  ;;  %v331_v36 = vrot.slane %v2809_v24, 5 }
  0x16   :  { %v328_v35 = vsel %vm308_vm3, %v327_v26, %v326_v25  ;;  %v416_v37 = vrot.slane %v2724_v34, 5  ;;  %v2824_v39 = vunpack.c.l.b16 %v287_v28  ;;  %v333_v42 = vrot.slane %v2815_v29, 4 }
  0x17   :  { %v330_v41 = vsel %vm311_vm4, %v329_v31, %v328_v35  ;;  %v418_v46 = vrot.slane %v2732_v38, 4  ;;  %v335_v45 = vrot.slane %v2819_v33, 3  ;;  %v420_v51 = vrot.slane %v2743_v43, 3 }
  0x18   :  { %v332_v47 = vsel %vm314_vm5, %v331_v36, %v330_v41  ;;  %v417_v49 = vsel %vm311_vm4, %v416_v37, %v415_v32  ;;  %v337_v57 = vrot.slane %v2824_v39, 2  ;;  %v422_v61 = vrot.slane %v2752_v48, 2 }
  0x19   :  { %v334_v56 = vsel %vm317_vm6, %v333_v42, %v332_v47  ;;  %v419_v59 = vsel %vm314_vm5, %v418_v46, %v417_v49  ;;  %v424_v3 = vrot.slane %v2762_v53, 1  ;;  %v426_v4 = vrot.slane %v2780_v63, 7  ;;  %v2271_v46 = vld.sshfl [vmem:[%s3162_s0 + $0x8] sm:$0x1 pattern:$0x75316420] }
  0x1a   :  { %v336_v62 = vsel %vm320_vm7, %v335_v45, %v334_v56  ;;  %v421_v1 = vsel %vm317_vm6, %v420_v51, %v419_v59  ;;  %v428_v15 = vrot.slane %v2790_v5, 6  ;;  %v430_v17 = vrot.slane %v2799_v18, 5  ;;  %v2881_v51 = vld [vmem:[%s3161_s1 + $0x50] sm:$0xff]  }
  0x1b   :  { %v338_v7 = vsel %vm323_vm8, %v337_v57, %v336_v62  ;;  %v423_v11 = vsel %vm320_vm7, %v422_v61, %v421_v1  ;;  %v427_v23 = vsel %vm305_vm2, %v426_v4, %v296_v58  ;;  %v432_v25 = vrot.slane %v2809_v24, 4 }
  0x1c   :  { %v2851_v21 = vpack.c.b16 %v338_v7, %v324_v20  ;;  %v425_v22 = vsel %vm323_vm8, %v424_v3, %v423_v11  ;;  %v429_v28 = vsel %vm308_vm3, %v428_v15, %v427_v23  ;;  %v434_v32 = vrot.slane %v2815_v29, 3 }
  0x1d   :  { %v436_v35 = vrot.slane %v2819_v33, 2  ;;  %v438_v37 = vrot.slane %v2824_v39, 1  ;;  %v431_v20 = vsel %vm311_vm4, %v430_v17, %v429_v28  ;;  %v2864_v41 = vsel %vm367_vm0, %v2595_v52, 0  ;;  %v2919_v17 = vld [vmem:[%s3161_s1 + $0x48] sm:$0xff]  }
  0x1e   :  { %2472 = vmatmul.mubr.msk.bf16.vlgmr.msra.gmra.mxu0 %vm363_vm9, %v2851_v21  ;;  %v2867_v58 = vsel %vm367_vm0, %v2596_v54, 0  ;;  %v794_v47 = vsel %vm305_vm2, %v307_v40, %v2711_v27  ;;  %v433_v49 = vsel %vm314_vm5, %v432_v25, %v431_v20  ;;  %v2279_v52 = vld.sshfl [vmem:[%s3162_s0 + $0x12] sm:$0x1 pattern:$0x75316420]  ;;  %v664_v54 = vrot.slane %v2271_v46, %v2663_v12 }
  0x1f   :  { %2488 = vmatpush3.bf16.msra.mxu0 %v2864_v41  ;;  %2495 = vmatprep.mubr.msk.bf16.mxu0 %vm2609_vm1, %v2607_v0  ;;  %v796_v40 = vsel %vm308_vm3, %v310_v44, %v794_v47  ;;  %v1175_v56 = vrot.slane %v2711_v27, 1  ;;  %v435_v59 = vsel %vm317_vm6, %v434_v32, %v433_v49  ;;  %v776_v61 = vrot.slane %v2279_v52, %v2663_v12  ;;  %v2603_v47 = vld [vmem:[%s3161_s1 + $0x98] sm:$0x3f]  }
  0x20   :  { %2489 = vmatprep.subr.bf16.mxu0 %v2607_v0  ;;  %v798_v62 = vsel %vm311_vm4, %v313_v50, %v796_v40  ;;  %v808_v1 = vsel %vm305_vm2, %v327_v26, %v2780_v63  ;;  %v437_v3 = vsel %vm320_vm7, %v436_v35, %v435_v59  ;;  %v2902_v4 = vunpack.c.l.b16 %v664_v54  ;;  %v2946_v35 = vld [vmem:[%s3161_s1 + $0x40] sm:$0xff]  }
  0x21   :  { %v800_v27 = vsel %vm314_vm5, %v316_v55, %v798_v62  ;;  %v810_v44 = vsel %vm308_vm3, %v329_v31, %v808_v1  ;;  %v439_v7 = vsel %vm323_vm8, %v438_v37, %v437_v3  ;;  %v2909_v11 = vunpack.c.l.b16 %v776_v61 }
  0x22   :  { %v802_v50 = vsel %vm317_vm6, %v319_v60, %v800_v27  ;;  %v812_v26 = vsel %vm311_vm4, %v331_v36, %v810_v44  ;;  %v440_v15 = vpack.c.b16 %v439_v7, %v425_v22  ;;  %v805_v31 = vrot.slane %v2902_v4, 1  ;;  %v2369_v7 = vld.sshfl [vmem:[%s3162_s0 + $0x13] sm:$0x1 pattern:$0x75316420] }
  0x23   :  { %2490 = vmatpush3.bf16.msra.mxu0 %v2881_v51  ;;  %v804_v55 = vsel %vm320_vm7, %v322_v2, %v802_v50  ;;  %v814_v23 = vsel %vm314_vm5, %v333_v42, %v812_v26  ;;  %v819_v36 = vrot.slane %v2909_v11, 1  ;;  %v1176_v22 = vsel %vm305_vm2, %v2718_v30, %v1175_v56  ;;  %v2361_v56 = vld.sshfl [vmem:[%s3162_s0 + $0x9] sm:$0x1 pattern:$0x75316420] }
  0x24   :  { %2491 = vmatprep.subr.bf16.mxu0 %v2607_v0  ;;  %v816_v60 = vsel %vm317_vm6, %v335_v45, %v814_v23  ;;  %v1177_v25 = vrot.slane %v2724_v34, 7  ;;  %2484 = vmatmul.mubr.msk.bf16.vlgmr.msra.gmra.mxu1 %vm363_vm9, %v440_v15  ;;  %v806_v28 = vsel %vm323_vm8, %v805_v31, %v804_v55  ;;  %v1179_v32 = vrot.slane %v2732_v38, 6  ;;  %v2941_v45 = vld [vmem:[%s3161_s1 + $0x70] sm:$0xff]   ;;  %v2984_v50 = vld [vmem:[%s3161_s1 + $0x68] sm:$0xff]  }
  0x25   :  { %v818_v2 = vsel %vm320_vm7, %v337_v57, %v816_v60  ;;  %v1181_v42 = vrot.slane %v2743_v43, 5  ;;  %2500 = vmatpush3.bf16.msra.mxu1 %v2867_v58  ;;  %2507 = vmatprep.mubr.msk.bf16.mxu1 %vm2609_vm1, %v2607_v0  ;;  %v1183_v20 = vrot.slane %v2752_v48, 4  ;;  %v1185_v46 = vrot.slane %v2762_v53, 3 }
  0x26   :  { %v820_v57 = vsel %vm323_vm8, %v819_v36, %v818_v2  ;;  %v1178_v37 = vsel %vm308_vm3, %v1177_v25, %v1176_v22  ;;  %2501 = vmatprep.subr.bf16.mxu1 %v2607_v0  ;;  %v1187_v54 = vrot.slane %v2902_v4, 2  ;;  %v1189_v40 = vrot.slane %v2780_v63, 1 }
  0x27   :  { %2492 = vmatpush3.bf16.msra.mxu0 %v2919_v17  ;;  %v2959_v49 = vpack.c.b16 %v820_v57, %v806_v28  ;;  %v1180_v52 = vsel %vm311_vm4, %v1179_v32, %v1178_v37  ;;  %v1191_v61 = vrot.slane %v2799_v18, 7  ;;  %v1193_v62 = vrot.slane %v2809_v24, 6 }
  0x28   :  { %2493 = vmatprep.subr.bf16.mxu0 %v2607_v0  ;;  %v1182_v59 = vsel %vm314_vm5, %v1181_v42, %v1180_v52  ;;  %v1195_v1 = vrot.slane %v2815_v29, 5  ;;  %v1190_v27 = vsel %vm305_vm2, %v2790_v5, %v1189_v40  ;;  %v1197_v63 = vrot.slane %v2819_v33, 4 }
  0x29   :  { %v1184_v3 = vsel %vm317_vm6, %v1183_v20, %v1182_v59  ;;  %v1199_v44 = vrot.slane %v2824_v39, 3  ;;  %2502 = vmatpush3.bf16.msra.mxu1 %v2941_v45  ;;  %v1192_v15 = vsel %vm308_vm3, %v1191_v61, %v1190_v27  ;;  %v1201_v55 = vrot.slane %v2909_v11, 2 }
  0x2a   :  { %v1186_v26 = vsel %vm320_vm7, %v1185_v46, %v1184_v3  ;;  %v2990_v31 = vsel %vm367_vm0, %v2603_v47, 0  ;;  %2503 = vmatprep.subr.bf16.mxu1 %v2607_v0  ;;  %v1194_v60 = vsel %vm311_vm4, %v1193_v62, %v1192_v15  ;;  %v1429_v36 = vrot.slane %v2361_v56, %v2663_v12  ;;  %v3009_v47 = vld [vmem:[%s3161_s1 + $0x60] sm:$0xff]   ;;  %v3023_v56 = vld [vmem:[%s3161_s1 + $0x90] sm:$0xff]  }
  0x2b   :  { %2494 = vmatpush3.bf16.msra.mxu0 %v2946_v35  ;;  %v1188_v23 = vsel %vm323_vm8, %v1187_v54, %v1186_v26  ;;  %v1196_v22 = vsel %vm314_vm5, %v1195_v1, %v1194_v60  ;;  %v1541_v28 = vrot.slane %v2369_v7, %v2663_v12  ;;  %v1559_v37 = vsel %vm305_vm2, %v1177_v25, %v2718_v30 }
  0x2c   :  { %2511 = vmatprep.subr.bf16.mxu0 %v2607_v0  ;;  %v1198_v2 = vsel %vm317_vm6, %v1197_v63, %v1196_v22  ;;  %v3001_v57 = vunpack.c.l.b16 %v1429_v36  ;;  %v1561_v40 = vsel %vm308_vm3, %v1179_v32, %v1559_v37  ;;  %v2101_v60 = vrot.slane %v2732_v38, 7 }
  0x2d   :  { %2504 = vmatpush3.bf16.msra.mxu1 %v2984_v50  ;;  %v1200_v52 = vsel %vm320_vm7, %v1199_v44, %v1198_v2  ;;  %v3014_v12 = vunpack.c.l.b16 %v1541_v28  ;;  %v1563_v59 = vsel %vm311_vm4, %v1181_v42, %v1561_v40  ;;  %v1573_v42 = vsel %vm305_vm2, %v1191_v61, %v2790_v5 }
  0x2e   :  { %2496 = vmatmul.mubr.msk.bf16.vlgmr.msra.gmra.mxu0 %vm363_vm9, %v2959_v49  ;;  %2505 = vmatprep.subr.bf16.mxu1 %v2607_v0  ;;  %v1202_v25 = vsel %vm323_vm8, %v1201_v55, %v1200_v52  ;;  %v1570_v3 = vrot.slane %v3001_v57, 1  ;;  %v1565_v32 = vsel %vm314_vm5, %v1183_v20, %v1563_v59  ;;  %v2103_v36 = vrot.slane %v2743_v43, 6 }
  0x2f   :  { %2512 = vmatpush3.bf16.msra.mxu0 %v2990_v31  ;;  %v3027_v27 = vpack.c.b16 %v1202_v25, %v1188_v23  ;;  %2519 = vmatprep.mubr.msk.bf16.mxu0 %vm2609_vm1, %v2607_v0  ;;  %v1567_v7 = vsel %vm317_vm6, %v1185_v46, %v1565_v32  ;;  %v1584_v15 = vrot.slane %v3014_v12, 1  ;;  %v3044_v23 = vld [vmem:[%s3161_s1 + $0x88] sm:$0xff]   ;;  %v1575_v46 = vsel %vm308_vm3, %v1193_v62, %v1573_v42 }
  0x30   :  { %2513 = vmatprep.subr.bf16.mxu0 %v2607_v0  ;;  %v1569_v26 = vsel %vm320_vm7, %v1187_v54, %v1567_v7  ;;  %v2099_v54 = vrot.slane %v2718_v30, 1  ;;  %v1577_v61 = vsel %vm311_vm4, %v1195_v1, %v1575_v46  ;;  %v2105_v22 = vrot.slane %v2752_v48, 5 }
  0x31   :  { %2506 = vmatpush3.bf16.msra.mxu1 %v3009_v47  ;;  %v1571_v20 = vsel %vm323_vm8, %v1570_v3, %v1569_v26  ;;  %v2107_v28 = vrot.slane %v2762_v53, 4  ;;  %v1579_v2 = vsel %vm314_vm5, %v1197_v63, %v1577_v61  ;;  %v2109_v38 = vrot.slane %v2902_v4, 3 }
  0x32   :  { %2523 = vmatprep.subr.bf16.mxu1 %v2607_v0  ;;  %v2100_v30 = vsel %vm305_vm2, %v2724_v34, %v2099_v54  ;;  %v2111_v62 = vrot.slane %v3001_v57, 2  ;;  %v1581_v43 = vsel %vm317_vm6, %v1199_v44, %v1579_v2  ;;  %v2113_v53 = vrot.slane %v2790_v5, 1  ;;  %v3074_v34 = vld [vmem:[%s3161_s1 + $0x80] sm:$0xff]   ;;  %s2610_s1 = smov 64  }
  0x33   :  { %2514 = vmatpush3.bf16.msra.mxu0 %v3023_v56  ;;  %v2102_v48 = vsel %vm308_vm3, %v2101_v60, %v2100_v30  ;;  %v2115_v1 = vrot.slane %v2809_v24, 7  ;;  %v2117_v63 = vrot.slane %v2815_v29, 6  ;;  %v2119_v44 = vrot.slane %v2819_v33, 5 }
  0x34   :  { %2515 = vmatprep.subr.bf16.mxu0 %v2607_v0  ;;  %2508 = vmatmul.mubr.msk.bf16.vlgmr.msra.gmra.mxu1 %vm363_vm9, %v3027_v27  ;;  %v2104_v4 = vsel %vm311_vm4, %v2103_v36, %v2102_v48  ;;  %v2114_v57 = vsel %vm305_vm2, %v2799_v18, %v2113_v53  ;;  %v2121_v37 = vrot.slane %v2824_v39, 4  ;;  %v2123_v40 = vrot.slane %v2909_v11, 3 }
  0x35   :  { %2524 = vmatpush3.bf16.msra.mxu1 %v2644_v6  ;;  %2531 = vmatprep.mubr.msk.bf16.mxu1 %vm2609_vm1, %v2607_v0  ;;  %v1583_v6 = vsel %vm320_vm7, %v1201_v55, %v1581_v43  ;;  %v2106_v24 = vsel %vm314_vm5, %v2105_v22, %v2104_v4  ;;  %v2116_v55 = vsel %vm308_vm3, %v2115_v1, %v2114_v57  ;;  %v2125_v59 = vrot.slane %v3014_v12, 2 }
  0x36   :  { %2525 = vmatprep.subr.bf16.mxu1 %v2607_v0  ;;  %v1585_v5 = vsel %vm323_vm8, %v1584_v15, %v1583_v6  ;;  %v2108_v52 = vsel %vm317_vm6, %v2107_v28, %v2106_v24  ;;  %v2118_v25 = vsel %vm311_vm4, %v2117_v63, %v2116_v55 }
  0x37   :  { %2516 = vmatpush3.bf16.msra.mxu0 %v3044_v23  ;;  %v1586_v29 = vpack.c.b16 %v1585_v5, %v1571_v20  ;;  %v2110_v33 = vsel %vm320_vm7, %v2109_v38, %v2108_v52  ;;  %v2120_v39 = vsel %vm314_vm5, %v2119_v44, %v2118_v25 }
  0x38   :  { %2517 = vmatprep.subr.bf16.mxu0 %v2607_v0  ;;  %v2112_v18 = vsel %vm323_vm8, %v2111_v62, %v2110_v33  ;;  %v2122_v11 = vsel %vm317_vm6, %v2121_v37, %v2120_v39 }
  0x39   :  { %2526 = vmatpush3.bf16.msra.mxu1 %v2653_v9  ;;  %v2124_v9 = vsel %vm320_vm7, %v2123_v40, %v2122_v11 }
  0x3a   :  { %2527 = vmatprep.subr.bf16.mxu1 %v2607_v0  ;;  %v2126_v12 = vsel %vm323_vm8, %v2125_v59, %v2124_v9 }
  0x3b   :  { %2518 = vmatpush3.bf16.msra.mxu0 %v3074_v34  ;;  %v2127_v3 = vpack.c.b16 %v2126_v12, %v2112_v18  ;;  %v2412_v18 = vld [vmem:[%s3163_s2] ss:$0 sm:$0xff] }
  0x3c   :  { %2535 = vmatprep.subr.bf16.mxu0 %v2607_v0 }
  0x3d   :  { %2528 = vmatpush3.bf16.msra.mxu1 %v2669_v13 }
  0x3e   :  { %2520 = vmatmul.mubr.msk.bf16.vlgmr.msra.gmra.mxu0 %vm363_vm9, %v1586_v29  ;;  %2529 = vmatprep.subr.bf16.mxu1 %v2607_v0 }
  0x3f   :  { %2536 = vmatpush3.bf16.msra.mxu0 %v2648_v8  ;;  %2543 = vmatprep.mubr.msk.bf16.mxu0 %vm2609_vm1, %v2607_v0 }
  0x40   :  { %2537 = vmatprep.subr.bf16.mxu0 %v2607_v0 }
  0x41   :  { %2530 = vmatpush3.bf16.msra.mxu1 %v2685_v16 }
  0x42   :  { %2547 = vmatprep.subr.bf16.mxu1 %v2607_v0 }
  0x43   :  { %2538 = vmatpush3.bf16.msra.mxu0 %v2660_v10 }
  0x44   :  { %2539 = vmatprep.subr.bf16.mxu0 %v2607_v0  ;;  %2532 = vmatmul.mubr.msk.bf16.vlgmr.msra.gmra.mxu1 %vm363_vm9, %v2959_v49 }
  0x45   :  { %2548 = vmatpush3.bf16.msra.mxu1 %v2864_v41  ;;  %2555 = vmatprep.mubr.msk.bf16.mxu1 %vm2609_vm1, %v2607_v0 }
  0x46   :  { %2549 = vmatprep.subr.bf16.mxu1 %v2607_v0 }
  0x47   :  { %2540 = vmatpush3.bf16.msra.mxu0 %v2676_v14 }
  0x48   :  { %2541 = vmatprep.subr.bf16.mxu0 %v2607_v0 }
  0x49   :  { %2550 = vmatpush3.bf16.msra.mxu1 %v2881_v51 }
  0x4a   :  { %2551 = vmatprep.subr.bf16.mxu1 %v2607_v0 }
  0x4b   :  { %2542 = vmatpush3.bf16.msra.mxu0 %v2694_v19 }
  0x4c   :  { %2559 = vmatprep.subr.bf16.mxu0 %v2607_v0 }
  0x4d   :  { %2552 = vmatpush3.bf16.msra.mxu1 %v2919_v17 }
  0x4e   :  { %2544 = vmatmul.mubr.msk.bf16.vlgmr.msra.gmra.mxu0 %vm363_vm9, %v2851_v21  ;;  %2553 = vmatprep.subr.bf16.mxu1 %v2607_v0 }
  0x4f   :  { %2560 = vmatpush3.bf16.msra.mxu0 %v2867_v58  ;;  %2567 = vmatprep.mubr.msk.bf16.mxu0 %vm2609_vm1, %v2607_v0 }
  0x50   :  { %2561 = vmatprep.subr.bf16.mxu0 %v2607_v0 }
  0x51   :  { %2554 = vmatpush3.bf16.msra.mxu1 %v2946_v35 }
  0x52   :  { %2571 = vmatprep.subr.bf16.mxu1 %v2607_v0 }
  0x53   :  { %2562 = vmatpush3.bf16.msra.mxu0 %v2941_v45 }
  0x54   :  { %2563 = vmatprep.subr.bf16.mxu0 %v2607_v0  ;;  %2556 = vmatmul.mubr.msk.bf16.vlgmr.msra.gmra.mxu1 %vm363_vm9, %v3027_v27 }
  0x55   :  { %2572 = vmatpush3.bf16.msra.mxu1 %v2990_v31  ;;  %2579 = vmatprep.mubr.msk.bf16.mxu1 %vm2609_vm1, %v2607_v0 }
  0x56   :  { %2573 = vmatprep.subr.bf16.mxu1 %v2607_v0 }
  0x57   :  { %2564 = vmatpush3.bf16.msra.mxu0 %v2984_v50 }
  0x58   :  { %2565 = vmatprep.subr.bf16.mxu0 %v2607_v0 }
  0x59   :  { %2574 = vmatpush3.bf16.msra.mxu1 %v3023_v56 }
  0x5a   :  { %2575 = vmatprep.subr.bf16.mxu1 %v2607_v0 }
  0x5b   :  { %2566 = vmatpush3.bf16.msra.mxu0 %v3009_v47 }
  0x5d   :  { %2576 = vmatpush3.bf16.msra.mxu1 %v3044_v23 }
  0x5e   :  { %2568 = vmatmul.mubr.msk.bf16.vlgmr.msra.gmra.mxu0 %vm363_vm9, %v1586_v29  ;;  %2577 = vmatprep.subr.bf16.mxu1 %v2607_v0 }
  0x61   :  { %2578 = vmatpush3.bf16.msra.mxu1 %v3074_v34 }
  0x64   :  { %2580 = vmatmul.mubr.msk.bf16.vlgmr.msra.gmra.mxu1 %vm363_vm9, %v2127_v3 }
  0xde   :  { %v405_v8 = vpop.f32.mrf.mxu0 }
  0xe0   :  { %v2473_v10 = vpop.f32.mrf.mxu0 }
  0xe2   :  { %v408_v13 = vpop.f32.mrf.mxu0 }
  0xe4   :  { %v2474_v14 = vpop.f32.mrf.mxu0  ;;  %v504_v16 = vpop.f32.mrf.mxu1 }
  0xe5   :  { %v505_v28 = vadd.f32 %v504_v16, %v405_v8 }
  0xe6   :  { %v2485_v19 = vpop.f32.mrf.mxu1 }
  0xe8   :  { %v507_v21 = vpop.f32.mrf.mxu1 }
  0xe9   :  { %v508_v48 = vadd.f32 %v507_v21, %v408_v13 }
  0xea   :  { %v2486_v41 = vpop.f32.mrf.mxu1 }
  0xee   :  { %v885_v58 = vpop.f32.mrf.mxu0 }
  0xef   :  { %v892_v30 = vadd.f32 %v885_v58, %v505_v28 }
  0xf0   :  { %v2497_v51 = vpop.f32.mrf.mxu0 }
  0xf2   :  { %v888_v17 = vpop.f32.mrf.mxu0 }
  0xf3   :  { %v893_v6 = vadd.f32 %v888_v17, %v508_v48 }
  0xf4   :  { %v2498_v45 = vpop.f32.mrf.mxu0  ;;  %v1267_v35 = vpop.f32.mrf.mxu1 }
  0xf5   :  { %v1274_v34 = vadd.f32 %v1267_v35, %v892_v30 }
  0xf6   :  { %v2509_v49 = vpop.f32.mrf.mxu1 }
  0xf8   :  { %v1270_v50 = vpop.f32.mrf.mxu1 }
  0xf9   :  { %v1275_v52 = vadd.f32 %v1270_v50, %v893_v6 }
  0xfa   :  { %v2510_v0 = vpop.f32.mrf.mxu1 }
  0xfe   :  { %v1650_v31 = vpop.f32.mrf.mxu0 }
  0xff   :  { %v1657_v5 = vadd.f32 %v1650_v31, %v1274_v34 }
 0x100   :  { %v2521_v47 = vpop.f32.mrf.mxu0 }
 0x102   :  { %v1653_v56 = vpop.f32.mrf.mxu0 }
 0x103   :  { %v1658_v29 = vadd.f32 %v1653_v56, %v1275_v52 }
 0x104   :  { %v2522_v27 = vpop.f32.mrf.mxu0  ;;  %v1693_v32 = vpop.f32.mrf.mxu1 }
 0x106   :  { %v2533_v7 = vpop.f32.mrf.mxu1 }
 0x108   :  { %v1696_v26 = vpop.f32.mrf.mxu1 }
 0x10a   :  { %v2534_v42 = vpop.f32.mrf.mxu1 }
 0x10e   :  { %v1734_v15 = vpop.f32.mrf.mxu0 }
 0x10f   :  { %v1735_v22 = vadd.f32 %v1734_v15, %v1693_v32 }
 0x110   :  { %v2545_v23 = vpop.f32.mrf.mxu0 }
 0x112   :  { %v1737_v20 = vpop.f32.mrf.mxu0 }
 0x113   :  { %v1738_v62 = vadd.f32 %v1737_v20, %v1696_v26 }
 0x114   :  { %v2546_v46 = vpop.f32.mrf.mxu0  ;;  %v1775_v54 = vpop.f32.mrf.mxu1 }
 0x115   :  { %v1782_v38 = vadd.f32 %v1775_v54, %v1735_v22 }
 0x116   :  { %v2557_v60 = vpop.f32.mrf.mxu1 }
 0x118   :  { %v1778_v61 = vpop.f32.mrf.mxu1 }
 0x119   :  { %v1783_v4 = vadd.f32 %v1778_v61, %v1738_v62 }
 0x11a   :  { %v2558_v36 = vpop.f32.mrf.mxu1 }
 0x11e   :  { %v1818_v2 = vpop.f32.mrf.mxu0 }
 0x11f   :  { %v1825_v53 = vadd.f32 %v1818_v2, %v1782_v38 }
 0x120   :  { %v2569_v43 = vpop.f32.mrf.mxu0 }
 0x122   :  { %v1821_v1 = vpop.f32.mrf.mxu0 }
 0x123   :  { %v1826_v57 = vadd.f32 %v1821_v1, %v1783_v4 }
 0x124   :  { %v2570_v63 = vpop.f32.mrf.mxu0  ;;  %v2165_v44 = vpop.f32.mrf.mxu1 }
 0x125   :  { %v2172_v24 = vadd.f32 %v2165_v44, %v1825_v53 }
 0x126   :  { %v2581_v37 = vpop.f32.mrf.mxu1 }
 0x127   :  { %v2174_v55 = vmax.f32 %v1657_v5, %v2172_v24 }
 0x128   :  { %v2168_v40 = vpop.f32.mrf.mxu1 }
 0x129   :  { %v2173_v33 = vadd.f32 %v2168_v40, %v1826_v57  ;;  %2178 = vrot.lane.b32.xlu0 %v2174_v55, %s2610_s1 }
 0x12a   :  { %v2582_v25 = vpop.f32.mrf.mxu1 }
 0x12b   :  { %v2175_v59 = vmax.f32 %v1658_v29, %v2173_v33 }
 0x12d   :  { %2180 = vrot.lane.b32.xlu0 %v2175_v59, %s2610_s1 }
 0x19b   :  { %v2179_v39 = vpop.permute.xlu0 %2178 }
 0x19c   :  { %v2184_v11 = vmax.f32 %v2174_v55, %v2179_v39 }
 0x19e   :  { %v2193_v9 = vadd.f32 %v2412_v18, %v2184_v11 }
 0x19f   :  { %v2181_v12 = vpop.permute.xlu0 %2180 }
 0x1a0   :  { %v2195_v3 = vmax.f32 %v2193_v9, 0.0  ;;  %v2185_v8 = vmax.f32 %v2175_v59, %v2181_v12 }
 0x1a2   :  { %v2197_v10 = vpack.c.bf16 %v2195_v3, %v2195_v3  ;;  %v2194_v13 = vadd.f32 %v2412_v18, %v2185_v8 }
 0x1a4   :  { %2200 = vst.msk [vmem:[%s3164_s3] sm:$0xf] %vm2199_vm10, %v2197_v10  ;;  %v2196_v14 = vmax.f32 %v2194_v13, 0.0 }
 0x1a6   :  { %v2198_v16 = vpack.c.bf16 %v2196_v14, %v2196_v14 }
 0x1a8   :  { %2201 = vst.msk [vmem:[%s3164_s3 + $0x4] sm:$0xf] %vm2199_vm10, %v2198_v16 }

// kernel: tile.18
= control target key start
LH: loop header
LB: loop body
LE: loop exit
PB: predicated region body
PF: predicated region fallthrough
CT: control target
= control target key end

     0   :  { %s22_s0 = inlined_call_operand.vmem [shape: f32[16], index: 0, kind: input, shape index: {}]   ;;  %s23_s1 = inlined_call_operand.vmem [shape: f32[4,16], index: 1, kind: output, shape index: {}]  }
   0x1   :  { %v4_v0 = vld [vmem:[%s22_s0] ss:$0 sm:$0xff] }
   0x2   :  { %5 = vst [vmem:[%s23_s1] sm:$0xf] %v4_v0 }

// kernel: tile.19
= control target key start
LH: loop header
LB: loop body
LE: loop exit
PB: predicated region body
PF: predicated region fallthrough
CT: control target
= control target key end

     0   :  { %vm8_vm0 = vcmask 130048   ;;  %s40_s8 = smov 16   ;;  %s41_s9 = smov 32   ;;  %vm14_vm1 = vcmask 523648   ;;  %vm20_vm2 = vcmask 392448   ;;  %vm26_vm3 = vcmask 261248   ;;  %s58_s0 = inlined_call_operand.vmem [shape: f32[4,16], index: 0, kind: input, shape index: {}]   ;;  %s59_s1 = inlined_call_operand.vmem [shape: f32[1,64], index: 1, kind: output, shape index: {}]  }
   0x1   :  { %v5_v0 = vld [vmem:[%s58_s0] sm:$0xf]  ;;  %s39_s0 = smov 48  }
   0x2   :  { %6 = vst [vmem:[#allocation1] sm:$0xf] %v5_v0 }
   0x9   :  { %v11_v1 = vld [vmem:[#allocation1 + $0x3] sm:$0x1]   ;;  %v23_v2 = vld [vmem:[#allocation1 + $0x1] sm:$0x1]   ;;  %v7_v3 = vld [vmem:[#allocation1] sm:$0x1]  }
   0xa   :  { %12 = vrot.lane.b32.xlu0 %v11_v1, %s39_s0  ;;  %24 = vrot.lane.b32.xlu1 %v23_v2, %s40_s8  ;;  %v17_v4 = vld [vmem:[#allocation1 + $0x2] sm:$0x1]   ;;  %9 = vst.msk [vmem:[#allocation0] sm:$0x1] %vm8_vm0, %v7_v3  }
   0xe   :  { %18 = vrot.lane.b32.xlu0 %v17_v4, %s41_s9 }
  0x7c   :  { %v13_v5 = vpop.permute.xlu0 %12   ;;  %v25_v6 = vpop.permute.xlu1 %24  }
  0x7d   :  { %15 = vst.msk [vmem:[#allocation0] sm:$0x1] %vm14_vm1, %v13_v5  }
  0x80   :  { %v19_v7 = vpop.permute.xlu0 %18  }
  0x81   :  { %21 = vst.msk [vmem:[#allocation0] sm:$0x1] %vm20_vm2, %v19_v7  }
  0x82   :  { %27 = vst.msk [vmem:[#allocation0] sm:$0x1] %vm26_vm3, %v25_v6  }
  0x89   :  { %v32_v8 = vld [vmem:[#allocation0] sm:$0x1] }
  0x8a   :  { %35 = vst [vmem:[%s59_s1] sm:$0x1] %v32_v8 }

// kernel: featureselector_forward.3
= control target key start
LH: loop header
LB: loop body
LE: loop exit
PB: predicated region body
PF: predicated region fallthrough
CT: control target
= control target key end

     0   :  { %v2640_v0 = vmov 0.0   ;;  %vm2641_vm0 = vmmov 0   ;;  %v2642_v3 = vmov 1966171168   ;;  %v78_v5 = vlaneseq  ;;  %s2643_s28 = smov 64   ;;  %s3473_s1 = inlined_call_operand.vmem [shape: bf16[5,96,128], index: 1, kind: input, shape index: {}]   ;;  %s3474_s0 = inlined_call_operand.vmem [shape: bf16[2,6,2,96], index: 0, kind: input, shape index: {}]   ;;  %s3475_s3 = inlined_call_operand.vmem [shape: bf16[64,4], index: 3, kind: input, shape index: {}]   ;;  %s3476_s2 = inlined_call_operand.vmem [shape: f32[1,64], index: 2, kind: input, shape index: {}]   ;;  %s3477_s4 = inlined_call_operand.vmem [shape: f32[1,4], index: 4, kind: input, shape index: {}]   ;;  %s3478_s6 = inlined_call_operand.vmem [shape: f32[2,4,4], index: 6, kind: output, shape index: {0}]   ;;  %s3479_s5 = inlined_call_operand.vmem [shape: f32[2,4,4,4], index: 5, kind: input, shape index: {}]   ;;  %s3480_s7 = inlined_call_operand.vmem [shape: f32[2,4,4], index: 7, kind: output, shape index: {1}]   ;;  %s3481_s8 = inlined_call_operand.vmem [shape: f32[2,4,4], index: 8, kind: output, shape index: {2}]  }
   0x1   :  { %2382 = vmatprep.subr.bf16.mxu0 %v2640_v0  ;;  %2398 = vmatprep.subr.bf16.mxu1 %v2640_v0  ;;  %v2694_v1 = vld [vmem:[%s3473_s1 + $0x58] sm:$0xff]   ;;  %v2699_v2 = vld [vmem:[%s3473_s1 + $0x28] sm:$0xff]   ;;  %v76_v4 = vunpack.c.l.s4 %v2642_v3  ;;  %v2709_v6 = vld [vmem:[%s3473_s1 + $0x50] sm:$0xff]   ;;  %vm189_vm1 = vcmask 1041409   ;;  %vm192_vm2 = vcmask 1042434   ;;  %vm195_vm3 = vcmask 1043459  }
   0x2   :  { %2394 = vmatprep.mubr.msk.bf16.mxu0 %vm2641_vm0, %v2640_v0  ;;  %2410 = vmatprep.mubr.msk.bf16.mxu1 %vm2641_vm0, %v2640_v0  ;;  %v2716_v7 = vld [vmem:[%s3473_s1 + $0x20] sm:$0xff]   ;;  %v2720_v9 = vshrl.u32 %v78_v5, 7  ;;  %v2726_v10 = vld [vmem:[%s3473_s1 + $0x48] sm:$0xff]   ;;  %v2733_v11 = vld [vmem:[%s3473_s1 + $0x18] sm:$0xff]   ;;  %vm198_vm4 = vcmask 1044484   ;;  %vm201_vm5 = vcmask 1045509  }
   0x3   :  { %2383 = vmatpush3.bf16.msra.mxu0 %v2694_v1  ;;  %2399 = vmatpush3.bf16.msra.mxu1 %v2699_v2  ;;  %v77_v8 = vunpack.c.0.s8 %v76_v4  ;;  %v2743_v13 = vld [vmem:[%s3473_s1 + $0x40] sm:$0xff]   ;;  %v2750_v14 = vld [vmem:[%s3473_s1 + $0x10] sm:$0xff]   ;;  %v2764_v18 = vld [vmem:[%s3473_s1 + $0x38] sm:$0xff]   ;;  %vm204_vm6 = vcmask 1046534   ;;  %vm207_vm7 = vcmask 1047559   ;;  %vm246_vm8 = vcmask 785408  }
   0x4   :  { %2384 = vmatprep.subr.bf16.mxu0 %v2640_v0  ;;  %2400 = vmatprep.subr.bf16.mxu1 %v2640_v0  ;;  %v2142_v15 = vld.sshfl [vmem:[%s3474_s0] sm:$0x1 pattern:$0x75316420]  ;;  %v2769_v19 = vld [vmem:[%s3473_s1 + $0x8] sm:$0xff]   ;;  %v2798_v32 = vld [vmem:[%s3473_s1 + $0x30] sm:$0xff]  }
   0x5   :  { %v2737_v12 = vsub.s32 %v77_v8, %v2720_v9  ;;  %v2143_v16 = vld.sshfl [vmem:[%s3474_s0 + $0x1] sm:$0x1 pattern:$0x75316420]  ;;  %vm1530_vm9 = vcmask 523264   ;;  %vm1577_vm10 = vcmask 27648  }
   0x6   :  { %v2144_v20 = vld.sshfl [vmem:[%s3474_s0 + $0x2] sm:$0x1 pattern:$0x75316420]  ;;  %vm1584_vm11 = vcmask 1043456  }
   0x7   :  { %2385 = vmatpush3.bf16.msra.mxu0 %v2709_v6  ;;  %2401 = vmatpush3.bf16.msra.mxu1 %v2716_v7  ;;  %v81_v17 = vrot.slane %v2142_v15, %v2737_v12  ;;  %v95_v21 = vrot.slane %v2143_v16, %v2737_v12  ;;  %v2145_v22 = vld.sshfl [vmem:[%s3474_s0 + $0x3] sm:$0x1 pattern:$0x75316420]  ;;  %v109_v23 = vrot.slane %v2144_v20, %v2737_v12  ;;  %v2854_v15 = vld [vmem:[%s3473_s1 + $0x88] sm:$0xff]  }
   0x8   :  { %2386 = vmatprep.subr.bf16.mxu0 %v2640_v0  ;;  %2402 = vmatprep.subr.bf16.mxu1 %v2640_v0  ;;  %v2146_v25 = vld.sshfl [vmem:[%s3474_s0 + $0x6] sm:$0x1 pattern:$0x75316420]  ;;  %v123_v26 = vrot.slane %v2145_v22, %v2737_v12 }
   0x9   :  { %v180_v24 = vunpack.c.l.b16 %v81_v17  ;;  %v2786_v27 = vunpack.c.l.b16 %v95_v21  ;;  %v2147_v28 = vld.sshfl [vmem:[%s3474_s0 + $0x7] sm:$0x1 pattern:$0x75316420]  ;;  %v137_v29 = vrot.slane %v2146_v25, %v2737_v12  ;;  %v2792_v30 = vunpack.c.l.b16 %v109_v23 }
   0xa   :  { %v2148_v33 = vld.sshfl [vmem:[%s3474_s0 + $0x8] sm:$0x1 pattern:$0x75316420]  ;;  %v151_v34 = vrot.slane %v2147_v28, %v2737_v12  ;;  %v2804_v35 = vunpack.c.l.b16 %v123_v26  ;;  %v2812_v37 = vld [vmem:[%s3473_s1] sm:$0xff]  }
   0xb   :  { %2387 = vmatpush3.bf16.msra.mxu0 %v2726_v10  ;;  %2403 = vmatpush3.bf16.msra.mxu1 %v2733_v11  ;;  %v188_v31 = vrot.slane %v180_v24, 1  ;;  %v290_v36 = vrot.slane %v2786_v27, 7  ;;  %v2149_v38 = vld.sshfl [vmem:[%s3474_s0 + $0x9] sm:$0x1 pattern:$0x75316420]  ;;  %v165_v39 = vrot.slane %v2148_v33, %v2737_v12  ;;  %v184_v40 = vunpack.c.l.b16 %v137_v29 }
   0xc   :  { %2388 = vmatprep.subr.bf16.mxu0 %v2640_v0  ;;  %2404 = vmatprep.subr.bf16.mxu1 %v2640_v0  ;;  %v191_v42 = vrot.slane %v2792_v30, 7  ;;  %v179_v43 = vrot.slane %v2149_v38, %v2737_v12  ;;  %v2823_v44 = vunpack.c.l.b16 %v151_v34  ;;  %v194_v45 = vrot.slane %v2804_v35, 6  ;;  %v2876_v26 = vld [vmem:[%s3473_s1 + $0x80] sm:$0xff]  }
   0xd   :  { %v190_v41 = vsel %vm189_vm1, %v2786_v27, %v188_v31  ;;  %v291_v46 = vsel %vm189_vm1, %v290_v36, %v180_v24  ;;  %v2827_v47 = vunpack.c.l.b16 %v165_v39  ;;  %v197_v49 = vrot.slane %v184_v40, 5  ;;  %v2868_v24 = vld [vmem:[%s3473_s1 + $0xb8] sm:$0xff]   ;;  %v2187_v28 = vld.sshfl [vmem:[%s3474_s0 + $0x4] sm:$0x1 pattern:$0x75316420] }
   0xe   :  { %v193_v48 = vsel %vm192_vm2, %v191_v42, %v190_v41  ;;  %v292_v50 = vrot.slane %v2792_v30, 6  ;;  %v2832_v51 = vunpack.c.l.b16 %v179_v43  ;;  %v200_v53 = vrot.slane %v2823_v44, 4  ;;  %v2889_v31 = vld [vmem:[%s3473_s1 + $0xb0] sm:$0xff]  }
   0xf   :  { %2389 = vmatpush3.bf16.msra.mxu0 %v2743_v13  ;;  %2405 = vmatpush3.bf16.msra.mxu1 %v2750_v14  ;;  %v196_v52 = vsel %vm195_vm3, %v194_v45, %v193_v48  ;;  %v294_v54 = vrot.slane %v2804_v35, 5  ;;  %v203_v56 = vrot.slane %v2827_v47, 3  ;;  %v296_v58 = vrot.slane %v184_v40, 4  ;;  %v2909_v40 = vld [vmem:[%s3473_s1 + $0x78] sm:$0xff]  }
  0x10   :  { %2390 = vmatprep.subr.bf16.mxu0 %v2640_v0  ;;  %2406 = vmatprep.subr.bf16.mxu1 %v2640_v0  ;;  %v199_v55 = vsel %vm198_vm4, %v197_v49, %v196_v52  ;;  %v293_v57 = vsel %vm192_vm2, %v292_v50, %v291_v46  ;;  %v206_v60 = vrot.slane %v2832_v51, 2  ;;  %v298_v62 = vrot.slane %v2823_v44, 3  ;;  %v2191_v33 = vld.sshfl [vmem:[%s3474_s0 + $0xa] sm:$0x1 pattern:$0x75316420] }
  0x11   :  { %v202_v59 = vsel %vm201_vm5, %v200_v53, %v199_v55  ;;  %v295_v61 = vsel %vm195_vm3, %v294_v54, %v293_v57  ;;  %v300_v4 = vrot.slane %v2827_v47, 2  ;;  %v302_v8 = vrot.slane %v2832_v51, 1  ;;  %v2924_v49 = vld [vmem:[%s3473_s1 + $0xa8] sm:$0xff]  }
  0x12   :  { %v205_v63 = vsel %vm204_vm6, %v203_v56, %v202_v59  ;;  %v297_v3 = vsel %vm198_vm4, %v296_v58, %v295_v61  ;;  %v778_v22 = vrot.slane %v2786_v27, 1  ;;  %v780_v29 = vrot.slane %v2804_v35, 7  ;;  %v2257_v57 = vld.sshfl [vmem:[%s3474_s0 + $0x5] sm:$0x1 pattern:$0x75316420] }
  0x13   :  { %2391 = vmatpush3.bf16.msra.mxu0 %v2764_v18  ;;  %2407 = vmatpush3.bf16.msra.mxu1 %v2769_v19  ;;  %v208_v16 = vsel %vm207_vm7, %v206_v60, %v205_v63  ;;  %v299_v17 = vsel %vm201_vm5, %v298_v62, %v297_v3  ;;  %v469_v34 = vrot.slane %v2187_v28, %v2737_v12  ;;  %v784_v48 = vrot.slane %v2823_v44, 5  ;;  %v2935_v44 = vld [vmem:[%s3473_s1 + $0x70] sm:$0xff]   ;;  %v2261_v61 = vld.sshfl [vmem:[%s3474_s0 + $0xb] sm:$0x1 pattern:$0x75316420] }
  0x14   :  { %2392 = vmatprep.subr.bf16.mxu0 %v2640_v0  ;;  %2408 = vmatprep.subr.bf16.mxu1 %v2640_v0  ;;  %v2860_v20 = vpack.c.b16 %v208_v16, %v208_v16  ;;  %v301_v21 = vsel %vm204_vm6, %v300_v4, %v299_v17  ;;  %v535_v36 = vsel %vm189_vm1, %v191_v42, %v2786_v27  ;;  %v786_v55 = vrot.slane %v2827_v47, 4  ;;  %v2966_v16 = vld [vmem:[%s3473_s1 + $0x68] sm:$0xff]  }
  0x15   :  { %v303_v23 = vsel %vm207_vm7, %v302_v8, %v301_v21  ;;  %v779_v38 = vsel %vm189_vm1, %v2792_v30, %v778_v22  ;;  %v2903_v39 = vunpack.c.l.b16 %v469_v34  ;;  %v525_v27 = vrot.slane %v2191_v33, %v2737_v12 }
  0x16   :  { %v304_v25 = vpack.c.b16 %v303_v23, %v303_v23  ;;  %v537_v41 = vsel %vm192_vm2, %v194_v45, %v535_v36  ;;  %v781_v42 = vsel %vm192_vm2, %v780_v29, %v779_v38  ;;  %v958_v62 = vrot.slane %v2257_v57, %v2737_v12 }
  0x17   :  { %2393 = vmatpush3.bf16.msra.mxu0 %v2798_v32  ;;  %2409 = vmatpush3.bf16.msra.mxu1 %v2812_v37  ;;  %v538_v43 = vrot.slane %v2903_v39, 5  ;;  %v782_v46 = vrot.slane %v2903_v39, 6  ;;  %v2937_v52 = vunpack.c.l.b16 %v525_v27  ;;  %v1014_v63 = vrot.slane %v2261_v61, %v2737_v12  ;;  %v3023_v61 = vld [vmem:[%s3473_s1 + $0xe8] sm:$0xff]  }
  0x18   :  { %2414 = vmatprep.subr.bf16.mxu0 %v2640_v0  ;;  %2430 = vmatprep.subr.bf16.mxu1 %v2640_v0  ;;  %v1416_v3 = vrot.slane %v2792_v30, 1  ;;  %v1018_v4 = vunpack.c.l.b16 %v958_v62  ;;  %v1418_v8 = vrot.slane %v2903_v39, 7  ;;  %v1422_v33 = vrot.slane %v2827_v47, 5  ;;  %v3070_v39 = vld [vmem:[%s3473_s1 + $0xd0] sm:$0xff]   ;;  %v3082_v47 = vld [vmem:[%s3473_s1 + $0xc8] sm:$0xff]  }
  0x19   :  { %v539_v45 = vsel %vm195_vm3, %v538_v43, %v537_v41  ;;  %v783_v50 = vsel %vm195_vm3, %v782_v46, %v781_v42  ;;  %v546_v17 = vrot.slane %v2937_v52, 1  ;;  %v2978_v23 = vunpack.c.l.b16 %v1014_v63  ;;  %v3001_v43 = vld [vmem:[%s3473_s1 + $0x60] sm:$0xff]  }
  0x1a   :  { %2395 = vmatmul.mubr.msk.bf16.vlgmr.msra.gmra.mxu0 %vm246_vm8, %v2860_v20  ;;  %2411 = vmatmul.mubr.msk.bf16.vlgmr.msra.gmra.mxu1 %vm246_vm8, %v304_v25  ;;  %v541_v54 = vsel %vm198_vm4, %v200_v53, %v539_v45  ;;  %v785_v59 = vsel %vm198_vm4, %v784_v48, %v783_v50  ;;  %v2955_v53 = vld [vmem:[%s3473_s1 + $0xa0] sm:$0xff]   ;;  %v1417_v22 = vsel %vm189_vm1, %v2804_v35, %v1416_v3  ;;  %v1420_v28 = vrot.slane %v1018_v4, 6  ;;  %v3057_v35 = vld [vmem:[%s3473_s1 + $0xd8] sm:$0xff]  }
  0x1b   :  { %2415 = vmatpush3.bf16.msra.mxu0 %v2854_v15  ;;  %2426 = vmatprep.mubr.msk.bf16.mxu0 %vm2641_vm0, %v2640_v0  ;;  %v543_v58 = vsel %vm201_vm5, %v203_v56, %v541_v54  ;;  %v788_v56 = vrot.slane %v2832_v51, 3  ;;  %v787_v21 = vsel %vm201_vm5, %v786_v55, %v785_v59  ;;  %v1419_v25 = vsel %vm192_vm2, %v1418_v8, %v1417_v22  ;;  %v3039_v3 = vld [vmem:[%s3473_s1 + $0xe0] sm:$0xff]  }
  0x1c   :  { %2416 = vmatprep.subr.bf16.mxu0 %v2640_v0  ;;  %2431 = vmatpush3.bf16.msra.mxu1 %v2868_v24  ;;  %v545_v12 = vsel %vm204_vm6, %v206_v60, %v543_v58  ;;  %v2986_v60 = vld [vmem:[%s3473_s1 + $0x98] sm:$0xff]   ;;  %v790_v34 = vrot.slane %v2937_v52, 2  ;;  %v1424_v36 = vrot.slane %v2832_v51, 4  ;;  %v1426_v38 = vrot.slane %v2937_v52, 3  ;;  %v3011_v52 = vld [vmem:[%s3473_s1 + $0x90] sm:$0xff]  }
  0x1d   :  { %2442 = vmatprep.mubr.msk.bf16.mxu1 %vm2641_vm0, %v2640_v0  ;;  %2432 = vmatprep.subr.bf16.mxu1 %v2640_v0  ;;  %v789_v27 = vsel %vm204_vm6, %v788_v56, %v787_v21  ;;  %v1421_v41 = vsel %vm195_vm3, %v1420_v28, %v1419_v25  ;;  %v1428_v42 = vrot.slane %v2978_v23, 2  ;;  %v547_v48 = vsel %vm207_vm7, %v546_v17, %v545_v12 }
  0x1e   :  { %v1423_v45 = vsel %vm198_vm4, %v1422_v33, %v1421_v41  ;;  %v791_v54 = vsel %vm207_vm7, %v790_v34, %v789_v27  ;;  %v548_v58 = vpack.c.b16 %v547_v48, %v547_v48  ;;  %v1024_v63 = vsel %vm189_vm1, %v780_v29, %v2792_v30 }
  0x1f   :  { %2417 = vmatpush3.bf16.msra.mxu0 %v2876_v26  ;;  %v1425_v50 = vsel %vm201_vm5, %v1424_v36, %v1423_v45  ;;  %v3025_v62 = vpack.c.b16 %v791_v54, %v791_v54  ;;  %v1027_v8 = vrot.slane %v1018_v4, 5  ;;  %v1026_v30 = vsel %vm192_vm2, %v782_v46, %v1024_v63 }
  0x20   :  { %2418 = vmatprep.subr.bf16.mxu0 %v2640_v0  ;;  %2433 = vmatpush3.bf16.msra.mxu1 %v2889_v31  ;;  %v1427_v57 = vsel %vm204_vm6, %v1426_v38, %v1425_v50  ;;  %v1035_v46 = vrot.slane %v2978_v23, 1 }
  0x21   :  { %2434 = vmatprep.subr.bf16.mxu1 %v2640_v0  ;;  %v3017_v59 = vsel %vm207_vm7, %v1428_v42, %v1427_v57  ;;  %v1028_v29 = vsel %vm195_vm3, %v1027_v8, %v1026_v30  ;;  %v2591_v57 = vld [vmem:[%s3475_s3] sm:$0xff]  }
  0x23   :  { %2419 = vmatpush3.bf16.msra.mxu0 %v2909_v40 }
  0x24   :  { %2420 = vmatprep.subr.bf16.mxu0 %v2640_v0  ;;  %2435 = vmatpush3.bf16.msra.mxu1 %v2924_v49 }
  0x25   :  { %2436 = vmatprep.subr.bf16.mxu1 %v2640_v0 }
  0x27   :  { %2421 = vmatpush3.bf16.msra.mxu0 %v2935_v44 }
  0x28   :  { %2422 = vmatprep.subr.bf16.mxu0 %v2640_v0  ;;  %2437 = vmatpush3.bf16.msra.mxu1 %v2955_v53 }
  0x29   :  { %2438 = vmatprep.subr.bf16.mxu1 %v2640_v0 }
  0x2b   :  { %2423 = vmatpush3.bf16.msra.mxu0 %v2966_v16 }
  0x2c   :  { %2424 = vmatprep.subr.bf16.mxu0 %v2640_v0  ;;  %2439 = vmatpush3.bf16.msra.mxu1 %v2986_v60 }
  0x2d   :  { %2440 = vmatprep.subr.bf16.mxu1 %v2640_v0 }
  0x2f   :  { %2425 = vmatpush3.bf16.msra.mxu0 %v3001_v43 }
  0x30   :  { %2446 = vmatprep.subr.bf16.mxu0 %v2640_v0  ;;  %2441 = vmatpush3.bf16.msra.mxu1 %v3011_v52 }
  0x31   :  { %2462 = vmatprep.subr.bf16.mxu1 %v2640_v0 }
  0x32   :  { %2427 = vmatmul.mubr.msk.bf16.vlgmr.msra.gmra.mxu0 %vm246_vm8, %v548_v58 }
  0x33   :  { %2447 = vmatpush3.bf16.msra.mxu0 %v3023_v61  ;;  %2458 = vmatprep.mubr.msk.bf16.mxu0 %vm2641_vm0, %v2640_v0 }
  0x34   :  { %2443 = vmatmul.mubr.msk.bf16.vlgmr.msra.gmra.mxu1 %vm246_vm8, %v3025_v62  ;;  %2448 = vmatprep.subr.bf16.mxu0 %v2640_v0 }
  0x35   :  { %2463 = vmatpush3.bf16.msra.mxu1 %v2694_v1  ;;  %2474 = vmatprep.mubr.msk.bf16.mxu1 %vm2641_vm0, %v2640_v0  ;;  %v1030_v1 = vsel %vm198_vm4, %v786_v55, %v1028_v29 }
  0x36   :  { %2464 = vmatprep.subr.bf16.mxu1 %v2640_v0 }
  0x37   :  { %2449 = vmatpush3.bf16.msra.mxu0 %v3039_v3 }
  0x38   :  { %2450 = vmatprep.subr.bf16.mxu0 %v2640_v0 }
  0x39   :  { %2465 = vmatpush3.bf16.msra.mxu1 %v2709_v6  ;;  %v1032_v6 = vsel %vm201_vm5, %v788_v56, %v1030_v1 }
  0x3a   :  { %2466 = vmatprep.subr.bf16.mxu1 %v2640_v0  ;;  %v1034_v55 = vsel %vm204_vm6, %v790_v34, %v1032_v6  ;;  %v2290_v6 = vld [vmem:[%s3476_s2] ss:$0 sm:$0xff] }
  0x3b   :  { %2451 = vmatpush3.bf16.msra.mxu0 %v3057_v35  ;;  %v1036_v51 = vsel %vm207_vm7, %v1035_v46, %v1034_v55 }
  0x3c   :  { %2452 = vmatprep.subr.bf16.mxu0 %v2640_v0  ;;  %v1037_v56 = vpack.c.b16 %v1036_v51, %v1036_v51 }
  0x3d   :  { %2467 = vmatpush3.bf16.msra.mxu1 %v2726_v10  ;;  %v3093_v10 = vld [vmem:[%s3473_s1 + $0xc0] sm:$0xff]  }
  0x3e   :  { %2468 = vmatprep.subr.bf16.mxu1 %v2640_v0 }
  0x3f   :  { %2453 = vmatpush3.bf16.msra.mxu0 %v3070_v39 }
  0x40   :  { %2454 = vmatprep.subr.bf16.mxu0 %v2640_v0 }
  0x41   :  { %2469 = vmatpush3.bf16.msra.mxu1 %v2743_v13 }
  0x42   :  { %2470 = vmatprep.subr.bf16.mxu1 %v2640_v0 }
  0x43   :  { %2455 = vmatpush3.bf16.msra.mxu0 %v3082_v47 }
  0x44   :  { %2456 = vmatprep.subr.bf16.mxu0 %v2640_v0 }
  0x45   :  { %2471 = vmatpush3.bf16.msra.mxu1 %v2764_v18 }
  0x46   :  { %2472 = vmatprep.subr.bf16.mxu1 %v2640_v0 }
  0x47   :  { %2457 = vmatpush3.bf16.msra.mxu0 %v3093_v10 }
  0x48   :  { %2478 = vmatprep.subr.bf16.mxu0 %v2640_v0 }
  0x49   :  { %2473 = vmatpush3.bf16.msra.mxu1 %v2798_v32 }
  0x4a   :  { %2459 = vmatmul.mubr.msk.bf16.vlgmr.msra.gmra.mxu0 %vm246_vm8, %v1037_v56  ;;  %2494 = vmatprep.subr.bf16.mxu1 %v2640_v0 }
  0x4b   :  { %2479 = vmatpush3.bf16.msra.mxu0 %v2699_v2  ;;  %2490 = vmatprep.mubr.msk.bf16.mxu0 %vm2641_vm0, %v2640_v0  ;;  %v1430_v2 = vpack.c.b16 %v3017_v59, %v3017_v59 }
  0x4c   :  { %2475 = vmatmul.mubr.msk.bf16.vlgmr.msra.gmra.mxu1 %vm246_vm8, %v548_v58  ;;  %2480 = vmatprep.subr.bf16.mxu0 %v2640_v0 }
  0x4d   :  { %2495 = vmatpush3.bf16.msra.mxu1 %v2854_v15  ;;  %2506 = vmatprep.mubr.msk.bf16.mxu1 %vm2641_vm0, %v2640_v0 }
  0x4e   :  { %2496 = vmatprep.subr.bf16.mxu1 %v2640_v0 }
  0x4f   :  { %2481 = vmatpush3.bf16.msra.mxu0 %v2716_v7  ;;  %v2588_v7 = vld [vmem:[%s3475_s3 + $0x18] sm:$0xff]  }
  0x50   :  { %2482 = vmatprep.subr.bf16.mxu0 %v2640_v0 }
  0x51   :  { %2497 = vmatpush3.bf16.msra.mxu1 %v2876_v26 }
  0x52   :  { %2498 = vmatprep.subr.bf16.mxu1 %v2640_v0 }
  0x53   :  { %2483 = vmatpush3.bf16.msra.mxu0 %v2733_v11  ;;  %v2589_v11 = vld [vmem:[%s3475_s3 + $0x10] sm:$0xff]  }
  0x54   :  { %2484 = vmatprep.subr.bf16.mxu0 %v2640_v0 }
  0x55   :  { %2499 = vmatpush3.bf16.msra.mxu1 %v2909_v40 }
  0x56   :  { %2500 = vmatprep.subr.bf16.mxu1 %v2640_v0 }
  0x57   :  { %2485 = vmatpush3.bf16.msra.mxu0 %v2750_v14 }
  0x58   :  { %2486 = vmatprep.subr.bf16.mxu0 %v2640_v0 }
  0x59   :  { %2501 = vmatpush3.bf16.msra.mxu1 %v2935_v44 }
  0x5a   :  { %2502 = vmatprep.subr.bf16.mxu1 %v2640_v0 }
  0x5b   :  { %2487 = vmatpush3.bf16.msra.mxu0 %v2769_v19 }
  0x5c   :  { %2488 = vmatprep.subr.bf16.mxu0 %v2640_v0 }
  0x5d   :  { %2503 = vmatpush3.bf16.msra.mxu1 %v2966_v16 }
  0x5e   :  { %2504 = vmatprep.subr.bf16.mxu1 %v2640_v0 }
  0x5f   :  { %2489 = vmatpush3.bf16.msra.mxu0 %v2812_v37 }
  0x60   :  { %2510 = vmatprep.subr.bf16.mxu0 %v2640_v0 }
  0x61   :  { %2505 = vmatpush3.bf16.msra.mxu1 %v3001_v43 }
  0x62   :  { %2491 = vmatmul.mubr.msk.bf16.vlgmr.msra.gmra.mxu0 %vm246_vm8, %v2860_v20  ;;  %2526 = vmatprep.subr.bf16.mxu1 %v2640_v0 }
  0x63   :  { %2511 = vmatpush3.bf16.msra.mxu0 %v2868_v24  ;;  %2522 = vmatprep.mubr.msk.bf16.mxu0 %vm2641_vm0, %v2640_v0 }
  0x64   :  { %2507 = vmatmul.mubr.msk.bf16.vlgmr.msra.gmra.mxu1 %vm246_vm8, %v3025_v62  ;;  %2512 = vmatprep.subr.bf16.mxu0 %v2640_v0 }
  0x65   :  { %2527 = vmatpush3.bf16.msra.mxu1 %v3023_v61  ;;  %2538 = vmatprep.mubr.msk.bf16.mxu1 %vm2641_vm0, %v2640_v0 }
  0x66   :  { %2528 = vmatprep.subr.bf16.mxu1 %v2640_v0 }
  0x67   :  { %2513 = vmatpush3.bf16.msra.mxu0 %v2889_v31 }
  0x68   :  { %2514 = vmatprep.subr.bf16.mxu0 %v2640_v0 }
  0x69   :  { %2529 = vmatpush3.bf16.msra.mxu1 %v3039_v3 }
  0x6a   :  { %2530 = vmatprep.subr.bf16.mxu1 %v2640_v0 }
  0x6b   :  { %2515 = vmatpush3.bf16.msra.mxu0 %v2924_v49 }
  0x6c   :  { %2516 = vmatprep.subr.bf16.mxu0 %v2640_v0 }
  0x6d   :  { %2531 = vmatpush3.bf16.msra.mxu1 %v3057_v35 }
  0x6e   :  { %2532 = vmatprep.subr.bf16.mxu1 %v2640_v0 }
  0x6f   :  { %2517 = vmatpush3.bf16.msra.mxu0 %v2955_v53 }
  0x70   :  { %2518 = vmatprep.subr.bf16.mxu0 %v2640_v0 }
  0x71   :  { %2533 = vmatpush3.bf16.msra.mxu1 %v3070_v39 }
  0x72   :  { %2534 = vmatprep.subr.bf16.mxu1 %v2640_v0 }
  0x73   :  { %2519 = vmatpush3.bf16.msra.mxu0 %v2986_v60 }
  0x74   :  { %2520 = vmatprep.subr.bf16.mxu0 %v2640_v0 }
  0x75   :  { %2535 = vmatpush3.bf16.msra.mxu1 %v3082_v47 }
  0x76   :  { %2536 = vmatprep.subr.bf16.mxu1 %v2640_v0 }
  0x77   :  { %2521 = vmatpush3.bf16.msra.mxu0 %v3011_v52  ;;  %v2590_v52 = vld [vmem:[%s3475_s3 + $0x8] sm:$0xff]  }
  0x78   :  { %2542 = vmatprep.subr.bf16.mxu0 %v2640_v0 }
  0x79   :  { %2537 = vmatpush3.bf16.msra.mxu1 %v3093_v10 }
  0x7a   :  { %2523 = vmatmul.mubr.msk.bf16.vlgmr.msra.gmra.mxu0 %vm246_vm8, %v1037_v56  ;;  %v2291_v56 = vld [vmem:[%s3477_s4] ss:$0 sm:$0xff] }
  0x7b   :  { %2550 = vmatprep.mubr.msk.bf16.mxu0 %vm2641_vm0, %v2640_v0  ;;  %2543 = vmatpush3.bf16.msra.mxu0 %v2588_v7 }
  0x7c   :  { %2539 = vmatmul.mubr.msk.bf16.vlgmr.msra.gmra.mxu1 %vm246_vm8, %v1430_v2  ;;  %2544 = vmatprep.subr.bf16.mxu0 %v2640_v0 }
  0x7f   :  { %2545 = vmatpush3.bf16.msra.mxu0 %v2589_v11 }
  0x80   :  { %2546 = vmatprep.subr.bf16.mxu0 %v2640_v0 }
  0x83   :  { %2547 = vmatpush3.bf16.msra.mxu0 %v2590_v52 }
  0x84   :  { %2548 = vmatprep.subr.bf16.mxu0 %v2640_v0 }
  0x87   :  { %2549 = vmatpush3.bf16.msra.mxu0 %v2591_v57 }
  0xda   :  { %v284_v13 = vpop.f32.mrf.mxu0  ;;  %v378_v14 = vpop.f32.mrf.mxu1 }
  0xdb   :  { %v379_v19 = vadd.f32 %v378_v14, %v284_v13 }
  0xdc   :  { %v2396_v18 = vpop.f32.mrf.mxu0  ;;  %v2412_v32 = vpop.f32.mrf.mxu1 }
  0xde   :  { %v287_v37 = vpop.f32.mrf.mxu0  ;;  %v381_v15 = vpop.f32.mrf.mxu1 }
  0xe0   :  { %v2397_v20 = vpop.f32.mrf.mxu0  ;;  %v2413_v24 = vpop.f32.mrf.mxu1 }
  0xf2   :  { %v622_v26 = vpop.f32.mrf.mxu0 }
  0xf3   :  { %v628_v31 = vadd.f32 %v622_v26, %v379_v19 }
  0xf4   :  { %v866_v40 = vpop.f32.mrf.mxu1  ;;  %v2428_v49 = vpop.f32.mrf.mxu0 }
  0xf5   :  { %v872_v44 = vadd.f32 %v866_v40, %v628_v31 }
  0xf6   :  { %v2444_v53 = vpop.f32.mrf.mxu1  ;;  %v625_v4 = vpop.f32.mrf.mxu0 }
  0xf8   :  { %v869_v16 = vpop.f32.mrf.mxu1  ;;  %v2429_v12 = vpop.f32.mrf.mxu0 }
  0xfa   :  { %v2445_v17 = vpop.f32.mrf.mxu1 }
 0x10a   :  { %v1111_v21 = vpop.f32.mrf.mxu0 }
 0x10b   :  { %v1117_v63 = vadd.f32 %v1111_v21, %v872_v44 }
 0x10c   :  { %v1152_v22 = vpop.f32.mrf.mxu1  ;;  %v2460_v23 = vpop.f32.mrf.mxu0 }
 0x10e   :  { %v2476_v25 = vpop.f32.mrf.mxu1  ;;  %v1114_v28 = vpop.f32.mrf.mxu0 }
 0x110   :  { %v1155_v33 = vpop.f32.mrf.mxu1  ;;  %v2461_v60 = vpop.f32.mrf.mxu0 }
 0x112   :  { %v2477_v34 = vpop.f32.mrf.mxu1 }
 0x122   :  { %v1192_v36 = vpop.f32.mrf.mxu0 }
 0x123   :  { %v1193_v50 = vadd.f32 %v1192_v36, %v1152_v22 }
 0x124   :  { %v1232_v38 = vpop.f32.mrf.mxu1  ;;  %v2492_v27 = vpop.f32.mrf.mxu0 }
 0x125   :  { %v1238_v54 = vadd.f32 %v1232_v38, %v1193_v50 }
 0x126   :  { %v2508_v41 = vpop.f32.mrf.mxu1  ;;  %v1195_v42 = vpop.f32.mrf.mxu0 }
 0x128   :  { %v1235_v43 = vpop.f32.mrf.mxu1  ;;  %v2493_v48 = vpop.f32.mrf.mxu0 }
 0x12a   :  { %v2509_v45 = vpop.f32.mrf.mxu1 }
 0x13a   :  { %v1273_v58 = vpop.f32.mrf.mxu0 }
 0x13b   :  { %v1279_v59 = vadd.f32 %v1273_v58, %v1238_v54 }
 0x13c   :  { %v1468_v61 = vpop.f32.mrf.mxu1  ;;  %v2524_v62 = vpop.f32.mrf.mxu0 }
 0x13d   :  { %v1474_v3 = vadd.f32 %v1468_v61, %v1279_v59 }
 0x13e   :  { %v2540_v8 = vpop.f32.mrf.mxu1  ;;  %v1276_v30 = vpop.f32.mrf.mxu0 }
 0x13f   :  { %v1475_v35 = vmax.f32 %v1117_v63, %v1474_v3 }
 0x140   :  { %v1471_v29 = vpop.f32.mrf.mxu1  ;;  %v2525_v1 = vpop.f32.mrf.mxu0 }
 0x141   :  { %1477 = vrot.lane.b32.xlu0 %v1475_v35, %s2643_s28 }
 0x142   :  { %v2541_v39 = vpop.f32.mrf.mxu1 }
 0x1b3   :  { %v1478_v47 = vpop.permute.xlu0 %1477 }
 0x1b4   :  { %v1480_v46 = vmax.f32 %v1475_v35, %v1478_v47 }
 0x1b6   :  { %v1488_v55 = vadd.f32 %v2290_v6, %v1480_v46 }
 0x1b8   :  { %v1489_v10 = vmax.f32 %v1488_v55, 0.0 }
 0x1ba   :  { %v1490_v51 = vpack.c.bf16 %v1489_v10, %v1489_v10 }
 0x1bc   :  { %2551 = vmatmul.mubr.msk.bf16.vlgmr.msra.gmra.mxu0 %vm1530_vm9, %v1490_v51  ;;  %v1891_v51 = vmul.u32 4, %v2720_v9 }
 0x27c   :  { %v1568_v2 = vpop.f32.mrf.mxu0 }
 0x27d   :  { %v1569_v7 = vadd.f32 %v2291_v56, %v1568_v2  ;;  %v1893_v56 = vand.u32 127, %v78_v5 }
 0x27e   :  { %v2552_v11 = vpop.f32.mrf.mxu0 }
 0x27f   :  { %v1578_v13 = vsel %vm1577_vm10, %v1569_v7, -inf  ;;  %v1575_v14 = vcombine.high %v1569_v7, %v1569_v7 }
 0x280   :  { %1579 = vmax.xlane.f32.xlu0 %v1578_v13  ;;  %v1571_v18 = vpop.f32.mrf.mxu0 }
 0x281   :  { %v1581_v19 = vsel %vm1577_vm10, %v1575_v14, -inf  ;;  %v1894_v18 = vadd.s32 %v1893_v56, %v1891_v51 }
 0x282   :  { %1582 = vmax.xlane.f32.xlu1 %v1581_v19  ;;  %v2553_v32 = vpop.f32.mrf.mxu0 }
 0x309   :  { %v1580_v37 = vpop.xlane.xlu0 %1579 }
 0x30a   :  { %v1585_v15 = vsel %vm1584_vm11, %v1580_v37, -inf }
 0x30b   :  { %v1586_v20 = vrot.slane %v1585_v15, 4  ;;  %v1583_v24 = vpop.xlane.xlu1 %1582 }
 0x30c   :  { %v1592_v26 = vsel %vm1584_vm11, %v1583_v24, -inf }
 0x30d   :  { %v1587_v31 = vmax.f32 %v1585_v15, %v1586_v20  ;;  %v1593_v40 = vrot.slane %v1592_v26, 4  ;;  %v3221_v20 = vcvt.s32.f32 %v1894_v18 }
 0x30f   :  { %v1588_v49 = vrot.slane %v1587_v31, 2  ;;  %v1594_v44 = vmax.f32 %v1592_v26, %v1593_v40 }
 0x311   :  { %v1589_v53 = vmax.f32 %v1587_v31, %v1588_v49  ;;  %v1595_v4 = vrot.slane %v1594_v44, 2 }
 0x313   :  { %v1590_v16 = vrot.slane %v1589_v53, 1  ;;  %v1596_v12 = vmax.f32 %v1594_v44, %v1595_v4 }
 0x315   :  { %v1591_v17 = vmax.f32 %v1589_v53, %v1590_v16  ;;  %v1597_v21 = vrot.slane %v1596_v12, 1 }
 0x317   :  { %v1599_v22 = vsub.f32 %v1569_v7, %v1591_v17  ;;  %v1598_v23 = vmax.f32 %v1596_v12, %v1597_v21 }
 0x319   :  { %v1601_v25 = vmul.f32 1.442695, %v1599_v22  ;;  %v1600_v28 = vsub.f32 %v1575_v14, %v1598_v23 }
 0x31b   :  { %2592 = vpow2.f32 %v1601_v25  ;;  %v1603_v33 = vmul.f32 1.442695, %v1600_v28 }
 0x31d   :  { %2594 = vpow2.f32 %v1603_v33 }
 0x328   :  { %v2593_v60 = vpop.eup %2592 }
 0x329   :  { %v1605_v34 = vsel %vm1577_vm10, %v2593_v60, 0.0 }
 0x32a   :  { %v2595_v36 = vpop.eup %2594  ;;  %1606 = vadd.xlane.f32.xlu1 %v1605_v34 }
 0x32b   :  { %v1608_v38 = vsel %vm1577_vm10, %v2595_v36, 0.0 }
 0x32e   :  { %1609 = vadd.xlane.f32.xlu1 %v1608_v38 }
 0x3b3   :  { %v1607_v27 = vpop.xlane.xlu1 %1606 }
 0x3b4   :  { %v1611_v41 = vsel %vm1584_vm11, %v1607_v27, 0.0 }
 0x3b5   :  { %v1612_v42 = vrot.slane %v1611_v41, 4 }
 0x3b7   :  { %v1613_v43 = vadd.f32 %v1612_v42, %v1611_v41  ;;  %v1610_v48 = vpop.xlane.xlu1 %1609 }
 0x3b8   :  { %v1618_v45 = vsel %vm1584_vm11, %v1610_v48, 0.0 }
 0x3b9   :  { %v1614_v50 = vrot.slane %v1613_v43, 2  ;;  %v1619_v52 = vrot.slane %v1618_v45, 4 }
 0x3bb   :  { %v1615_v54 = vadd.f32 %v1614_v50, %v1613_v43  ;;  %v1620_v57 = vadd.f32 %v1619_v52, %v1618_v45 }
 0x3bd   :  { %v1616_v58 = vrot.slane %v1615_v54, 1  ;;  %v1621_v59 = vrot.slane %v1620_v57, 2 }
 0x3bf   :  { %v1617_v61 = vadd.f32 %v1616_v58, %v1615_v54  ;;  %v1622_v62 = vadd.f32 %v1621_v59, %v1620_v57 }
 0x3c1   :  { %2596 = vlog2.f32 %v1617_v61  ;;  %v1623_v63 = vrot.slane %v1622_v62, 1 }
 0x3c3   :  { %v1624_v3 = vadd.f32 %v1623_v63, %v1622_v62 }
 0x3c5   :  { %2598 = vlog2.f32 %v1624_v3 }
 0x3ce   :  { %v2597_v8 = vpop.eup %2596 }
 0x3cf   :  { %v1626_v30 = vmul.f32 0.6931472, %v2597_v8 }
 0x3d1   :  { %v3199_v35 = vsub.f32 %v1599_v22, %v1626_v30 }
 0x3d2   :  { %v2599_v29 = vpop.eup %2598 }
 0x3d3   :  { %1631 = vst.msk [vmem:[%s3478_s6] sm:$0xf] %vm1577_vm10, %v3199_v35  ;;  %v1628_v1 = vmul.f32 0.6931472, %v2599_v29  ;;  %v1896_v39 = vsel %vm1577_vm10, %v3199_v35, -inf }
 0x3d4   :  { %1897 = vmax.xlane.f32.xlu1 %v1896_v39 }
 0x3d5   :  { %v3208_v6 = vsub.f32 %v1600_v28, %v1628_v1 }
 0x3d7   :  { %1632 = vst.msk [vmem:[%s3478_s6 + $0x4] sm:$0xf] %vm1577_vm10, %v3208_v6  ;;  %v1899_v47 = vsel %vm1577_vm10, %v3208_v6, -inf }
 0x3d8   :  { %1900 = vmax.xlane.f32.xlu1 %v1899_v47 }
 0x45d   :  { %v1898_v46 = vpop.xlane.xlu1 %1897 }
 0x45e   :  { %v1902_v55 = vsel %vm1584_vm11, %v1898_v46, -inf }
 0x45f   :  { %v1903_v10 = vrot.slane %v1902_v55, 4 }
 0x461   :  { %v1904_v2 = vmax.f32 %v1902_v55, %v1903_v10  ;;  %v1901_v7 = vpop.xlane.xlu1 %1900 }
 0x462   :  { %v1909_v11 = vsel %vm1584_vm11, %v1901_v7, -inf }
 0x463   :  { %v1905_v13 = vrot.slane %v1904_v2, 2  ;;  %v1910_v14 = vrot.slane %v1909_v11, 4 }
 0x465   :  { %v1906_v19 = vmax.f32 %v1904_v2, %v1905_v13  ;;  %v1911_v32 = vmax.f32 %v1909_v11, %v1910_v14 }
 0x467   :  { %v1907_v37 = vrot.slane %v1906_v19, 1  ;;  %v1912_v15 = vrot.slane %v1911_v32, 2 }
 0x469   :  { %v1913_v24 = vmax.f32 %v1911_v32, %v1912_v15  ;;  %v1908_v26 = vmax.f32 %v1906_v19, %v1907_v37 }
 0x46b   :  { %v1914_v31 = vrot.slane %v1913_v24, 1  ;;  %vm1916_vm12 = vcmp.eq.f32.partialorder %v3199_v35, %v1908_v26 }
 0x46c   :  { %v1918_v5 = vsel %vm1916_vm12, %v3221_v20, 16.0 }
 0x46d   :  { %v1920_v9 = vsel %vm1577_vm10, %v1918_v5, inf  ;;  %v1915_v40 = vmax.f32 %v1913_v24, %v1914_v31 }
 0x46e   :  { %1921 = vmin.xlane.f32.xlu1 %v1920_v9 }
 0x46f   :  { %vm1917_vm13 = vcmp.eq.f32.partialorder %v3208_v6, %v1915_v40 }
 0x470   :  { %v1919_v49 = vsel %vm1917_vm13, %v3221_v20, 16.0 }
 0x471   :  { %v1923_v44 = vsel %vm1577_vm10, %v1919_v49, inf }
 0x472   :  { %1924 = vmin.xlane.f32.xlu1 %v1923_v44 }
 0x4f7   :  { %v1922_v53 = vpop.xlane.xlu1 %1921 }
 0x4f8   :  { %v1926_v4 = vsel %vm1584_vm11, %v1922_v53, inf }
 0x4f9   :  { %v1927_v16 = vrot.slane %v1926_v4, 4 }
 0x4fb   :  { %v1928_v12 = vmin.f32 %v1926_v4, %v1927_v16  ;;  %v1925_v17 = vpop.xlane.xlu1 %1924 }
 0x4fc   :  { %v1933_v21 = vsel %vm1584_vm11, %v1925_v17, inf }
 0x4fd   :  { %v1929_v22 = vrot.slane %v1928_v12, 2  ;;  %v1934_v23 = vrot.slane %v1933_v21, 4 }
 0x4ff   :  { %v1930_v25 = vmin.f32 %v1928_v12, %v1929_v22  ;;  %v1935_v28 = vmin.f32 %v1933_v21, %v1934_v23 }
 0x501   :  { %v1931_v33 = vrot.slane %v1930_v25, 1  ;;  %v1936_v60 = vrot.slane %v1935_v28, 2 }
 0x503   :  { %v1932_v34 = vmin.f32 %v1930_v25, %v1931_v33  ;;  %v1937_v36 = vmin.f32 %v1935_v28, %v1936_v60 }
 0x505   :  { %v1938_v38 = vrot.slane %v1937_v36, 1  ;;  %vm1940_vm14 = vcmp.eq.f32.partialorder %v3221_v20, %v1932_v34 }
 0x506   :  { %v3233_v27 = vsel %vm1940_vm14, 1.0, %v2640_v0 }
 0x507   :  { %v1939_v41 = vmin.f32 %v1937_v36, %v1938_v38  ;;  %vm1948_vm15 = vcmp.gt.f32.partialorder %v3233_v27, 0.5  ;;  %v1633_v38 = vld [vmem:[%s3479_s5] sm:$0xf] }
 0x508   :  { %v1950_v42 = vsel %vm1948_vm15, -1e+30, %v3199_v35 }
 0x509   :  { %v1952_v43 = vsel %vm1577_vm10, %v1950_v42, -inf  ;;  %vm1941_vm0 = vcmp.eq.f32.partialorder %v3221_v20, %v1939_v41 }
 0x50a   :  { %1953 = vmax.xlane.f32.xlu1 %v1952_v43  ;;  %v3240_v48 = vsel %vm1941_vm0, 1.0, %v2640_v0 }
 0x50b   :  { %vm1949_vm1 = vcmp.gt.f32.partialorder %v3240_v48, 0.5 }
 0x50c   :  { %v1951_v45 = vsel %vm1949_vm1, -1e+30, %v3208_v6 }
 0x50d   :  { %v1955_v50 = vsel %vm1577_vm10, %v1951_v45, -inf }
 0x50e   :  { %1956 = vmax.xlane.f32.xlu1 %v1955_v50  ;;  %v1641_v50 = vadd.f32 %v1633_v38, %v3199_v35 }
 0x593   :  { %v1954_v52 = vpop.xlane.xlu1 %1953 }
 0x594   :  { %v1958_v54 = vsel %vm1584_vm11, %v1954_v52, -inf  ;;  %v1634_v52 = vld [vmem:[%s3479_s5 + $0x4] sm:$0xf] }
 0x595   :  { %v1959_v57 = vrot.slane %v1958_v54, 4 }
 0x597   :  { %v1960_v58 = vmax.f32 %v1958_v54, %v1959_v57  ;;  %v1957_v59 = vpop.xlane.xlu1 %1956  ;;  %v1637_v54 = vld [vmem:[%s3479_s5 + $0x10] sm:$0xf] }
 0x598   :  { %v1965_v61 = vsel %vm1584_vm11, %v1957_v59, -inf  ;;  %v1642_v59 = vadd.f32 %v1634_v52, %v3199_v35 }
 0x599   :  { %v1961_v62 = vrot.slane %v1960_v58, 2  ;;  %v1966_v63 = vrot.slane %v1965_v61, 4 }
 0x59b   :  { %v1962_v3 = vmax.f32 %v1960_v58, %v1961_v62  ;;  %v1967_v8 = vmax.f32 %v1965_v61, %v1966_v63  ;;  %v3287_v62 = vmul.f32 2.0, %v1641_v50 }
 0x59d   :  { %v1963_v30 = vrot.slane %v1962_v3, 1  ;;  %v1968_v29 = vrot.slane %v1967_v8, 2 }
 0x59f   :  { %v1969_v1 = vmax.f32 %v1967_v8, %v1968_v29  ;;  %v1964_v39 = vmax.f32 %v1962_v3, %v1963_v30  ;;  %v1645_v3 = vadd.f32 %v1637_v54, %v3208_v6  ;;  %v1635_v8 = vld [vmem:[%s3479_s5 + $0x8] sm:$0xf]  ;;  %v1638_v30 = vld [vmem:[%s3479_s5 + $0x14] sm:$0xf] }
 0x5a1   :  { %v1970_v47 = vrot.slane %v1969_v1, 1  ;;  %vm1972_vm2 = vcmp.eq.f32.partialorder %v1950_v42, %v1964_v39  ;;  %v1643_v39 = vadd.f32 %v1635_v8, %v3199_v35 }
 0x5a2   :  { %v1974_v46 = vsel %vm1972_vm2, %v3221_v20, 16.0 }
 0x5a3   :  { %v1976_v55 = vsel %vm1577_vm10, %v1974_v46, inf  ;;  %v1971_v10 = vmax.f32 %v1969_v1, %v1970_v47  ;;  %v3298_v1 = vmul.f32 2.0, %v1642_v59  ;;  %v1657_v47 = vsel %vm1577_vm10, %v3287_v62, -inf }
 0x5a4   :  { %1977 = vmin.xlane.f32.xlu0 %v1976_v55  ;;  %v3304_v55 = vmul.f32 2.0, %v1645_v3 }
 0x5a5   :  { %vm1973_vm3 = vcmp.eq.f32.partialorder %v1951_v45, %v1971_v10  ;;  %v1646_v10 = vadd.f32 %v1638_v30, %v3208_v6 }
 0x5a6   :  { %v1975_v51 = vsel %vm1973_vm3, %v3221_v20, 16.0 }
 0x5a7   :  { %v1979_v56 = vsel %vm1577_vm10, %v1975_v51, inf  ;;  %v1636_v51 = vld [vmem:[%s3479_s5 + $0xc] sm:$0xf] }
 0x5a8   :  { %1980 = vmin.xlane.f32.xlu1 %v1979_v56  ;;  %v1639_v56 = vld [vmem:[%s3479_s5 + $0x18] sm:$0xf] }
 0x62d   :  { %v1978_v2 = vpop.xlane.xlu0 %1977 }
 0x62e   :  { %v1982_v7 = vsel %vm1584_vm11, %v1978_v2, inf  ;;  %v3313_v2 = vmul.f32 2.0, %v1643_v39 }
 0x62f   :  { %v1983_v11 = vrot.slane %v1982_v7, 4 }
 0x631   :  { %v1984_v13 = vmin.f32 %v1982_v7, %v1983_v11  ;;  %v1981_v14 = vpop.xlane.xlu1 %1980  ;;  %v1644_v7 = vadd.f32 %v1636_v51, %v3199_v35  ;;  %v1669_v11 = vsel %vm1577_vm10, %v3304_v55, -inf  ;;  %v1663_v35 = vsel %vm1577_vm10, %v3313_v2, -inf }
 0x632   :  { %v1989_v18 = vsel %vm1584_vm11, %v1981_v14, inf  ;;  %v3320_v14 = vmul.f32 2.0, %v1646_v10 }
 0x633   :  { %v1985_v19 = vrot.slane %v1984_v13, 2  ;;  %v1990_v32 = vrot.slane %v1989_v18, 4 }
 0x635   :  { %v1986_v37 = vmin.f32 %v1984_v13, %v1985_v19  ;;  %v1991_v15 = vmin.f32 %v1989_v18, %v1990_v32  ;;  %v1660_v13 = vsel %vm1577_vm10, %v3298_v1, -inf  ;;  %v1647_v18 = vadd.f32 %v1639_v56, %v3208_v6  ;;  %v1640_v19 = vld [vmem:[%s3479_s5 + $0x1c] sm:$0xf] }
 0x636   :  { %v3326_v32 = vmul.f32 2.0, %v1644_v7 }
 0x637   :  { %v1987_v24 = vrot.slane %v1986_v37, 1  ;;  %v1992_v26 = vrot.slane %v1991_v15, 2 }
 0x639   :  { %v1988_v31 = vmin.f32 %v1986_v37, %v1987_v24  ;;  %v1993_v5 = vmin.f32 %v1991_v15, %v1992_v26  ;;  %v1672_v37 = vsel %vm1577_vm10, %v3320_v14, -inf  ;;  %v3332_v15 = vmul.f32 2.0, %v1647_v18 }
 0x63a   :  { %v1648_v24 = vadd.f32 %v1640_v19, %v3208_v6  ;;  %v1666_v26 = vsel %vm1577_vm10, %v3326_v32, -inf }
 0x63b   :  { %v1994_v9 = vrot.slane %v1993_v5, 1  ;;  %vm1996_vm4 = vcmp.eq.f32.partialorder %v3221_v20, %v1988_v31  ;;  %v1675_v31 = vsel %vm1577_vm10, %v3332_v15, -inf }
 0x63c   :  { %v3255_v40 = vsel %vm1996_vm4, 1.0, %v2640_v0 }
 0x63d   :  { %v1995_v49 = vmin.f32 %v1993_v5, %v1994_v9  ;;  %vm2004_vm5 = vcmp.gt.f32.partialorder %v3255_v40, 0.5  ;;  %v3339_v5 = vmul.f32 2.0, %v1648_v24  ;;  %v2002_v56 = vadd.f32 %v3255_v40, %v3233_v27 }
 0x63e   :  { %v3258_v44 = vsel %vm2004_vm5, -1e+30, %v1950_v42 }
 0x63f   :  { %v2008_v53 = vsel %vm1577_vm10, %v3258_v44, -inf  ;;  %vm1997_vm6 = vcmp.eq.f32.partialorder %v3221_v20, %v1995_v49  ;;  %v1678_v9 = vsel %vm1577_vm10, %v3339_v5, -inf }
 0x640   :  { %2009 = vmax.xlane.f32.xlu0 %v2008_v53  ;;  %v3264_v4 = vsel %vm1997_vm6, 1.0, %v2640_v0 }
 0x641   :  { %vm2005_vm7 = vcmp.gt.f32.partialorder %v3264_v4, 0.5 }
 0x642   :  { %v3267_v16 = vsel %vm2005_vm7, -1e+30, %v1951_v45 }
 0x643   :  { %v2011_v12 = vsel %vm1577_vm10, %v3267_v16, -inf }
 0x644   :  { %2012 = vmax.xlane.f32.xlu1 %v2011_v12 }
 0x6c9   :  { %v2010_v17 = vpop.xlane.xlu0 %2009 }
 0x6ca   :  { %v2014_v21 = vsel %vm1584_vm11, %v2010_v17, -inf }
 0x6cb   :  { %v2015_v22 = vrot.slane %v2014_v21, 4 }
 0x6cd   :  { %v2016_v23 = vmax.f32 %v2014_v21, %v2015_v22  ;;  %v2013_v25 = vpop.xlane.xlu1 %2012 }
 0x6ce   :  { %v2021_v28 = vsel %vm1584_vm11, %v2013_v25, -inf }
 0x6cf   :  { %v2017_v33 = vrot.slane %v2016_v23, 2  ;;  %v2022_v60 = vrot.slane %v2021_v28, 4 }
 0x6d1   :  { %v2018_v34 = vmax.f32 %v2016_v23, %v2017_v33  ;;  %v2023_v36 = vmax.f32 %v2021_v28, %v2022_v60 }
 0x6d3   :  { %v2019_v41 = vrot.slane %v2018_v34, 1  ;;  %v2024_v42 = vrot.slane %v2023_v36, 2 }
 0x6d5   :  { %v2025_v43 = vmax.f32 %v2023_v36, %v2024_v42  ;;  %v2020_v45 = vmax.f32 %v2018_v34, %v2019_v41 }
 0x6d7   :  { %v2026_v57 = vrot.slane %v2025_v43, 1  ;;  %vm2028_vm8 = vcmp.eq.f32.partialorder %v3258_v44, %v2020_v45 }
 0x6d8   :  { %v2030_v58 = vsel %vm2028_vm8, %v3221_v20, 16.0 }
 0x6d9   :  { %v2032_v61 = vsel %vm1577_vm10, %v2030_v58, inf  ;;  %v2027_v63 = vmax.f32 %v2025_v43, %v2026_v57 }
 0x6da   :  { %2033 = vmin.xlane.f32.xlu0 %v2032_v61 }
 0x6db   :  { %vm2029_vm9 = vcmp.eq.f32.partialorder %v3267_v16, %v2027_v63 }
 0x6dc   :  { %v2031_v29 = vsel %vm2029_vm9, %v3221_v20, 16.0 }
 0x6dd   :  { %v2035_v46 = vsel %vm1577_vm10, %v2031_v29, inf }
 0x6de   :  { %1658 = vmax.xlane.f32.xlu0 %v1657_v47  ;;  %2036 = vmin.xlane.f32.xlu1 %v2035_v46 }
 0x6e2   :  { %1670 = vmax.xlane.f32.xlu0 %v1669_v11  ;;  %1661 = vmax.xlane.f32.xlu1 %v1660_v13 }
 0x6e6   :  { %1664 = vmax.xlane.f32.xlu0 %v1663_v35  ;;  %1673 = vmax.xlane.f32.xlu1 %v1672_v37 }
 0x6ea   :  { %1667 = vmax.xlane.f32.xlu0 %v1666_v26  ;;  %1676 = vmax.xlane.f32.xlu1 %v1675_v31 }
 0x6ee   :  { %1679 = vmax.xlane.f32.xlu1 %v1678_v9 }
 0x763   :  { %v2034_v49 = vpop.xlane.xlu0 %2033 }
 0x764   :  { %v2038_v53 = vsel %vm1584_vm11, %v2034_v49, inf }
 0x765   :  { %v2039_v6 = vrot.slane %v2038_v53, 4 }
 0x767   :  { %v2040_v12 = vmin.f32 %v2038_v53, %v2039_v6  ;;  %v1659_v17 = vpop.xlane.xlu0 %1658  ;;  %v2037_v21 = vpop.xlane.xlu1 %2036 }
 0x768   :  { %v1681_v22 = vsel %vm1584_vm11, %v1659_v17, -inf  ;;  %v2045_v23 = vsel %vm1584_vm11, %v2037_v21, inf }
 0x769   :  { %v2041_v25 = vrot.slane %v2040_v12, 2  ;;  %v1682_v28 = vrot.slane %v1681_v22, 4  ;;  %v2046_v33 = vrot.slane %v2045_v23, 4 }
 0x76b   :  { %v2042_v60 = vmin.f32 %v2040_v12, %v2041_v25  ;;  %v1683_v34 = vmax.f32 %v1681_v22, %v1682_v28  ;;  %v2047_v36 = vmin.f32 %v2045_v23, %v2046_v33  ;;  %v1671_v38 = vpop.xlane.xlu0 %1670  ;;  %v1662_v41 = vpop.xlane.xlu1 %1661 }
 0x76c   :  { %v1709_v42 = vsel %vm1584_vm11, %v1671_v38, -inf  ;;  %v1688_v43 = vsel %vm1584_vm11, %v1662_v41, -inf }
 0x76d   :  { %v2043_v45 = vrot.slane %v2042_v60, 1  ;;  %v1684_v50 = vrot.slane %v1683_v34, 2  ;;  %v2048_v52 = vrot.slane %v2047_v36, 2  ;;  %v1710_v54 = vrot.slane %v1709_v42, 4 }
 0x76e   :  { %v1689_v57 = vrot.slane %v1688_v43, 4 }
 0x76f   :  { %v2044_v58 = vmin.f32 %v2042_v60, %v2043_v45  ;;  %v1685_v59 = vmax.f32 %v1683_v34, %v1684_v50  ;;  %v2049_v61 = vmin.f32 %v2047_v36, %v2048_v52  ;;  %v1711_v63 = vmax.f32 %v1709_v42, %v1710_v54  ;;  %v1665_v3 = vpop.xlane.xlu0 %1664  ;;  %v1674_v8 = vpop.xlane.xlu1 %1673 }
 0x770   :  { %v1690_v30 = vmax.f32 %v1688_v43, %v1689_v57  ;;  %v1695_v29 = vsel %vm1584_vm11, %v1665_v3, -inf  ;;  %v1716_v39 = vsel %vm1584_vm11, %v1674_v8, -inf }
 0x771   :  { %v1686_v47 = vrot.slane %v1685_v59, 1  ;;  %v2050_v46 = vrot.slane %v2049_v61, 1  ;;  %v1712_v10 = vrot.slane %v1711_v63, 2  ;;  %v1696_v51 = vrot.slane %v1695_v29, 4 }
 0x772   :  { %v1691_v7 = vrot.slane %v1690_v30, 2  ;;  %v1717_v11 = vrot.slane %v1716_v39, 4  ;;  %vm2052_vm12 = vcmp.eq.f32.partialorder %v3221_v20, %v2044_v58 }
 0x773   :  { %v1687_v13 = vmax.f32 %v1685_v59, %v1686_v47  ;;  %v2051_v18 = vmin.f32 %v2049_v61, %v2050_v46  ;;  %v1713_v19 = vmax.f32 %v1711_v63, %v1712_v10  ;;  %v1697_v35 = vmax.f32 %v1695_v29, %v1696_v51  ;;  %v1668_v37 = vpop.xlane.xlu0 %1667  ;;  %v1677_v24 = vpop.xlane.xlu1 %1676 }
 0x774   :  { %v1692_v26 = vmax.f32 %v1690_v30, %v1691_v7  ;;  %v1718_v31 = vmax.f32 %v1716_v39, %v1717_v11  ;;  %v1702_v9 = vsel %vm1584_vm11, %v1668_v37, -inf  ;;  %v1723_v49 = vsel %vm1584_vm11, %v1677_v24, -inf }
 0x775   :  { %v1737_v53 = vsub.f32 %v3287_v62, %v1687_v13  ;;  %v1714_v6 = vrot.slane %v1713_v19, 1  ;;  %v1698_v27 = vrot.slane %v1697_v35, 2  ;;  %v1703_v40 = vrot.slane %v1702_v9, 4 }
 0x776   :  { %v1693_v12 = vrot.slane %v1692_v26, 1  ;;  %v1719_v17 = vrot.slane %v1718_v31, 2  ;;  %v1724_v21 = vrot.slane %v1723_v49, 4  ;;  %v2303_v22 = vsel %vm2052_vm12, 1.0, %v2640_v0 }
 0x777   :  { %v1745_v23 = vmul.f32 1.442695, %v1737_v53  ;;  %v1715_v25 = vmax.f32 %v1713_v19, %v1714_v6  ;;  %v1699_v28 = vmax.f32 %v1697_v35, %v1698_v27  ;;  %v1704_v33 = vmax.f32 %v1702_v9, %v1703_v40  ;;  %v1680_v52 = vpop.xlane.xlu1 %1679 }
 0x778   :  { %v1694_v60 = vmax.f32 %v1692_v26, %v1693_v12  ;;  %v1720_v34 = vmax.f32 %v1718_v31, %v1719_v17  ;;  %v1725_v36 = vmax.f32 %v1723_v49, %v1724_v21  ;;  %vm2060_vm13 = vcmp.gt.f32.partialorder %v2303_v22, 0.5 }
 0x779   :  { %2600 = vpow2.f32 %v1745_v23  ;;  %v1741_v62 = vsub.f32 %v3304_v55, %v1715_v25  ;;  %v1700_v38 = vrot.slane %v1699_v28, 1  ;;  %v1705_v41 = vrot.slane %v1704_v33, 2 }
 0x77a   :  { %v1738_v42 = vsub.f32 %v3298_v1, %v1694_v60  ;;  %v1721_v43 = vrot.slane %v1720_v34, 1  ;;  %v1726_v45 = vrot.slane %v1725_v36, 2  ;;  %v3362_v50 = vsel %vm2060_vm13, -1e+30, %v3258_v44 }
 0x77b   :  { %v1753_v54 = vmul.f32 1.442695, %v1741_v62  ;;  %v1701_v57 = vmax.f32 %v1699_v28, %v1700_v38  ;;  %v1706_v58 = vmax.f32 %v1704_v33, %v1705_v41  ;;  %v2064_v59 = vsel %vm1577_vm10, %v3362_v50, -inf }
 0x77c   :  { %v1747_v61 = vmul.f32 1.442695, %v1738_v42  ;;  %v1722_v63 = vmax.f32 %v1720_v34, %v1721_v43  ;;  %v1727_v3 = vmax.f32 %v1725_v36, %v1726_v45  ;;  %2065 = vmax.xlane.f32.xlu0 %v2064_v59  ;;  %v3366_v55 = vadd.f32 %v2303_v22, %v2002_v56 }
 0x77d   :  { %2602 = vpow2.f32 %v1753_v54  ;;  %v1739_v1 = vsub.f32 %v3313_v2, %v1701_v57  ;;  %v1707_v8 = vrot.slane %v1706_v58, 1  ;;  %v1730_v44 = vsel %vm1584_vm11, %v1680_v52, -inf }
 0x77e   :  { %2604 = vpow2.f32 %v1747_v61  ;;  %v1742_v30 = vsub.f32 %v3320_v14, %v1722_v63  ;;  %v1728_v29 = vrot.slane %v1727_v3, 1  ;;  %v1731_v39 = vrot.slane %v1730_v44, 4 }
 0x77f   :  { %v2003_v47 = vadd.f32 %v3264_v4, %v3240_v48  ;;  %v1749_v46 = vmul.f32 1.442695, %v1739_v1  ;;  %v1708_v10 = vmax.f32 %v1706_v58, %v1707_v8  ;;  %vm2053_vm14 = vcmp.eq.f32.partialorder %v3221_v20, %v2051_v18 }
 0x780   :  { %v1755_v51 = vmul.f32 1.442695, %v1742_v30  ;;  %v1729_v56 = vmax.f32 %v1727_v3, %v1728_v29  ;;  %v1732_v7 = vmax.f32 %v1730_v44, %v1731_v39  ;;  %v2304_v2 = vsel %vm2053_vm14, 1.0, %v2640_v0 }
 0x781   :  { %2606 = vpow2.f32 %v1749_v46  ;;  %v1740_v11 = vsub.f32 %v3326_v32, %v1708_v10  ;;  %vm2061_vm15 = vcmp.gt.f32.partialorder %v2304_v2, 0.5  ;;  %v3376_v13 = vadd.f32 %v2304_v2, %v2003_v47 }
 0x782   :  { %2608 = vpow2.f32 %v1755_v51  ;;  %v1743_v14 = vsub.f32 %v3332_v15, %v1729_v56  ;;  %v1733_v19 = vrot.slane %v1732_v7, 2  ;;  %v3380_v48 = vsel %vm2061_vm15, -1e+30, %v3267_v16 }
 0x783   :  { %v1751_v4 = vmul.f32 1.442695, %v1740_v11  ;;  %v2067_v18 = vsel %vm1577_vm10, %v3380_v48, -inf }
 0x784   :  { %v1757_v35 = vmul.f32 1.442695, %v1743_v14  ;;  %v1734_v37 = vmax.f32 %v1732_v7, %v1733_v19  ;;  %2068 = vmax.xlane.f32.xlu1 %v2067_v18 }
 0x785   :  { %2610 = vpow2.f32 %v1751_v4 }
 0x786   :  { %v3384_v24 = vpop.eup %2600  ;;  %2612 = vpow2.f32 %v1757_v35  ;;  %v1735_v32 = vrot.slane %v1734_v37, 1 }
 0x787   :  { %v1761_v26 = vsel %vm1577_vm10, %v3384_v24, 0.0 }
 0x788   :  { %v1736_v15 = vmax.f32 %v1734_v37, %v1735_v32  ;;  %1762 = vadd.xlane.f32.xlu0 %v1761_v26 }
 0x78a   :  { %v3388_v31 = vpop.eup %2602  ;;  %v1744_v16 = vsub.f32 %v3339_v5, %v1736_v15 }
 0x78b   :  { %v3391_v9 = vpop.eup %2604  ;;  %v1773_v49 = vsel %vm1577_vm10, %v3388_v31, 0.0 }
 0x78c   :  { %v1759_v53 = vmul.f32 1.442695, %v1744_v16  ;;  %1774 = vadd.xlane.f32.xlu0 %v1773_v49  ;;  %v1764_v6 = vsel %vm1577_vm10, %v3391_v9, 0.0 }
 0x78d   :  { %1765 = vadd.xlane.f32.xlu1 %v1764_v6 }
 0x78e   :  { %v3397_v27 = vpop.eup %2606  ;;  %2614 = vpow2.f32 %v1759_v53 }
 0x78f   :  { %v3399_v40 = vpop.eup %2608  ;;  %v1767_v12 = vsel %vm1577_vm10, %v3397_v27, 0.0 }
 0x790   :  { %1768 = vadd.xlane.f32.xlu0 %v1767_v12  ;;  %v1776_v5 = vsel %vm1577_vm10, %v3399_v40, 0.0 }
 0x791   :  { %1777 = vadd.xlane.f32.xlu1 %v1776_v5 }
 0x792   :  { %v3405_v17 = vpop.eup %2610 }
 0x793   :  { %v3407_v21 = vpop.eup %2612  ;;  %v1770_v22 = vsel %vm1577_vm10, %v3405_v17, 0.0 }
 0x794   :  { %1771 = vadd.xlane.f32.xlu0 %v1770_v22  ;;  %v1779_v23 = vsel %vm1577_vm10, %v3407_v21, 0.0 }
 0x795   :  { %1780 = vadd.xlane.f32.xlu1 %v1779_v23 }
 0x79b   :  { %v3413_v25 = vpop.eup %2614 }
 0x79c   :  { %v1782_v28 = vsel %vm1577_vm10, %v3413_v25, 0.0 }
 0x79d   :  { %1783 = vadd.xlane.f32.xlu1 %v1782_v28 }
 0x805   :  { %v2066_v33 = vpop.xlane.xlu0 %2065 }
 0x806   :  { %v2070_v60 = vsel %vm1584_vm11, %v2066_v33, -inf }
 0x807   :  { %v2071_v34 = vrot.slane %v2070_v60, 4 }
 0x809   :  { %v2072_v36 = vmax.f32 %v2070_v60, %v2071_v34 }
 0x80b   :  { %v2073_v62 = vrot.slane %v2072_v36, 2 }
 0x80d   :  { %v2074_v38 = vmax.f32 %v2072_v36, %v2073_v62  ;;  %v2069_v41 = vpop.xlane.xlu1 %2068 }
 0x80e   :  { %v2077_v42 = vsel %vm1584_vm11, %v2069_v41, -inf }
 0x80f   :  { %v2075_v43 = vrot.slane %v2074_v38, 1  ;;  %v2078_v45 = vrot.slane %v2077_v42, 4 }
 0x811   :  { %v2079_v52 = vmax.f32 %v2077_v42, %v2078_v45  ;;  %v2076_v54 = vmax.f32 %v2074_v38, %v2075_v43  ;;  %v1763_v57 = vpop.xlane.xlu0 %1762 }
 0x812   :  { %v1785_v58 = vsel %vm1584_vm11, %v1763_v57, 0.0 }
 0x813   :  { %v2080_v59 = vrot.slane %v2079_v52, 2  ;;  %vm2084_vm0 = vcmp.eq.f32.partialorder %v3362_v50, %v2076_v54  ;;  %v1786_v61 = vrot.slane %v1785_v58, 4 }
 0x814   :  { %v2086_v63 = vsel %vm2084_vm0, %v3221_v20, 16.0 }
 0x815   :  { %v2081_v3 = vmax.f32 %v2079_v52, %v2080_v59  ;;  %v2088_v1 = vsel %vm1577_vm10, %v2086_v63, inf  ;;  %v1787_v8 = vadd.f32 %v1786_v61, %v1785_v58  ;;  %v1775_v44 = vpop.xlane.xlu0 %1774 }
 0x816   :  { %2089 = vmin.xlane.f32.xlu0 %v2088_v1  ;;  %v1813_v30 = vsel %vm1584_vm11, %v1775_v44, 0.0  ;;  %v1766_v29 = vpop.xlane.xlu1 %1765 }
 0x817   :  { %v2082_v39 = vrot.slane %v2081_v3, 1  ;;  %v1788_v47 = vrot.slane %v1787_v8, 2  ;;  %v1814_v46 = vrot.slane %v1813_v30, 4  ;;  %v1792_v10 = vsel %vm1584_vm11, %v1766_v29, 0.0 }
 0x818   :  { %v1793_v51 = vrot.slane %v1792_v10, 4 }
 0x819   :  { %v1789_v56 = vadd.f32 %v1788_v47, %v1787_v8  ;;  %v2083_v50 = vmax.f32 %v2081_v3, %v2082_v39  ;;  %v1815_v7 = vadd.f32 %v1814_v46, %v1813_v30  ;;  %v1769_v2 = vpop.xlane.xlu0 %1768 }
 0x81a   :  { %v1794_v11 = vadd.f32 %v1793_v51, %v1792_v10  ;;  %v1799_v14 = vsel %vm1584_vm11, %v1769_v2, 0.0  ;;  %v1778_v19 = vpop.xlane.xlu1 %1777 }
 0x81b   :  { %v1790_v4 = vrot.slane %v1789_v56, 1  ;;  %vm2085_vm1 = vcmp.eq.f32.partialorder %v3380_v48, %v2083_v50  ;;  %v1800_v18 = vrot.slane %v1799_v14, 4  ;;  %v1816_v37 = vrot.slane %v1815_v7, 2 }
 0x81c   :  { %v2087_v35 = vsel %vm2085_vm1, %v3221_v20, 16.0  ;;  %v1795_v32 = vrot.slane %v1794_v11, 2  ;;  %v1820_v26 = vsel %vm1584_vm11, %v1778_v19, 0.0 }
 0x81d   :  { %v2091_v15 = vsel %vm1577_vm10, %v2087_v35, inf  ;;  %v1801_v16 = vadd.f32 %v1800_v18, %v1799_v14  ;;  %v1772_v49 = vpop.xlane.xlu0 %1771  ;;  %v1821_v6 = vrot.slane %v1820_v26, 4  ;;  %v1791_v22 = vadd.f32 %v1790_v4, %v1789_v56 }
 0x81e   :  { %2092 = vmin.xlane.f32.xlu1 %v2091_v15  ;;  %v1796_v53 = vadd.f32 %v1795_v32, %v1794_v11  ;;  %v1806_v12 = vsel %vm1584_vm11, %v1772_v49, 0.0  ;;  %v1781_v5 = vpop.xlane.xlu1 %1780  ;;  %v1817_v28 = vadd.f32 %v1816_v37, %v1815_v7 }
 0x81f   :  { %v1802_v23 = vrot.slane %v1801_v16, 2  ;;  %v1807_v48 = vrot.slane %v1806_v12, 4  ;;  %v1822_v60 = vadd.f32 %v1821_v6, %v1820_v26  ;;  %v1827_v34 = vsel %vm1584_vm11, %v1781_v5, 0.0 }
 0x820   :  { %v1797_v33 = vrot.slane %v1796_v53, 1  ;;  %v1828_v38 = vrot.slane %v1827_v34, 4  ;;  %2616 = vrcp.f32 %v1791_v22  ;;  %v1818_v54 = vrot.slane %v1817_v28, 1 }
 0x821   :  { %v1803_v36 = vadd.f32 %v1802_v23, %v1801_v16  ;;  %v1808_v62 = vadd.f32 %v1807_v48, %v1806_v12  ;;  %v1823_v42 = vrot.slane %v1822_v60, 2 }
 0x822   :  { %v1798_v41 = vadd.f32 %v1797_v33, %v1796_v53  ;;  %v1829_v52 = vadd.f32 %v1828_v38, %v1827_v34  ;;  %v1819_v30 = vadd.f32 %v1818_v54, %v1817_v28 }
 0x823   :  { %v1804_v43 = vrot.slane %v1803_v36, 1  ;;  %v1809_v45 = vrot.slane %v1808_v62, 2  ;;  %v1824_v57 = vadd.f32 %v1823_v42, %v1822_v60 }
 0x824   :  { %2618 = vrcp.f32 %v1798_v41  ;;  %v1830_v61 = vrot.slane %v1829_v52, 2 }
 0x825   :  { %v1805_v58 = vadd.f32 %v1804_v43, %v1803_v36  ;;  %v1810_v59 = vadd.f32 %v1809_v45, %v1808_v62  ;;  %v1825_v63 = vrot.slane %v1824_v57, 1 }
 0x826   :  { %v1784_v3 = vpop.xlane.xlu1 %1783  ;;  %v1831_v8 = vadd.f32 %v1830_v61, %v1829_v52 }
 0x827   :  { %2620 = vrcp.f32 %v1805_v58  ;;  %v1811_v1 = vrot.slane %v1810_v59, 1  ;;  %v1834_v44 = vsel %vm1584_vm11, %v1784_v3, 0.0  ;;  %v1826_v29 = vadd.f32 %v1825_v63, %v1824_v57 }
 0x828   :  { %v1835_v39 = vrot.slane %v1834_v44, 4  ;;  %v1832_v46 = vrot.slane %v1831_v8, 1 }
 0x829   :  { %v1812_v47 = vadd.f32 %v1811_v1, %v1810_v59  ;;  %2622 = vrcp.f32 %v1826_v29 }
 0x82a   :  { %v1836_v10 = vadd.f32 %v1835_v39, %v1834_v44  ;;  %v1833_v51 = vadd.f32 %v1832_v46, %v1831_v8 }
 0x82b   :  { %2624 = vrcp.f32 %v1812_v47 }
 0x82c   :  { %2626 = vrcp.f32 %v1819_v30  ;;  %v1837_v56 = vrot.slane %v1836_v10, 2 }
 0x82d   :  { %2628 = vrcp.f32 %v1833_v51  ;;  %v2617_v7 = vpop.eup %2616 }
 0x82e   :  { %v1838_v50 = vadd.f32 %v1837_v56, %v1836_v10  ;;  %v1842_v4 = vmul.f32 %v2617_v7, %v3384_v24 }
 0x830   :  { %v1839_v2 = vrot.slane %v1838_v50, 1  ;;  %v1857_v26 = vsel %vm1577_vm10, %v1842_v4, 0.0 }
 0x831   :  { %v2619_v11 = vpop.eup %2618 }
 0x832   :  { %v1844_v14 = vmul.f32 %v2619_v11, %v3391_v9  ;;  %v1840_v19 = vadd.f32 %v1839_v2, %v1838_v50 }
 0x834   :  { %v2621_v18 = vpop.eup %2620  ;;  %2630 = vrcp.f32 %v1840_v19  ;;  %v1858_v35 = vsel %vm1577_vm10, %v1844_v14, 0.0 }
 0x835   :  { %v1846_v37 = vmul.f32 %v2621_v18, %v3397_v27  ;;  %v1859_v49 = vadd.f32 %v1858_v35, %v1857_v26 }
 0x836   :  { %v2623_v32 = vpop.eup %2622 }
 0x837   :  { %v1860_v15 = vsel %vm1577_vm10, %v1846_v37, 0.0  ;;  %v1852_v24 = vmul.f32 %v2623_v32, %v3399_v40 }
 0x838   :  { %v2625_v16 = vpop.eup %2624  ;;  %v1861_v12 = vadd.f32 %v1860_v15, %v1859_v49 }
 0x839   :  { %v2627_v53 = vpop.eup %2626  ;;  %v1848_v6 = vmul.f32 %v2625_v16, %v3405_v17  ;;  %v1865_v48 = vsel %vm1577_vm10, %v1852_v24, 0.0 }
 0x83a   :  { %v2629_v9 = vpop.eup %2628  ;;  %v1850_v22 = vmul.f32 %v2627_v53, %v3388_v31 }
 0x83b   :  { %v1862_v5 = vsel %vm1577_vm10, %v1848_v6, 0.0  ;;  %v1854_v27 = vmul.f32 %v2629_v9, %v3407_v21 }
 0x83c   :  { %v1863_v23 = vadd.f32 %v1862_v5, %v1861_v12  ;;  %v1864_v33 = vsel %vm1577_vm10, %v1850_v22, 0.0 }
 0x83d   :  { %v1867_v34 = vsel %vm1577_vm10, %v1854_v27, 0.0  ;;  %v1866_v36 = vadd.f32 %v1865_v48, %v1864_v33 }
 0x83e   :  { %v2297_v28 = vadd.f32 -0.5, %v1863_v23 }
 0x83f   :  { %v1868_v38 = vadd.f32 %v1867_v34, %v1866_v36 }
 0x840   :  { %v1873_v60 = vsub.f32 0.0, %v2297_v28 }
 0x841   :  { %v2631_v17 = vpop.eup %2630 }
 0x842   :  { %v1875_v62 = vmul.f32 10.0, %v1873_v60  ;;  %v1856_v40 = vmul.f32 %v2631_v17, %v3413_v25 }
 0x844   :  { %v1877_v41 = vmul.f32 1.442695, %v1875_v62  ;;  %v1869_v31 = vsel %vm1577_vm10, %v1856_v40, 0.0 }
 0x845   :  { %v1870_v42 = vadd.f32 %v1869_v31, %v1868_v38 }
 0x846   :  { %2632 = vpow2.f32 %v1877_v41 }
 0x847   :  { %v2298_v21 = vadd.f32 -0.5, %v1870_v42 }
 0x849   :  { %v1874_v43 = vsub.f32 0.0, %v2298_v21 }
 0x84b   :  { %v1876_v45 = vmul.f32 10.0, %v1874_v43 }
 0x84d   :  { %v1879_v52 = vmul.f32 1.442695, %v1876_v45 }
 0x84f   :  { %2634 = vpow2.f32 %v1879_v52 }
 0x853   :  { %v2633_v54 = vpop.eup %2632 }
 0x854   :  { %v1881_v57 = vadd.f32 1.0, %v2633_v54 }
 0x856   :  { %2636 = vrcp.f32 %v1881_v57 }
 0x85c   :  { %v2635_v58 = vpop.eup %2634 }
 0x85d   :  { %v1882_v59 = vadd.f32 1.0, %v2635_v58 }
 0x85f   :  { %2638 = vrcp.f32 %v1882_v59 }
 0x863   :  { %v2637_v61 = vpop.eup %2636 }
 0x864   :  { %1887 = vst.msk [vmem:[%s3480_s7] sm:$0xf] %vm1577_vm10, %v2637_v61 }
 0x86c   :  { %v2639_v25 = vpop.eup %2638 }
 0x86d   :  { %1888 = vst.msk [vmem:[%s3480_s7 + $0x4] sm:$0xf] %vm1577_vm10, %v2639_v25 }
 0x89f   :  { %v2090_v63 = vpop.xlane.xlu0 %2089 }
 0x8a0   :  { %v2094_v3 = vsel %vm1584_vm11, %v2090_v63, inf }
 0x8a1   :  { %v2095_v1 = vrot.slane %v2094_v3, 4 }
 0x8a3   :  { %v2096_v8 = vmin.f32 %v2094_v3, %v2095_v1 }
 0x8a5   :  { %v2097_v44 = vrot.slane %v2096_v8, 2 }
 0x8a7   :  { %v2098_v30 = vmin.f32 %v2096_v8, %v2097_v44  ;;  %v2093_v29 = vpop.xlane.xlu1 %2092 }
 0x8a8   :  { %v2101_v39 = vsel %vm1584_vm11, %v2093_v29, inf }
 0x8a9   :  { %v2099_v47 = vrot.slane %v2098_v30, 1  ;;  %v2102_v46 = vrot.slane %v2101_v39, 4 }
 0x8ab   :  { %v2100_v10 = vmin.f32 %v2098_v30, %v2099_v47  ;;  %v2103_v51 = vmin.f32 %v2101_v39, %v2102_v46 }
 0x8ad   :  { %vm2108_vm2 = vcmp.eq.f32.partialorder %v3221_v20, %v2100_v10  ;;  %v2104_v56 = vrot.slane %v2103_v51, 2 }
 0x8ae   :  { %v2305_v50 = vsel %vm2108_vm2, 1.0, %v2640_v0 }
 0x8af   :  { %v2114_v7 = vadd.f32 %v2305_v50, %v3366_v55  ;;  %v2105_v2 = vmin.f32 %v2103_v51, %v2104_v56 }
 0x8b1   :  { %2116 = vst.msk [vmem:[%s3481_s8] sm:$0xf] %vm1577_vm10, %v2114_v7  ;;  %v2106_v11 = vrot.slane %v2105_v2, 1 }
 0x8b3   :  { %v2107_v14 = vmin.f32 %v2105_v2, %v2106_v11 }
 0x8b5   :  { %vm2109_vm11 = vcmp.eq.f32.partialorder %v3221_v20, %v2107_v14 }
 0x8b6   :  { %v2306_v19 = vsel %vm2109_vm11, 1.0, %v2640_v0 }
 0x8b7   :  { %v2115_v4 = vadd.f32 %v2306_v19, %v3376_v13 }
 0x8b9   :  { %2117 = vst.msk [vmem:[%s3481_s8 + $0x4] sm:$0xf] %vm1577_vm10, %v2115_v4 }

</bundles_post_ra>
